<compile_context>
chip_gen: v6e
topology: v6e:2x2x1
jax: 0.10.0
libtpu: 0.0.40
codegen_flags: <defaults>
</compile_context>

<pallas_src>
import math

import jax
import jax.numpy as jnp
from jax.experimental import pallas as pl
from jax.experimental.pallas import tpu as pltpu

K_IN = 28 * 28   # 784 (multiple of 16; no K padding needed)
N_HID = 512
N_OUT = 10
N_PAD = 128      # lane-dense padded logits width


def _round_up(x, m):
    return ((x + m - 1) // m) * m


def mlp_kernel(x_ref, w1_ref, b1_ref, w2_ref, b2_ref, w3_ref, b3_ref, out_ref):
    # x tile arrives f32 (TM, 784); cast to bf16 in-register for the MXU.
    xb = x_ref[...].astype(jnp.bfloat16)
    # Layer 1: (TM,784)bf16 @ (784,512)bf16 -> f32 acc; bias+ReLU in bias dtype.
    h1 = jnp.dot(xb, w1_ref[...], preferred_element_type=jnp.float32)
    h1 = jnp.maximum(h1.astype(b1_ref.dtype) + b1_ref[...], 0).astype(jnp.bfloat16)
    # Layer 2: (TM,512)bf16 @ (512,512)bf16 -> f32 acc; bias+ReLU in bias dtype.
    h2 = jnp.dot(h1, w2_ref[...], preferred_element_type=jnp.float32)
    h2 = jnp.maximum(h2.astype(b2_ref.dtype) + b2_ref[...], 0).astype(jnp.bfloat16)
    # Layer 3: (TM,512)bf16 @ (512,128)bf16 -> f32 acc; bias add in f32.
    logits = jnp.dot(h2, w3_ref[...], preferred_element_type=jnp.float32)
    out_ref[...] = (logits + b3_ref[...]).astype(out_ref.dtype)


def init_params(key):
    """PyTorch nn.Linear-style init (uniform +-1/sqrt(fan_in)).
    Weights stored as (in_features, out_features) = W.T of torch; biases (1, out)."""
    dims = [(K_IN, N_HID), (N_HID, N_HID), (N_HID, N_OUT)]
    params = []
    for i, (fan_in, fan_out) in enumerate(dims):
        kw, kb = jax.random.split(jax.random.fold_in(key, i))
        bound = 1.0 / math.sqrt(fan_in)
        w = jax.random.uniform(kw, (fan_in, fan_out), jnp.float32, -bound, bound)
        b = jax.random.uniform(kb, (1, fan_out), jnp.float32, -bound, bound)
        params.extend([w, b])
    return tuple(params)


def _bf16_epilogue_ok():
    """bf16 bias+ReLU only where the VPU supports packed bf16 (v6e/v7x)."""
    try:
        kind = jax.devices()[0].device_kind.lower()
    except Exception:
        return True
    return not any(t in kind for t in ("v2", "v3", "v4", "v5"))


def prepare_params(params, *, bf16_epilogue=None):
    """One-time cast/pad: bf16 weights (w3 lane-padded 10->128 with zeros),
    hidden-layer biases in the epilogue dtype, final bias f32 (lane-padded)."""
    if bf16_epilogue is None:
        bf16_epilogue = _bf16_epilogue_ok()
    e_dt = jnp.bfloat16 if bf16_epilogue else jnp.float32
    w1, b1, w2, b2, w3, b3 = params
    w1_p = w1.astype(jnp.bfloat16)                    # (784, 512), no K padding
    w2_p = w2.astype(jnp.bfloat16)
    w3_p = jnp.zeros((N_HID, N_PAD), jnp.bfloat16).at[:, :N_OUT].set(
        w3.astype(jnp.bfloat16))
    b1_p = b1.astype(e_dt)
    b2_p = b2.astype(e_dt)
    b3_p = jnp.zeros((1, N_PAD), jnp.float32).at[:, :N_OUT].set(b3.astype(jnp.float32))
    return w1_p, b1_p, w2_p, b2_p, w3_p, b3_p


def _choose_tm(B, tm_max):
    """Batch tile: multiple of 8 sublanes; at most tm_max; split mid-size batches
    into >= 2 grid steps so the parallel axis can use both v7x TensorCores."""
    b8 = _round_up(B, 8)
    if b8 <= tm_max:
        if b8 >= 512:
            return _round_up(b8 // 2, 8)
        return b8
    return tm_max


def neural_network_forward(x_nchw, prepared, *, tm=1024):
    """x_nchw: (B, 1, 28, 28) float32. Returns logits (B, 10) float32."""
    w1_p, b1_p, w2_p, b2_p, w3_p, b3_p = prepared
    B = x_nchw.shape[0]
    x_flat = x_nchw.reshape(B, -1).astype(jnp.float32)   # nn.Flatten: (B, 784)

    TM = _choose_tm(B, tm)
    grid = (pl.cdiv(B, TM),)   # ragged last block handled by Pallas (masked writes)

    def run(single_buffer_weights):
        if single_buffer_weights:
            res = lambda shape: pl.BlockSpec(shape, lambda i: (0, 0),
                                             pipeline_mode=pl.Buffered(1))
        else:
            res = lambda shape: pl.BlockSpec(shape, lambda i: (0, 0))
        return pl.pallas_call(
            mlp_kernel,
            out_shape=jax.ShapeDtypeStruct((B, N_PAD), jnp.float32),
            grid=grid,
            in_specs=[
                pl.BlockSpec((TM, K_IN), lambda i: (i, 0)),
                res(w1_p.shape), res(b1_p.shape),
                res(w2_p.shape), res(b2_p.shape),
                res(w3_p.shape), res(b3_p.shape),
            ],
            out_specs=pl.BlockSpec((TM, N_PAD), lambda i: (i, 0)),
            compiler_params=pltpu.CompilerParams(
                dimension_semantics=("parallel",),
                vmem_limit_bytes=32 << 20,
            ),
        )(x_flat, w1_p, b1_p, w2_p, b2_p, w3_p, b3_p)

    try:
        out = run(True)
    except Exception:
        # Fallback if this JAX version rejects single-buffered resident blocks.
        out = run(False)
    return out[:, :N_OUT]


if __name__ == "__main__":
    key = jax.random.PRNGKey(0)
    params = init_params(key)
    bf16_ep = _bf16_epilogue_ok()
    prepared = prepare_params(params, bf16_epilogue=bf16_ep)

    # MNIST-like input: batch=8, NCHW (8, 1, 28, 28)
    B = 8
    x = jax.random.normal(jax.random.fold_in(key, 100), (B, 1, 28, 28), jnp.float32)

    logits = neural_network_forward(x, prepared)
    jax.block_until_ready(logits)
    assert logits.shape == (B, N_OUT)

    # Pure-JAX reference matching the kernel's precision choices
    # (bf16 MXU inputs, f32 accumulation, epilogue in the same dtype).
    w1, b1, w2, b2, w3, b3 = params
    e_dt = jnp.bfloat16 if bf16_ep else jnp.float32
    bf = lambda a: a.astype(jnp.bfloat16)
    xf = bf(x.reshape(B, -1))
    h1 = jnp.dot(xf, bf(w1), preferred_element_type=jnp.float32)
    h1 = jnp.maximum(h1.astype(e_dt) + b1.astype(e_dt), 0).astype(jnp.bfloat16)
    h2 = jnp.dot(h1, bf(w2), preferred_element_type=jnp.float32)
    h2 = jnp.maximum(h2.astype(e_dt) + b2.astype(e_dt), 0).astype(jnp.bfloat16)
    ref = jnp.dot(h2, bf(w3), preferred_element_type=jnp.float32) + b3

    assert jnp.allclose(logits, ref.astype(jnp.float32), atol=2e-2, rtol=2e-2), (
        float(jnp.max(jnp.abs(logits - ref))))

    print("KERNEL_OK")
</pallas_src>

<mosaic_0001>
module attributes {stable_mosaic.version = 11 : i64} {
  func.func @mlp_kernel(%arg0: i32, %arg1: memref<8x784xf32, #tpu.memory_space<vmem>>, %arg2: memref<784x512xbf16, #tpu.memory_space<vmem>>, %arg3: memref<1x512xbf16, #tpu.memory_space<vmem>>, %arg4: memref<512x512xbf16, #tpu.memory_space<vmem>>, %arg5: memref<1x512xbf16, #tpu.memory_space<vmem>>, %arg6: memref<512x128xbf16, #tpu.memory_space<vmem>>, %arg7: memref<1x128xf32, #tpu.memory_space<vmem>>, %arg8: memref<8x128xf32, #tpu.memory_space<vmem>>) attributes {dimension_semantics = [#tpu.dimension_semantics<parallel>], iteration_bounds = array<i64: 1>, scalar_prefetch = 0 : i64, scratch_operands = 0 : i64, tpu.core_type = #tpu.core_type<tc>, window_params = [{transform_indices = @transform_0, window_bounds = array<i64: 8, 784>}, {pipeline_mode = #tpu.pipeline_mode<synchronous>, transform_indices = @transform_1, window_bounds = array<i64: 784, 512>}, {pipeline_mode = #tpu.pipeline_mode<synchronous>, transform_indices = @transform_2, window_bounds = array<i64: 1, 512>}, {pipeline_mode = #tpu.pipeline_mode<synchronous>, transform_indices = @transform_3, window_bounds = array<i64: 512, 512>}, {pipeline_mode = #tpu.pipeline_mode<synchronous>, transform_indices = @transform_4, window_bounds = array<i64: 1, 512>}, {pipeline_mode = #tpu.pipeline_mode<synchronous>, transform_indices = @transform_5, window_bounds = array<i64: 512, 128>}, {pipeline_mode = #tpu.pipeline_mode<synchronous>, transform_indices = @transform_6, window_bounds = array<i64: 1, 128>}, {transform_indices = @transform_7, window_bounds = array<i64: 8, 128>}]} {
    %c0 = arith.constant 0 : index
    %c0_0 = arith.constant 0 : index
    %0 = vector.load %arg1[%c0, %c0_0] : memref<8x784xf32, #tpu.memory_space<vmem>>, vector<8x784xf32>
    %1 = arith.truncf %0 : vector<8x784xf32> to vector<8x784xbf16>
    %c0_1 = arith.constant 0 : index
    %c0_2 = arith.constant 0 : index
    %2 = vector.load %arg2[%c0_1, %c0_2] : memref<784x512xbf16, #tpu.memory_space<vmem>>, vector<784x512xbf16>
    %cst = arith.constant dense<0.000000e+00> : vector<8x512xf32>
    %3 = tpu.matmul %1, %2, %cst {dimension_numbers = #tpu.dot_dimension_numbers<[1], [0], [0], [1], [0, 0, 1, 1], [], []>} : vector<8x784xbf16>, vector<784x512xbf16>, vector<8x512xf32> -> vector<8x512xf32>
    %4 = arith.truncf %3 : vector<8x512xf32> to vector<8x512xbf16>
    %c0_3 = arith.constant 0 : index
    %c0_4 = arith.constant 0 : index
    %5 = vector.load %arg3[%c0_3, %c0_4] : memref<1x512xbf16, #tpu.memory_space<vmem>>, vector<1x512xbf16>
    %6 = vector.broadcast %5 : vector<1x512xbf16> to vector<8x512xbf16>
    %7 = arith.addf %4, %6 : vector<8x512xbf16>
    %cst_5 = arith.constant 0.000000e+00 : bf16
    %8 = vector.broadcast %cst_5 : bf16 to vector<8x512xbf16>
    %9 = arith.maximumf %7, %8 : vector<8x512xbf16>
    %c0_6 = arith.constant 0 : index
    %c0_7 = arith.constant 0 : index
    %10 = vector.load %arg4[%c0_6, %c0_7] : memref<512x512xbf16, #tpu.memory_space<vmem>>, vector<512x512xbf16>
    %cst_8 = arith.constant dense<0.000000e+00> : vector<8x512xf32>
    %11 = tpu.matmul %9, %10, %cst_8 {dimension_numbers = #tpu.dot_dimension_numbers<[1], [0], [0], [1], [0, 0, 1, 1], [], []>} : vector<8x512xbf16>, vector<512x512xbf16>, vector<8x512xf32> -> vector<8x512xf32>
    %12 = arith.truncf %11 : vector<8x512xf32> to vector<8x512xbf16>
    %c0_9 = arith.constant 0 : index
    %c0_10 = arith.constant 0 : index
    %13 = vector.load %arg5[%c0_9, %c0_10] : memref<1x512xbf16, #tpu.memory_space<vmem>>, vector<1x512xbf16>
    %14 = vector.broadcast %13 : vector<1x512xbf16> to vector<8x512xbf16>
    %15 = arith.addf %12, %14 : vector<8x512xbf16>
    %cst_11 = arith.constant 0.000000e+00 : bf16
    %16 = vector.broadcast %cst_11 : bf16 to vector<8x512xbf16>
    %17 = arith.maximumf %15, %16 : vector<8x512xbf16>
    %c0_12 = arith.constant 0 : index
    %c0_13 = arith.constant 0 : index
    %18 = vector.load %arg6[%c0_12, %c0_13] : memref<512x128xbf16, #tpu.memory_space<vmem>>, vector<512x128xbf16>
    %cst_14 = arith.constant dense<0.000000e+00> : vector<8x128xf32>
    %19 = tpu.matmul %17, %18, %cst_14 {dimension_numbers = #tpu.dot_dimension_numbers<[1], [0], [0], [1], [0, 0, 1, 1], [], []>} : vector<8x512xbf16>, vector<512x128xbf16>, vector<8x128xf32> -> vector<8x128xf32>
    %c0_15 = arith.constant 0 : index
    %c0_16 = arith.constant 0 : index
    %20 = vector.load %arg7[%c0_15, %c0_16] : memref<1x128xf32, #tpu.memory_space<vmem>>, vector<1x128xf32>
    %21 = vector.broadcast %20 : vector<1x128xf32> to vector<8x128xf32>
    %22 = arith.addf %19, %21 : vector<8x128xf32>
    %c0_17 = arith.constant 0 : index
    %c0_18 = arith.constant 0 : index
    %23 = vector.load %arg8[%c0_17, %c0_18] : memref<8x128xf32, #tpu.memory_space<vmem>>, vector<8x128xf32>
    tpu.vector_store %arg8[%c0_17, %c0_18], %22 {strides = array<i32>} : memref<8x128xf32, #tpu.memory_space<vmem>>, vector<8x128xf32>,
    return
  }
  func.func @transform_0(%arg0: i32) -> (i32, i32) {
    %c0_i32 = arith.constant 0 : i32
    %c0_i32_0 = arith.constant 0 : i32
    return %arg0, %c0_i32 : i32, i32
  }
  func.func @transform_1(%arg0: i32) -> (i32, i32) {
    %c0_i32 = arith.constant 0 : i32
    %c0_i32_0 = arith.constant 0 : i32
    %c0_i32_1 = arith.constant 0 : i32
    return %c0_i32, %c0_i32_0 : i32, i32
  }
  func.func @transform_2(%arg0: i32) -> (i32, i32) {
    %c0_i32 = arith.constant 0 : i32
    %c0_i32_0 = arith.constant 0 : i32
    %c0_i32_1 = arith.constant 0 : i32
    return %c0_i32, %c0_i32_0 : i32, i32
  }
  func.func @transform_3(%arg0: i32) -> (i32, i32) {
    %c0_i32 = arith.constant 0 : i32
    %c0_i32_0 = arith.constant 0 : i32
    %c0_i32_1 = arith.constant 0 : i32
    return %c0_i32, %c0_i32_0 : i32, i32
  }
  func.func @transform_4(%arg0: i32) -> (i32, i32) {
    %c0_i32 = arith.constant 0 : i32
    %c0_i32_0 = arith.constant 0 : i32
    %c0_i32_1 = arith.constant 0 : i32
    return %c0_i32, %c0_i32_0 : i32, i32
  }
  func.func @transform_5(%arg0: i32) -> (i32, i32) {
    %c0_i32 = arith.constant 0 : i32
    %c0_i32_0 = arith.constant 0 : i32
    %c0_i32_1 = arith.constant 0 : i32
    return %c0_i32, %c0_i32_0 : i32, i32
  }
  func.func @transform_6(%arg0: i32) -> (i32, i32) {
    %c0_i32 = arith.constant 0 : i32
    %c0_i32_0 = arith.constant 0 : i32
    %c0_i32_1 = arith.constant 0 : i32
    return %c0_i32, %c0_i32_0 : i32, i32
  }
  func.func @transform_7(%arg0: i32) -> (i32, i32) {
    %c0_i32 = arith.constant 0 : i32
    %c0_i32_0 = arith.constant 0 : i32
    return %arg0, %c0_i32 : i32, i32
  }
}

module attributes {stable_mosaic.version = 11 : i64} {
  func.func @mlp_kernel(%arg0: i32, %arg1: memref<8x784xf32, #tpu.memory_space<vmem>>, %arg2: memref<784x512xbf16, #tpu.memory_space<vmem>>, %arg3: memref<1x512xbf16, #tpu.memory_space<vmem>>, %arg4: memref<512x512xbf16, #tpu.memory_space<vmem>>, %arg5: memref<1x512xbf16, #tpu.memory_space<vmem>>, %arg6: memref<512x128xbf16, #tpu.memory_space<vmem>>, %arg7: memref<1x128xf32, #tpu.memory_space<vmem>>, %arg8: memref<8x128xf32, #tpu.memory_space<vmem>>) attributes {dimension_semantics = [#tpu.dimension_semantics<parallel>], iteration_bounds = array<i64: 1>, scalar_prefetch = 0 : i64, scratch_operands = 0 : i64, tpu.core_type = #tpu.core_type<tc>, window_params = [{transform_indices = @transform_0, window_bounds = array<i64: 8, 784>}, {pipeline_mode = #tpu.pipeline_mode<synchronous>, transform_indices = @transform_1, window_bounds = array<i64: 784, 512>}, {pipeline_mode = #tpu.pipeline_mode<synchronous>, transform_indices = @transform_2, window_bounds = array<i64: 1, 512>}, {pipeline_mode = #tpu.pipeline_mode<synchronous>, transform_indices = @transform_3, window_bounds = array<i64: 512, 512>}, {pipeline_mode = #tpu.pipeline_mode<synchronous>, transform_indices = @transform_4, window_bounds = array<i64: 1, 512>}, {pipeline_mode = #tpu.pipeline_mode<synchronous>, transform_indices = @transform_5, window_bounds = array<i64: 512, 128>}, {pipeline_mode = #tpu.pipeline_mode<synchronous>, transform_indices = @transform_6, window_bounds = array<i64: 1, 128>}, {transform_indices = @transform_7, window_bounds = array<i64: 8, 128>}]} {
    %c0 = arith.constant 0 : index
    %c0_0 = arith.constant 0 : index
    %0 = vector.load %arg1[%c0, %c0_0] : memref<8x784xf32, #tpu.memory_space<vmem>>, vector<8x784xf32>
    %1 = arith.truncf %0 : vector<8x784xf32> to vector<8x784xbf16>
    %c0_1 = arith.constant 0 : index
    %c0_2 = arith.constant 0 : index
    %2 = vector.load %arg2[%c0_1, %c0_2] : memref<784x512xbf16, #tpu.memory_space<vmem>>, vector<784x512xbf16>
    %cst = arith.constant dense<0.000000e+00> : vector<8x512xf32>
    %3 = tpu.matmul %1, %2, %cst {dimension_numbers = #tpu.dot_dimension_numbers<[1], [0], [0], [1], [0, 0, 1, 1], [], []>} : vector<8x784xbf16>, vector<784x512xbf16>, vector<8x512xf32> -> vector<8x512xf32>
    %4 = arith.truncf %3 : vector<8x512xf32> to vector<8x512xbf16>
    %c0_3 = arith.constant 0 : index
    %c0_4 = arith.constant 0 : index
    %5 = vector.load %arg3[%c0_3, %c0_4] : memref<1x512xbf16, #tpu.memory_space<vmem>>, vector<1x512xbf16>
    %6 = vector.broadcast %5 : vector<1x512xbf16> to vector<8x512xbf16>
    %7 = arith.addf %4, %6 : vector<8x512xbf16>
    %cst_5 = arith.constant 0.000000e+00 : bf16
    %8 = vector.broadcast %cst_5 : bf16 to vector<8x512xbf16>
    %9 = arith.maximumf %7, %8 : vector<8x512xbf16>
    %c0_6 = arith.constant 0 : index
    %c0_7 = arith.constant 0 : index
    %10 = vector.load %arg4[%c0_6, %c0_7] : memref<512x512xbf16, #tpu.memory_space<vmem>>, vector<512x512xbf16>
    %cst_8 = arith.constant dense<0.000000e+00> : vector<8x512xf32>
    %11 = tpu.matmul %9, %10, %cst_8 {dimension_numbers = #tpu.dot_dimension_numbers<[1], [0], [0], [1], [0, 0, 1, 1], [], []>} : vector<8x512xbf16>, vector<512x512xbf16>, vector<8x512xf32> -> vector<8x512xf32>
    %12 = arith.truncf %11 : vector<8x512xf32> to vector<8x512xbf16>
    %c0_9 = arith.constant 0 : index
    %c0_10 = arith.constant 0 : index
    %13 = vector.load %arg5[%c0_9, %c0_10] : memref<1x512xbf16, #tpu.memory_space<vmem>>, vector<1x512xbf16>
    %14 = vector.broadcast %13 : vector<1x512xbf16> to vector<8x512xbf16>
    %15 = arith.addf %12, %14 : vector<8x512xbf16>
    %cst_11 = arith.constant 0.000000e+00 : bf16
    %16 = vector.broadcast %cst_11 : bf16 to vector<8x512xbf16>
    %17 = arith.maximumf %15, %16 : vector<8x512xbf16>
    %c0_12 = arith.constant 0 : index
    %c0_13 = arith.constant 0 : index
    %18 = vector.load %arg6[%c0_12, %c0_13] : memref<512x128xbf16, #tpu.memory_space<vmem>>, vector<512x128xbf16>
    %cst_14 = arith.constant dense<0.000000e+00> : vector<8x128xf32>
    %19 = tpu.matmul %17, %18, %cst_14 {dimension_numbers = #tpu.dot_dimension_numbers<[1], [0], [0], [1], [0, 0, 1, 1], [], []>} : vector<8x512xbf16>, vector<512x128xbf16>, vector<8x128xf32> -> vector<8x128xf32>
    %c0_15 = arith.constant 0 : index
    %c0_16 = arith.constant 0 : index
    %20 = vector.load %arg7[%c0_15, %c0_16] : memref<1x128xf32, #tpu.memory_space<vmem>>, vector<1x128xf32>
    %21 = vector.broadcast %20 : vector<1x128xf32> to vector<8x128xf32>
    %22 = arith.addf %19, %21 : vector<8x128xf32>
    %c0_17 = arith.constant 0 : index
    %c0_18 = arith.constant 0 : index
    %23 = vector.load %arg8[%c0_17, %c0_18] : memref<8x128xf32, #tpu.memory_space<vmem>>, vector<8x128xf32>
    tpu.vector_store %arg8[%c0_17, %c0_18], %22 {strides = array<i32>} : memref<8x128xf32, #tpu.memory_space<vmem>>, vector<8x128xf32>,
    return
  }
  func.func @transform_0(%arg0: i32) -> (i32, i32) {
    %c0_i32 = arith.constant 0 : i32
    %c0_i32_0 = arith.constant 0 : i32
    return %arg0, %c0_i32 : i32, i32
  }
  func.func @transform_1(%arg0: i32) -> (i32, i32) {
    %c0_i32 = arith.constant 0 : i32
    %c0_i32_0 = arith.constant 0 : i32
    %c0_i32_1 = arith.constant 0 : i32
    return %c0_i32, %c0_i32_0 : i32, i32
  }
  func.func @transform_2(%arg0: i32) -> (i32, i32) {
    %c0_i32 = arith.constant 0 : i32
    %c0_i32_0 = arith.constant 0 : i32
    %c0_i32_1 = arith.constant 0 : i32
    return %c0_i32, %c0_i32_0 : i32, i32
  }
  func.func @transform_3(%arg0: i32) -> (i32, i32) {
    %c0_i32 = arith.constant 0 : i32
    %c0_i32_0 = arith.constant 0 : i32
    %c0_i32_1 = arith.constant 0 : i32
    return %c0_i32, %c0_i32_0 : i32, i32
  }
  func.func @transform_4(%arg0: i32) -> (i32, i32) {
    %c0_i32 = arith.constant 0 : i32
    %c0_i32_0 = arith.constant 0 : i32
    %c0_i32_1 = arith.constant 0 : i32
    return %c0_i32, %c0_i32_0 : i32, i32
  }
  func.func @transform_5(%arg0: i32) -> (i32, i32) {
    %c0_i32 = arith.constant 0 : i32
    %c0_i32_0 = arith.constant 0 : i32
    %c0_i32_1 = arith.constant 0 : i32
    return %c0_i32, %c0_i32_0 : i32, i32
  }
  func.func @transform_6(%arg0: i32) -> (i32, i32) {
    %c0_i32 = arith.constant 0 : i32
    %c0_i32_0 = arith.constant 0 : i32
    %c0_i32_1 = arith.constant 0 : i32
    return %c0_i32, %c0_i32_0 : i32, i32
  }
  func.func @transform_7(%arg0: i32) -> (i32, i32) {
    %c0_i32 = arith.constant 0 : i32
    %c0_i32_0 = arith.constant 0 : i32
    return %arg0, %c0_i32 : i32, i32
  }
}

</mosaic_0001>

<bundles_post_ra>
// kernel: tpu_custom_call.1
= control target key start
LH: loop header
LB: loop body
LE: loop exit
PB: predicated region body
PF: predicated region fallthrough
CT: control target
= control target key end

     0   :  { %12 = vsyncpa [#allocation3], 0  ;;  %s4260_s0 = inlined_call_operand.hbm [shape: f32[8,784], index: 0, kind: input, shape index: {}]   ;;  %s4261_s1 = inlined_call_operand.hbm [shape: bf16[784,512], index: 1, kind: input, shape index: {}]   ;;  %s4262_s2 = inlined_call_operand.hbm [shape: bf16[1,512], index: 2, kind: input, shape index: {}]   ;;  %s4263_s3 = inlined_call_operand.hbm [shape: bf16[512,512], index: 3, kind: input, shape index: {}]   ;;  %s4264_s4 = inlined_call_operand.vmem [shape: bf16[1,512], index: 4, kind: input, shape index: {}]   ;;  %s4265_s5 = inlined_call_operand.hbm [shape: bf16[512,128], index: 5, kind: input, shape index: {}]   ;;  %s4266_s6 = inlined_call_operand.vmem [shape: f32[1,128], index: 6, kind: input, shape index: {}]   ;;  %s4267_s7 = inlined_call_operand.hbm [shape: f32[8,128], index: 7, kind: output, shape index: {}]  }
   0x1   :  { %13 = vsyncpa [#allocation6], 0 }
   0x2   :  { %14 = vsyncpa [#allocation9], 0 }
   0x3   :  { %15 = vsyncpa [#allocation4], 0  ;;  %s4102_s24 = smov [#allocation5]  }
   0x4   :  { %s31_s25 = sshll.u32 %s4102_s24, 4  ;;  %s32_s25 = int_to_ptr.vmem [resolvable:$true] %s31_s25 }
   0x5   :  { %s3982_s26 = scalar_lea.vmem %s32_s25, 25088  ;;  %p3987_p1 = scmp.lt.s32.totalorder %s32_s25, %s32_s25 }
   0x6   :  { %p3983_p0 = scmp.ne.s32.totalorder %s32_s25, %s3982_s26  ;;  %p3988_p2 = scmp.lt.s32.totalorder %s3982_s26, %s3982_s26 }
   0x8   :  { %p3989_p3 = por %p3988_p2, %p3987_p1 }
   0xa   :  { %p3990_p4 = pnand %p3989_p3, %p3983_p0 }
   0xc   :  { %3993 = shalt.err (!%p3990_p4)
}
   0xd   :  { %s4103_s27 = smov 256   ;;  %s4104_s28 = smov 16  }
   0xe   :  { %37 = dma.hbm_to_vmem [thread:$0]  %s4261_s1, 25088, %s32_s25, [#allocation6], %s4103_s27, %s4103_s27, %s4104_s28  }
   0xf   :  { %s4105_s8 = smov [#allocation8]   ;;  %s4106_s10 = smov [#allocation2]  }
  0x10   :  { %s53_s9 = sshll.u32 %s4105_s8, 4  ;;  %s22_s11 = sshll.u32 %s4106_s10, 4  ;;  %s54_s9 = int_to_ptr.vmem [resolvable:$true] %s53_s9  ;;  %s23_s11 = int_to_ptr.vmem [resolvable:$true] %s22_s11 }
  0x11   :  { %s4002_s12 = scalar_lea.vmem %s54_s9, 16384  ;;  %p4007_p6 = scmp.lt.s32.totalorder %s54_s9, %s54_s9 }
  0x12   :  { %p4003_p5 = scmp.ne.s32.totalorder %s54_s9, %s4002_s12  ;;  %p4008_p7 = scmp.lt.s32.totalorder %s4002_s12, %s4002_s12 }
  0x14   :  { %p4009_p8 = por %p4008_p7, %p4007_p6 }
  0x16   :  { %p4010_p9 = pnand %p4009_p8, %p4003_p5 }
  0x18   :  { %4013 = shalt.err (!%p4010_p9)
}
  0x19   :  { %59 = dma.hbm_to_vmem [thread:$0]  %s4263_s3, 16384, %s54_s9, [#allocation9], %s4103_s27, %s4103_s27, %s4104_s28  }
  0x1a   :  { %s4022_s15 = scalar_lea.vmem %s23_s11, 896  ;;  %p4027_p11 = scmp.lt.s32.totalorder %s23_s11, %s23_s11 }
  0x1b   :  { %p4023_p10 = scmp.ne.s32.totalorder %s23_s11, %s4022_s15  ;;  %p4028_p12 = scmp.lt.s32.totalorder %s4022_s15, %s4022_s15 }
  0x1d   :  { %p4029_p13 = por %p4028_p12, %p4027_p11 }
  0x1f   :  { %p4030_p0 = pnand %p4029_p13, %p4023_p10 }
  0x21   :  { %4033 = shalt.err (!%p4030_p0)
}
  0x22   :  { %25 = dma.hbm_to_vmem [thread:$0]  %s4260_s0, 896, %s23_s11, [#allocation3]  }
  0x23   :  { %s4107_s17 = smov [#allocation7]   ;;  %s4108_s19 = smov [#allocation10]  }
  0x24   :  { %s44_s18 = sshll.u32 %s4107_s17, 4  ;;  %s67_s20 = sshll.u32 %s4108_s19, 4  ;;  %s45_s18 = int_to_ptr.vmem [resolvable:$true] %s44_s18  ;;  %s68_s20 = int_to_ptr.vmem [resolvable:$true] %s67_s20 }
  0x25   :  { %s4042_s21 = scalar_lea.vmem %s45_s18, 64  ;;  %p4047_p2 = scmp.lt.s32.totalorder %s45_s18, %s45_s18 }
  0x26   :  { %p4043_p1 = scmp.ne.s32.totalorder %s45_s18, %s4042_s21  ;;  %p4048_p3 = scmp.lt.s32.totalorder %s4042_s21, %s4042_s21 }
  0x28   :  { %p4049_p4 = por %p4048_p3, %p4047_p2 }
  0x2a   :  { %p4050_p5 = pnand %p4049_p4, %p4043_p1 }
  0x2c   :  { %4053 = shalt.err (!%p4050_p5)
}
  0x2d   :  { %47 = dma.hbm_to_vmem [thread:$0]  %s4262_s2, 64, %s45_s18, [#allocation6]  }
  0x2e   :  { %s4062_s23 = scalar_lea.vmem %s68_s20, 4096  ;;  %p4067_p7 = scmp.lt.s32.totalorder %s68_s20, %s68_s20 }
  0x2f   :  { %p4063_p6 = scmp.ne.s32.totalorder %s68_s20, %s4062_s23  ;;  %p4068_p8 = scmp.lt.s32.totalorder %s4062_s23, %s4062_s23 }
  0x31   :  { %p4069_p9 = por %p4068_p8, %p4067_p7 }
  0x33   :  { %p4070_p10 = pnand %p4069_p9, %p4063_p6 }
  0x35   :  { %4073 = shalt.err (!%p4070_p10)
}
  0x36   :  { %s4109_s0 = smov 64   ;;  %s4110_s24 = smov 4  }
  0x37   :  { %73 = dma.hbm_to_vmem [thread:$0]  %s4265_s5, 4096, %s68_s20, [#allocation9], %s4109_s0, %s4109_s0, %s4110_s24  }
  0x38   :  { %4094 = dma.done.wait [#allocation3], 896  }
  0x39   :  { %4095 = vsyncadd [#allocation3], 4294966400 }
  0x3a   :  { %4096 = dma.done.wait [#allocation6], 25152  }
  0x3b   :  { %4097 = vsyncadd [#allocation6], 4294942144 }
  0x3c   :  { %4098 = dma.done.wait [#allocation9], 20480  }
  0x3d   :  { %4099 = vsyncadd [#allocation9], 4294946816  ;;  %v3456_v0 = vld [vmem:[#allocation5 + $0xe4] ss:$16 sps:$4 sm:$0xff]   ;;  %v3460_v2 = vld [vmem:[#allocation5 + $0xe0] ss:$16 sps:$4 sm:$0xff]  }
  0x3e   :  { %v3458_v1 = vld [vmem:[#allocation5 + $0x2e4] ss:$16 sps:$4 sm:$0xff]   ;;  %1286 = vmatprep.subr.bf16.mxu0 %v3456_v0  ;;  %v3461_v3 = vld [vmem:[#allocation5 + $0x2e0] ss:$16 sps:$4 sm:$0xff]   ;;  %vm1282_vm0 = vcmask 130048   ;;  %s4113_s28 = smov [#allocation11]  }
  0x3f   :  { %1327 = vmatprep.subr.bf16.mxu1 %v3458_v1  ;;  %v3462_v4 = vld [vmem:[#allocation5 + $0xc4] ss:$16 sps:$4 sm:$0xff]   ;;  %1287 = vmatpush1.bf16.msra.mxu0 %v3460_v2  ;;  %v3466_v6 = vld [vmem:[#allocation5 + $0xc0] ss:$16 sps:$4 sm:$0xff]   ;;  %s3028_s29 = sshll.u32 %s4113_s28, 4  ;;  %s3029_s29 = int_to_ptr.vmem [resolvable:$true] %s3028_s29 }
  0x40   :  { %1328 = vmatpush1.bf16.msra.mxu1 %v3461_v3  ;;  %v3464_v5 = vld [vmem:[#allocation5 + $0x2c4] ss:$16 sps:$4 sm:$0xff]   ;;  %1288 = vmatprep.subr.bf16.mxu0 %v3462_v4  ;;  %v3467_v7 = vld [vmem:[#allocation5 + $0x2c0] ss:$16 sps:$4 sm:$0xff]   ;;  %v92_v4 = vld [vmem:[#allocation2] sm:$0xff]  ;;  %s4074_s30 = scalar_lea.vmem %s3029_s29, 128  ;;  %p4079_p12 = scmp.lt.s32.totalorder %s3029_s29, %s3029_s29 }
  0x41   :  { %1329 = vmatprep.subr.bf16.mxu1 %v3464_v5  ;;  %v3468_v8 = vld [vmem:[#allocation5 + $0xa4] ss:$16 sps:$4 sm:$0xff]   ;;  %v3472_v10 = vld [vmem:[#allocation5 + $0xa0] ss:$16 sps:$4 sm:$0xff]   ;;  %v94_v5 = vld [vmem:[#allocation2 + $0x10] sm:$0xff]  ;;  %p4075_p11 = scmp.ne.s32.totalorder %s3029_s29, %s4074_s30  ;;  %p4080_p13 = scmp.lt.s32.totalorder %s4074_s30, %s4074_s30 }
  0x42   :  { %v3470_v9 = vld [vmem:[#allocation5 + $0x2a4] ss:$16 sps:$4 sm:$0xff]   ;;  %v3473_v11 = vld [vmem:[#allocation5 + $0x2a0] ss:$16 sps:$4 sm:$0xff]  }
  0x43   :  { %1289 = vmatpush1.bf16.msra.mxu0 %v3466_v6  ;;  %v3474_v12 = vld [vmem:[#allocation5 + $0x84] ss:$16 sps:$4 sm:$0xff]   ;;  %v3478_v14 = vld [vmem:[#allocation5 + $0x80] ss:$16 sps:$4 sm:$0xff]   ;;  %p4081_p0 = por %p4080_p13, %p4079_p12 }
  0x44   :  { %1330 = vmatpush1.bf16.msra.mxu1 %v3467_v7  ;;  %1290 = vmatprep.subr.bf16.mxu0 %v3468_v8  ;;  %v3476_v13 = vld [vmem:[#allocation5 + $0x284] ss:$16 sps:$4 sm:$0xff]   ;;  %v3479_v15 = vld [vmem:[#allocation5 + $0x280] ss:$16 sps:$4 sm:$0xff]   ;;  %v4175_v8 = vpack.c.bf16 %v92_v4, %v92_v4  ;;  %v3635_v4 = vld [vmem:[#allocation5 + $0x16c] ss:$16 sps:$4 sm:$0xff]  }
  0x45   :  { %1331 = vmatprep.subr.bf16.mxu1 %v3470_v9  ;;  %v3480_v16 = vld [vmem:[#allocation5 + $0x64] ss:$16 sps:$4 sm:$0xff]   ;;  %v3484_v18 = vld [vmem:[#allocation5 + $0x60] ss:$16 sps:$4 sm:$0xff]   ;;  %v4177_v9 = vpack.c.bf16 %v94_v5, %v94_v5  ;;  %p4082_p1 = pnand %p4081_p0, %p4075_p11 }
  0x46   :  { %v3482_v17 = vld [vmem:[#allocation5 + $0x264] ss:$16 sps:$4 sm:$0xff]   ;;  %v3485_v19 = vld [vmem:[#allocation5 + $0x260] ss:$16 sps:$4 sm:$0xff]  }
  0x47   :  { %1291 = vmatpush1.bf16.msra.mxu0 %v3472_v10  ;;  %v3486_v20 = vld [vmem:[#allocation5 + $0x44] ss:$16 sps:$4 sm:$0xff]   ;;  %v3490_v22 = vld [vmem:[#allocation5 + $0x40] ss:$16 sps:$4 sm:$0xff]  }
  0x48   :  { %1332 = vmatpush1.bf16.msra.mxu1 %v3473_v11  ;;  %1292 = vmatprep.subr.bf16.mxu0 %v3474_v12  ;;  %v3488_v21 = vld [vmem:[#allocation5 + $0x244] ss:$16 sps:$4 sm:$0xff]   ;;  %v3491_v23 = vld [vmem:[#allocation5 + $0x240] ss:$16 sps:$4 sm:$0xff]  }
  0x49   :  { %1333 = vmatprep.subr.bf16.mxu1 %v3476_v13  ;;  %v3492_v24 = vld [vmem:[#allocation5 + $0x24] ss:$16 sps:$4 sm:$0xff]   ;;  %v3496_v26 = vld [vmem:[#allocation5 + $0x20] ss:$16 sps:$4 sm:$0xff]   ;;  %v3563_v13 = vld [vmem:[#allocation5 + $0xec] ss:$16 sps:$4 sm:$0xff]  }
  0x4a   :  { %v3494_v25 = vld [vmem:[#allocation5 + $0x224] ss:$16 sps:$4 sm:$0xff]   ;;  %v3497_v27 = vld [vmem:[#allocation5 + $0x220] ss:$16 sps:$4 sm:$0xff]  }
  0x4b   :  { %1293 = vmatpush1.bf16.msra.mxu0 %v3478_v14  ;;  %v3498_v28 = vld [vmem:[#allocation5 + $0x4] ss:$16 sps:$4 sm:$0xff]   ;;  %v3502_v30 = vld [vmem:[#allocation5] ss:$16 sps:$4 sm:$0xff]  }
  0x4c   :  { %1334 = vmatpush1.bf16.msra.mxu1 %v3479_v15  ;;  %1294 = vmatprep.subr.bf16.mxu0 %v3480_v16  ;;  %v3500_v29 = vld [vmem:[#allocation5 + $0x204] ss:$16 sps:$4 sm:$0xff]   ;;  %v3503_v31 = vld [vmem:[#allocation5 + $0x200] ss:$16 sps:$4 sm:$0xff]   ;;  %v98_v15 = vld [vmem:[#allocation2 + $0x30] sm:$0xff]  ;;  %v4111_v16 = vmov 0  }
  0x4d   :  { %1335 = vmatprep.subr.bf16.mxu1 %v3482_v17  ;;  %v3504_v32 = vld [vmem:[#allocation5 + $0x1e4] ss:$16 sps:$4 sm:$0xff]   ;;  %v3508_v34 = vld [vmem:[#allocation5 + $0x1e0] ss:$16 sps:$4 sm:$0xff]  }
  0x4e   :  { %v3506_v33 = vld [vmem:[#allocation5 + $0x3e4] ss:$16 sps:$4 sm:$0xff]   ;;  %v3509_v35 = vld [vmem:[#allocation5 + $0x3e0] ss:$16 sps:$4 sm:$0xff]  }
  0x4f   :  { %1295 = vmatpush1.bf16.msra.mxu0 %v3484_v18  ;;  %v3510_v36 = vld [vmem:[#allocation5 + $0x1c4] ss:$16 sps:$4 sm:$0xff]   ;;  %v3514_v38 = vld [vmem:[#allocation5 + $0x1c0] ss:$16 sps:$4 sm:$0xff]   ;;  %v3561_v18 = vld [vmem:[#allocation5 + $0xe8] ss:$16 sps:$4 sm:$0xff]  }
  0x50   :  { %1336 = vmatpush1.bf16.msra.mxu1 %v3485_v19  ;;  %1296 = vmatprep.subr.bf16.mxu0 %v3486_v20  ;;  %v3512_v37 = vld [vmem:[#allocation5 + $0x3c4] ss:$16 sps:$4 sm:$0xff]   ;;  %v3515_v39 = vld [vmem:[#allocation5 + $0x3c0] ss:$16 sps:$4 sm:$0xff]   ;;  %v4182_v19 = vpack.c.bf16 %v98_v15, %v98_v15  ;;  %v96_v15 = vld [vmem:[#allocation2 + $0x20] sm:$0xff] }
  0x51   :  { %1337 = vmatprep.subr.bf16.mxu1 %v3488_v21  ;;  %v3516_v40 = vld [vmem:[#allocation5 + $0x1a4] ss:$16 sps:$4 sm:$0xff]   ;;  %v3520_v42 = vld [vmem:[#allocation5 + $0x1a0] ss:$16 sps:$4 sm:$0xff]   ;;  %v3569_v21 = vld [vmem:[#allocation5 + $0xcc] ss:$16 sps:$4 sm:$0xff]  }
  0x52   :  { %v3518_v41 = vld [vmem:[#allocation5 + $0x3a4] ss:$16 sps:$4 sm:$0xff]   ;;  %v3521_v43 = vld [vmem:[#allocation5 + $0x3a0] ss:$16 sps:$4 sm:$0xff]  }
  0x53   :  { %1297 = vmatpush1.bf16.msra.mxu0 %v3490_v22  ;;  %v3522_v44 = vld [vmem:[#allocation5 + $0x184] ss:$16 sps:$4 sm:$0xff]   ;;  %v3526_v47 = vld [vmem:[#allocation5 + $0x180] ss:$16 sps:$4 sm:$0xff]  }
  0x54   :  { %1338 = vmatpush1.bf16.msra.mxu1 %v3491_v23  ;;  %1298 = vmatprep.subr.bf16.mxu0 %v3492_v24  ;;  %v3524_v45 = vld [vmem:[#allocation5 + $0x384] ss:$16 sps:$4 sm:$0xff]   ;;  %v3527_v48 = vld [vmem:[#allocation5 + $0x380] ss:$16 sps:$4 sm:$0xff]   ;;  %v3567_v23 = vld [vmem:[#allocation5 + $0xc8] ss:$16 sps:$4 sm:$0xff]  }
  0x55   :  { %1339 = vmatprep.subr.bf16.mxu1 %v3494_v25  ;;  %v93_v46 = vld [vmem:[#allocation2 + $0x8] sm:$0xff]  ;;  %v95_v50 = vld [vmem:[#allocation2 + $0x18] sm:$0xff]  ;;  %v3575_v25 = vld [vmem:[#allocation5 + $0xac] ss:$16 sps:$4 sm:$0xff]  }
  0x56   :  { %v4169_v49 = vpack.c.bf16 %v93_v46, %v93_v46  ;;  %v3528_v51 = vld [vmem:[#allocation5 + $0x164] ss:$16 sps:$4 sm:$0xff]   ;;  %v4171_v52 = vpack.c.bf16 %v95_v50, %v95_v50  ;;  %v3532_v54 = vld [vmem:[#allocation5 + $0x160] ss:$16 sps:$4 sm:$0xff]  }
  0x57   :  { %1299 = vmatpush1.bf16.msra.mxu0 %v3496_v26  ;;  %v3530_v53 = vld [vmem:[#allocation5 + $0x364] ss:$16 sps:$4 sm:$0xff]   ;;  %v3533_v55 = vld [vmem:[#allocation5 + $0x360] ss:$16 sps:$4 sm:$0xff]  }
  0x58   :  { %1340 = vmatpush1.bf16.msra.mxu1 %v3497_v27  ;;  %1300 = vmatprep.subr.bf16.mxu0 %v3498_v28  ;;  %v3534_v56 = vld [vmem:[#allocation5 + $0x144] ss:$16 sps:$4 sm:$0xff]   ;;  %v3538_v58 = vld [vmem:[#allocation5 + $0x140] ss:$16 sps:$4 sm:$0xff]   ;;  %v3573_v27 = vld [vmem:[#allocation5 + $0xa8] ss:$16 sps:$4 sm:$0xff]  }
  0x59   :  { %1341 = vmatprep.subr.bf16.mxu1 %v3500_v29  ;;  %1318 = vmatprep.mubr.bf16.mxu0 %v4169_v49  ;;  %v3536_v57 = vld [vmem:[#allocation5 + $0x344] ss:$16 sps:$4 sm:$0xff]   ;;  %v3539_v59 = vld [vmem:[#allocation5 + $0x340] ss:$16 sps:$4 sm:$0xff]   ;;  %v3581_v29 = vld [vmem:[#allocation5 + $0x8c] ss:$16 sps:$4 sm:$0xff]  }
  0x5a   :  { %1359 = vmatprep.mubr.bf16.mxu1 %v4171_v52  ;;  %v3540_v60 = vld [vmem:[#allocation5 + $0x124] ss:$16 sps:$4 sm:$0xff]   ;;  %v3544_v62 = vld [vmem:[#allocation5 + $0x120] ss:$16 sps:$4 sm:$0xff]  }
  0x5b   :  { %1301 = vmatpush1.bf16.msra.mxu0 %v3502_v30  ;;  %v3542_v61 = vld [vmem:[#allocation5 + $0x324] ss:$16 sps:$4 sm:$0xff]   ;;  %v3545_v63 = vld [vmem:[#allocation5 + $0x320] ss:$16 sps:$4 sm:$0xff]  }
  0x5c   :  { %1342 = vmatpush1.bf16.msra.mxu1 %v3503_v31  ;;  %1302 = vmatprep.subr.bf16.mxu0 %v3504_v32  ;;  %v3546_v0 = vld [vmem:[#allocation5 + $0x104] ss:$16 sps:$4 sm:$0xff]   ;;  %v3550_v2 = vld [vmem:[#allocation5 + $0x100] ss:$16 sps:$4 sm:$0xff]   ;;  %v3579_v31 = vld [vmem:[#allocation5 + $0x88] ss:$16 sps:$4 sm:$0xff]  }
  0x5d   :  { %1343 = vmatprep.subr.bf16.mxu1 %v3506_v33  ;;  %v3548_v1 = vld [vmem:[#allocation5 + $0x304] ss:$16 sps:$4 sm:$0xff]   ;;  %v3551_v3 = vld [vmem:[#allocation5 + $0x300] ss:$16 sps:$4 sm:$0xff]   ;;  %v3587_v33 = vld [vmem:[#allocation5 + $0x6c] ss:$16 sps:$4 sm:$0xff]  }
  0x5e   :  { %v3554_v6 = vld [vmem:[#allocation5 + $0x4e4] ss:$16 sps:$4 sm:$0xff]   ;;  %v3552_v10 = vld [vmem:[#allocation5 + $0x4e0] ss:$16 sps:$4 sm:$0xff]  }
  0x5f   :  { %1303 = vmatpush2.bf16.msra.mxu0 %v3508_v34  ;;  %v3557_v7 = vld [vmem:[#allocation5 + $0x604] ss:$16 sps:$4 sm:$0xff]   ;;  %v3555_v11 = vld [vmem:[#allocation5 + $0x600] ss:$16 sps:$4 sm:$0xff]  }
  0x60   :  { %1344 = vmatpush2.bf16.msra.mxu1 %v3509_v35  ;;  %1304 = vmatprep.subr.bf16.mxu0 %v3510_v36  ;;  %v3560_v12 = vld [vmem:[#allocation5 + $0x4c4] ss:$16 sps:$4 sm:$0xff]   ;;  %v3558_v14 = vld [vmem:[#allocation5 + $0x4c0] ss:$16 sps:$4 sm:$0xff]  }
  0x61   :  { %1345 = vmatprep.subr.bf16.mxu1 %v3512_v37  ;;  %v3566_v17 = vld [vmem:[#allocation5 + $0x4a4] ss:$16 sps:$4 sm:$0xff]   ;;  %v3564_v20 = vld [vmem:[#allocation5 + $0x4a0] ss:$16 sps:$4 sm:$0xff]   ;;  %v3585_v37 = vld [vmem:[#allocation5 + $0x68] ss:$16 sps:$4 sm:$0xff]  }
  0x62   :  { %v3572_v22 = vld [vmem:[#allocation5 + $0x484] ss:$16 sps:$4 sm:$0xff]   ;;  %v3570_v24 = vld [vmem:[#allocation5 + $0x480] ss:$16 sps:$4 sm:$0xff]  }
  0x63   :  { %1305 = vmatpush2.bf16.msra.mxu0 %v3514_v38  ;;  %v3578_v26 = vld [vmem:[#allocation5 + $0x464] ss:$16 sps:$4 sm:$0xff]   ;;  %v3576_v28 = vld [vmem:[#allocation5 + $0x460] ss:$16 sps:$4 sm:$0xff]  }
  0x64   :  { %1346 = vmatpush2.bf16.msra.mxu1 %v3515_v39  ;;  %1306 = vmatprep.subr.bf16.mxu0 %v3516_v40  ;;  %v3584_v30 = vld [vmem:[#allocation5 + $0x444] ss:$16 sps:$4 sm:$0xff]   ;;  %v3582_v32 = vld [vmem:[#allocation5 + $0x440] ss:$16 sps:$4 sm:$0xff]   ;;  %v3593_v39 = vld [vmem:[#allocation5 + $0x4c] ss:$16 sps:$4 sm:$0xff]  }
  0x65   :  { %1347 = vmatprep.subr.bf16.mxu1 %v3518_v41  ;;  %v3590_v34 = vld [vmem:[#allocation5 + $0x424] ss:$16 sps:$4 sm:$0xff]   ;;  %v3588_v38 = vld [vmem:[#allocation5 + $0x420] ss:$16 sps:$4 sm:$0xff]   ;;  %v3591_v41 = vld [vmem:[#allocation5 + $0x48] ss:$16 sps:$4 sm:$0xff]  }
  0x66   :  { %v97_v35 = vld [vmem:[#allocation2 + $0x28] sm:$0xff] }
  0x67   :  { %1307 = vmatpush2.bf16.msra.mxu0 %v3520_v42  ;;  %v4187_v36 = vpack.c.bf16 %v97_v35, %v97_v35  ;;  %v3596_v40 = vld [vmem:[#allocation5 + $0x404] ss:$16 sps:$4 sm:$0xff]   ;;  %v3594_v42 = vld [vmem:[#allocation5 + $0x400] ss:$16 sps:$4 sm:$0xff]   ;;  %v3674_v35 = vld [vmem:[#allocation5 + $0x26c] ss:$16 sps:$4 sm:$0xff]  }
  0x68   :  { %1348 = vmatpush2.bf16.msra.mxu1 %v3521_v43  ;;  %1308 = vmatprep.subr.bf16.mxu0 %v3522_v44  ;;  %v3599_v43 = vld [vmem:[#allocation5 + $0x2c] ss:$16 sps:$4 sm:$0xff]   ;;  %v3602_v44 = vld [vmem:[#allocation5 + $0x5e4] ss:$16 sps:$4 sm:$0xff]   ;;  %v3600_v46 = vld [vmem:[#allocation5 + $0x5e0] ss:$16 sps:$4 sm:$0xff]  }
  0x69   :  { %1349 = vmatprep.subr.bf16.mxu1 %v3524_v45  ;;  %v3597_v45 = vld [vmem:[#allocation5 + $0x28] ss:$16 sps:$4 sm:$0xff]   ;;  %v3606_v50 = vld [vmem:[#allocation5 + $0x5c0] ss:$16 sps:$4 sm:$0xff]   ;;  %v3638_v5 = vld [vmem:[#allocation5 + $0x524] ss:$16 sps:$4 sm:$0xff]  }
  0x6b   :  { %1309 = vmatpush2.bf16.msra.mxu0 %v3526_v47  ;;  %v3605_v47 = vld [vmem:[#allocation5 + $0xc] ss:$16 sps:$4 sm:$0xff]  }
  0x6c   :  { %1350 = vmatpush2.bf16.msra.mxu1 %v3527_v48  ;;  %1310 = vmatprep.subr.bf16.mxu0 %v3528_v51  ;;  %v3608_v48 = vld [vmem:[#allocation5 + $0x5c4] ss:$16 sps:$4 sm:$0xff]   ;;  %v3611_v51 = vld [vmem:[#allocation5 + $0x1ec] ss:$16 sps:$4 sm:$0xff]  }
  0x6d   :  { %1351 = vmatprep.subr.bf16.mxu1 %v3530_v53  ;;  %v3614_v53 = vld [vmem:[#allocation5 + $0x5a4] ss:$16 sps:$4 sm:$0xff]  }
  0x6f   :  { %1311 = vmatpush2.bf16.msra.mxu0 %v3532_v54  ;;  %v3609_v54 = vld [vmem:[#allocation5 + $0x1e8] ss:$16 sps:$4 sm:$0xff]  }
  0x70   :  { %1352 = vmatpush2.bf16.msra.mxu1 %v3533_v55  ;;  %1312 = vmatprep.subr.bf16.mxu0 %v3534_v56  ;;  %v3612_v55 = vld [vmem:[#allocation5 + $0x5a0] ss:$16 sps:$4 sm:$0xff]   ;;  %v3617_v56 = vld [vmem:[#allocation5 + $0x1cc] ss:$16 sps:$4 sm:$0xff]  }
  0x71   :  { %1353 = vmatprep.subr.bf16.mxu1 %v3536_v57  ;;  %v3620_v57 = vld [vmem:[#allocation5 + $0x584] ss:$16 sps:$4 sm:$0xff]  }
  0x73   :  { %1313 = vmatpush2.bf16.msra.mxu0 %v3538_v58  ;;  %v3615_v58 = vld [vmem:[#allocation5 + $0x1c8] ss:$16 sps:$4 sm:$0xff]  }
  0x74   :  { %1354 = vmatpush2.bf16.msra.mxu1 %v3539_v59  ;;  %1314 = vmatprep.subr.bf16.mxu0 %v3540_v60  ;;  %v3618_v59 = vld [vmem:[#allocation5 + $0x580] ss:$16 sps:$4 sm:$0xff]   ;;  %v3623_v60 = vld [vmem:[#allocation5 + $0x1ac] ss:$16 sps:$4 sm:$0xff]  }
  0x75   :  { %1355 = vmatprep.subr.bf16.mxu1 %v3542_v61  ;;  %v3626_v61 = vld [vmem:[#allocation5 + $0x564] ss:$16 sps:$4 sm:$0xff]  }
  0x77   :  { %1315 = vmatpush2.bf16.msra.mxu0 %v3544_v62  ;;  %v3621_v62 = vld [vmem:[#allocation5 + $0x1a8] ss:$16 sps:$4 sm:$0xff]  }
  0x78   :  { %1356 = vmatpush2.bf16.msra.mxu1 %v3545_v63  ;;  %1316 = vmatprep.subr.bf16.mxu0 %v3546_v0  ;;  %v3624_v63 = vld [vmem:[#allocation5 + $0x560] ss:$16 sps:$4 sm:$0xff]   ;;  %v3629_v0 = vld [vmem:[#allocation5 + $0x18c] ss:$16 sps:$4 sm:$0xff]  }
  0x79   :  { %1357 = vmatprep.subr.bf16.mxu1 %v3548_v1  ;;  %v3632_v1 = vld [vmem:[#allocation5 + $0x544] ss:$16 sps:$4 sm:$0xff]  }
  0x7b   :  { %1317 = vmatpush2.bf16.msra.mxu0 %v3550_v2  ;;  %v3627_v2 = vld [vmem:[#allocation5 + $0x188] ss:$16 sps:$4 sm:$0xff]  }
  0x7c   :  { %1358 = vmatpush2.bf16.msra.mxu1 %v3551_v3  ;;  %1368 = vmatprep.subr.bf16.mxu0 %v3554_v6  ;;  %v3630_v3 = vld [vmem:[#allocation5 + $0x540] ss:$16 sps:$4 sm:$0xff]   ;;  %v3633_v6 = vld [vmem:[#allocation5 + $0x168] ss:$16 sps:$4 sm:$0xff]  }
  0x7d   :  { %1423 = vmatprep.subr.bf16.mxu1 %v3557_v7  ;;  %v3636_v7 = vld [vmem:[#allocation5 + $0x520] ss:$16 sps:$4 sm:$0xff]  }
  0x7e   :  { %1319 = vmatmul.mubr.bf16.vlgmr.msra.gmra.mxu0 %v4175_v8 }
  0x7f   :  { %1360 = vmatmul.mubr.bf16.vlgmr.msra.gmra.mxu1 %v4177_v9  ;;  %1369 = vmatpush1.bf16.msra.mxu0 %v3552_v10  ;;  %v3641_v10 = vld [vmem:[#allocation5 + $0x14c] ss:$16 sps:$4 sm:$0xff]  }
  0x80   :  { %1424 = vmatpush1.bf16.msra.mxu1 %v3555_v11  ;;  %1370 = vmatprep.subr.bf16.mxu0 %v3560_v12  ;;  %v3644_v11 = vld [vmem:[#allocation5 + $0x504] ss:$16 sps:$4 sm:$0xff]   ;;  %v3639_v12 = vld [vmem:[#allocation5 + $0x148] ss:$16 sps:$4 sm:$0xff]  }
  0x81   :  { %1441 = vmatprep.mubr.bf16.mxu1 %v4111_v16  ;;  %1450 = vmatprep.subr.bf16.mxu1 %v3563_v13  ;;  %v3642_v13 = vld [vmem:[#allocation5 + $0x500] ss:$16 sps:$4 sm:$0xff]  }
  0x82   :  { %1400 = vmatprep.mubr.bf16.mxu0 %v4187_v36 }
  0x83   :  { %1371 = vmatpush1.bf16.msra.mxu0 %v3558_v14  ;;  %v3647_v14 = vld [vmem:[#allocation5 + $0x12c] ss:$16 sps:$4 sm:$0xff]  }
  0x84   :  { %1372 = vmatprep.subr.bf16.mxu0 %v3566_v17  ;;  %v3650_v17 = vld [vmem:[#allocation5 + $0x2ec] ss:$16 sps:$4 sm:$0xff]  }
  0x87   :  { %3235 = vmatmul.mubr.msk.bf16.vlgmr.msra.gmra.mxu1 %vm1282_vm0, %v4182_v19  ;;  %1373 = vmatpush1.bf16.msra.mxu0 %v3564_v20  ;;  %v4190_v20 = vpack.c.bf16 %v96_v15, %v96_v15  ;;  %v3737_v15 = vld [vmem:[#allocation5 + $0x54c] ss:$16 sps:$4 sm:$0xff]  }
  0x88   :  { %1451 = vmatpush1.bf16.msra.mxu1 %v3561_v18  ;;  %1374 = vmatprep.subr.bf16.mxu0 %v3572_v22  ;;  %v3645_v18 = vld [vmem:[#allocation5 + $0x128] ss:$16 sps:$4 sm:$0xff]   ;;  %v3653_v22 = vld [vmem:[#allocation5 + $0x10c] ss:$16 sps:$4 sm:$0xff]  }
  0x89   :  { %1452 = vmatprep.subr.bf16.mxu1 %v3569_v21  ;;  %1482 = vmatprep.mubr.bf16.mxu1 %v4169_v49  ;;  %v3603_v49 = vld [vmem:[#allocation5 + $0x8] ss:$16 sps:$4 sm:$0xff]  }
  0x8a   :  { %v3648_v21 = vld [vmem:[#allocation5 + $0x2e8] ss:$16 sps:$4 sm:$0xff]  }
  0x8b   :  { %1375 = vmatpush1.bf16.msra.mxu0 %v3570_v24  ;;  %v3651_v24 = vld [vmem:[#allocation5 + $0x108] ss:$16 sps:$4 sm:$0xff]  }
  0x8c   :  { %1453 = vmatpush1.bf16.msra.mxu1 %v3567_v23  ;;  %1376 = vmatprep.subr.bf16.mxu0 %v3578_v26  ;;  %v3656_v23 = vld [vmem:[#allocation5 + $0x2cc] ss:$16 sps:$4 sm:$0xff]  }
  0x8d   :  { %1454 = vmatprep.subr.bf16.mxu1 %v3575_v25  ;;  %v3654_v25 = vld [vmem:[#allocation5 + $0x2c8] ss:$16 sps:$4 sm:$0xff]   ;;  %v3659_v26 = vld [vmem:[#allocation5 + $0x4ec] ss:$16 sps:$4 sm:$0xff]  }
  0x8f   :  { %1377 = vmatpush1.bf16.msra.mxu0 %v3576_v28  ;;  %v3657_v28 = vld [vmem:[#allocation5 + $0x4e8] ss:$16 sps:$4 sm:$0xff]  }
  0x90   :  { %1455 = vmatpush1.bf16.msra.mxu1 %v3573_v27  ;;  %1378 = vmatprep.subr.bf16.mxu0 %v3584_v30  ;;  %v3662_v27 = vld [vmem:[#allocation5 + $0x2ac] ss:$16 sps:$4 sm:$0xff]  }
  0x91   :  { %1456 = vmatprep.subr.bf16.mxu1 %v3581_v29  ;;  %v3660_v29 = vld [vmem:[#allocation5 + $0x2a8] ss:$16 sps:$4 sm:$0xff]   ;;  %v3665_v30 = vld [vmem:[#allocation5 + $0x4cc] ss:$16 sps:$4 sm:$0xff]  }
  0x93   :  { %1379 = vmatpush1.bf16.msra.mxu0 %v3582_v32  ;;  %v3663_v32 = vld [vmem:[#allocation5 + $0x4c8] ss:$16 sps:$4 sm:$0xff]  }
  0x94   :  { %1457 = vmatpush1.bf16.msra.mxu1 %v3579_v31  ;;  %1380 = vmatprep.subr.bf16.mxu0 %v3590_v34  ;;  %v3668_v31 = vld [vmem:[#allocation5 + $0x28c] ss:$16 sps:$4 sm:$0xff]  }
  0x95   :  { %1458 = vmatprep.subr.bf16.mxu1 %v3587_v33  ;;  %v3666_v33 = vld [vmem:[#allocation5 + $0x288] ss:$16 sps:$4 sm:$0xff]   ;;  %v3671_v34 = vld [vmem:[#allocation5 + $0x4ac] ss:$16 sps:$4 sm:$0xff]  }
  0x97   :  { %1381 = vmatpush1.bf16.msra.mxu0 %v3588_v38  ;;  %v3677_v38 = vld [vmem:[#allocation5 + $0x48c] ss:$16 sps:$4 sm:$0xff]  }
  0x98   :  { %1459 = vmatpush1.bf16.msra.mxu1 %v3585_v37  ;;  %1382 = vmatprep.subr.bf16.mxu0 %v3596_v40  ;;  %v3669_v37 = vld [vmem:[#allocation5 + $0x4a8] ss:$16 sps:$4 sm:$0xff]  }
  0x99   :  { %1460 = vmatprep.subr.bf16.mxu1 %v3593_v39  ;;  %v3680_v39 = vld [vmem:[#allocation5 + $0x24c] ss:$16 sps:$4 sm:$0xff]   ;;  %v3675_v40 = vld [vmem:[#allocation5 + $0x488] ss:$16 sps:$4 sm:$0xff]  }
  0x9b   :  { %1383 = vmatpush1.bf16.msra.mxu0 %v3594_v42  ;;  %v3686_v42 = vld [vmem:[#allocation5 + $0x22c] ss:$16 sps:$4 sm:$0xff]  }
  0x9c   :  { %1461 = vmatpush1.bf16.msra.mxu1 %v3591_v41  ;;  %1384 = vmatprep.subr.bf16.mxu0 %v3602_v44  ;;  %v3683_v41 = vld [vmem:[#allocation5 + $0x46c] ss:$16 sps:$4 sm:$0xff]  }
  0x9d   :  { %1462 = vmatprep.subr.bf16.mxu1 %v3599_v43  ;;  %v3681_v43 = vld [vmem:[#allocation5 + $0x468] ss:$16 sps:$4 sm:$0xff]   ;;  %v3689_v44 = vld [vmem:[#allocation5 + $0x44c] ss:$16 sps:$4 sm:$0xff]  }
  0x9f   :  { %1385 = vmatpush2.bf16.msra.mxu0 %v3600_v46  ;;  %v3687_v46 = vld [vmem:[#allocation5 + $0x448] ss:$16 sps:$4 sm:$0xff]  }
  0xa0   :  { %1463 = vmatpush1.bf16.msra.mxu1 %v3597_v45  ;;  %1386 = vmatprep.subr.bf16.mxu0 %v3608_v48  ;;  %v3692_v45 = vld [vmem:[#allocation5 + $0x20c] ss:$16 sps:$4 sm:$0xff]  }
  0xa1   :  { %1464 = vmatprep.subr.bf16.mxu1 %v3605_v47  ;;  %v3690_v47 = vld [vmem:[#allocation5 + $0x208] ss:$16 sps:$4 sm:$0xff]   ;;  %v3695_v48 = vld [vmem:[#allocation5 + $0x42c] ss:$16 sps:$4 sm:$0xff]  }
  0xa3   :  { %1387 = vmatpush2.bf16.msra.mxu0 %v3606_v50  ;;  %v3693_v50 = vld [vmem:[#allocation5 + $0x428] ss:$16 sps:$4 sm:$0xff]  }
  0xa4   :  { %1465 = vmatpush1.bf16.msra.mxu1 %v3603_v49  ;;  %1388 = vmatprep.subr.bf16.mxu0 %v3614_v53  ;;  %v3698_v49 = vld [vmem:[#allocation5 + $0x3ec] ss:$16 sps:$4 sm:$0xff]  }
  0xa5   :  { %1466 = vmatprep.subr.bf16.mxu1 %v3611_v51  ;;  %v3696_v51 = vld [vmem:[#allocation5 + $0x3e8] ss:$16 sps:$4 sm:$0xff]   ;;  %v3701_v53 = vld [vmem:[#allocation5 + $0x40c] ss:$16 sps:$4 sm:$0xff]  }
  0xa7   :  { %1389 = vmatpush2.bf16.msra.mxu0 %v3612_v55  ;;  %v3699_v55 = vld [vmem:[#allocation5 + $0x408] ss:$16 sps:$4 sm:$0xff]  }
  0xa8   :  { %1467 = vmatpush2.bf16.msra.mxu1 %v3609_v54  ;;  %1390 = vmatprep.subr.bf16.mxu0 %v3620_v57  ;;  %v3704_v54 = vld [vmem:[#allocation5 + $0x3cc] ss:$16 sps:$4 sm:$0xff]  }
  0xa9   :  { %1468 = vmatprep.subr.bf16.mxu1 %v3617_v56  ;;  %v3702_v56 = vld [vmem:[#allocation5 + $0x3c8] ss:$16 sps:$4 sm:$0xff]   ;;  %v3707_v57 = vld [vmem:[#allocation5 + $0x5ec] ss:$16 sps:$4 sm:$0xff]  }
  0xab   :  { %1391 = vmatpush2.bf16.msra.mxu0 %v3618_v59  ;;  %v3705_v59 = vld [vmem:[#allocation5 + $0x5e8] ss:$16 sps:$4 sm:$0xff]  }
  0xac   :  { %1469 = vmatpush2.bf16.msra.mxu1 %v3615_v58  ;;  %1392 = vmatprep.subr.bf16.mxu0 %v3626_v61  ;;  %v3710_v58 = vld [vmem:[#allocation5 + $0x3ac] ss:$16 sps:$4 sm:$0xff]  }
  0xad   :  { %1470 = vmatprep.subr.bf16.mxu1 %v3623_v60  ;;  %v3708_v60 = vld [vmem:[#allocation5 + $0x3a8] ss:$16 sps:$4 sm:$0xff]   ;;  %v3713_v61 = vld [vmem:[#allocation5 + $0x5cc] ss:$16 sps:$4 sm:$0xff]  }
  0xaf   :  { %1393 = vmatpush2.bf16.msra.mxu0 %v3624_v63  ;;  %v3711_v63 = vld [vmem:[#allocation5 + $0x5c8] ss:$16 sps:$4 sm:$0xff]  }
  0xb0   :  { %1471 = vmatpush2.bf16.msra.mxu1 %v3621_v62  ;;  %1394 = vmatprep.subr.bf16.mxu0 %v3632_v1  ;;  %v3716_v62 = vld [vmem:[#allocation5 + $0x38c] ss:$16 sps:$4 sm:$0xff]  }
  0xb1   :  { %1472 = vmatprep.subr.bf16.mxu1 %v3629_v0  ;;  %v3714_v0 = vld [vmem:[#allocation5 + $0x388] ss:$16 sps:$4 sm:$0xff]   ;;  %v3719_v1 = vld [vmem:[#allocation5 + $0x5ac] ss:$16 sps:$4 sm:$0xff]  }
  0xb3   :  { %1395 = vmatpush2.bf16.msra.mxu0 %v3630_v3  ;;  %v3717_v3 = vld [vmem:[#allocation5 + $0x5a8] ss:$16 sps:$4 sm:$0xff]  }
  0xb4   :  { %1473 = vmatpush2.bf16.msra.mxu1 %v3627_v2  ;;  %1396 = vmatprep.subr.bf16.mxu0 %v3638_v5  ;;  %v3722_v2 = vld [vmem:[#allocation5 + $0x36c] ss:$16 sps:$4 sm:$0xff]  }
  0xb5   :  { %1474 = vmatprep.subr.bf16.mxu1 %v3635_v4  ;;  %v3720_v4 = vld [vmem:[#allocation5 + $0x368] ss:$16 sps:$4 sm:$0xff]   ;;  %v3725_v5 = vld [vmem:[#allocation5 + $0x58c] ss:$16 sps:$4 sm:$0xff]  }
  0xb7   :  { %1397 = vmatpush2.bf16.msra.mxu0 %v3636_v7  ;;  %v3723_v7 = vld [vmem:[#allocation5 + $0x588] ss:$16 sps:$4 sm:$0xff]  }
  0xb8   :  { %1475 = vmatpush2.bf16.msra.mxu1 %v3633_v6  ;;  %1398 = vmatprep.subr.bf16.mxu0 %v3644_v11  ;;  %v3728_v6 = vld [vmem:[#allocation5 + $0x34c] ss:$16 sps:$4 sm:$0xff]  }
  0xb9   :  { %1476 = vmatprep.subr.bf16.mxu1 %v3641_v10  ;;  %v3726_v10 = vld [vmem:[#allocation5 + $0x348] ss:$16 sps:$4 sm:$0xff]   ;;  %v3731_v11 = vld [vmem:[#allocation5 + $0x56c] ss:$16 sps:$4 sm:$0xff]  }
  0xbb   :  { %1399 = vmatpush2.bf16.msra.mxu0 %v3642_v13  ;;  %v3729_v13 = vld [vmem:[#allocation5 + $0x568] ss:$16 sps:$4 sm:$0xff]  }
  0xbc   :  { %1477 = vmatpush2.bf16.msra.mxu1 %v3639_v12  ;;  %1491 = vmatprep.subr.bf16.mxu0 %v3650_v17  ;;  %v3734_v12 = vld [vmem:[#allocation5 + $0x32c] ss:$16 sps:$4 sm:$0xff]  }
  0xbd   :  { %1478 = vmatprep.subr.bf16.mxu1 %v3647_v14  ;;  %v3732_v14 = vld [vmem:[#allocation5 + $0x328] ss:$16 sps:$4 sm:$0xff]   ;;  %v3740_v17 = vld [vmem:[#allocation5 + $0x30c] ss:$16 sps:$4 sm:$0xff]  }
  0xbe   :  { %1401 = vmatmul.mubr.bf16.vlgmr.msra.gmra.mxu0 %v4190_v20 }
  0xbf   :  { %1492 = vmatpush1.bf16.msra.mxu0 %v3648_v21  ;;  %1523 = vmatprep.mubr.bf16.mxu0 %v4171_v52  ;;  %v3672_v52 = vld [vmem:[#allocation5 + $0x268] ss:$16 sps:$4 sm:$0xff]  }
  0xc0   :  { %1479 = vmatpush2.bf16.msra.mxu1 %v3645_v18  ;;  %1493 = vmatprep.subr.bf16.mxu0 %v3656_v23  ;;  %v3735_v18 = vld [vmem:[#allocation5 + $0x548] ss:$16 sps:$4 sm:$0xff]   ;;  %v3746_v23 = vld [vmem:[#allocation5 + $0x60c] ss:$16 sps:$4 sm:$0xff]  }
  0xc1   :  { %1480 = vmatprep.subr.bf16.mxu1 %v3653_v22  ;;  %v3738_v21 = vld [vmem:[#allocation5 + $0x308] ss:$16 sps:$4 sm:$0xff]   ;;  %v3743_v22 = vld [vmem:[#allocation5 + $0x52c] ss:$16 sps:$4 sm:$0xff]  }
  0xc3   :  { %1494 = vmatpush1.bf16.msra.mxu0 %v3654_v25  ;;  %v3744_v25 = vld [vmem:[#allocation5 + $0x608] ss:$16 sps:$4 sm:$0xff]  }
  0xc4   :  { %1481 = vmatpush2.bf16.msra.mxu1 %v3651_v24  ;;  %1495 = vmatprep.subr.bf16.mxu0 %v3662_v27  ;;  %v3741_v24 = vld [vmem:[#allocation5 + $0x528] ss:$16 sps:$4 sm:$0xff]  }
  0xc5   :  { %1532 = vmatprep.subr.bf16.mxu1 %v3659_v26  ;;  %v3749_v26 = vld [vmem:[#allocation5 + $0x50c] ss:$16 sps:$4 sm:$0xff]   ;;  %v3752_v27 = vld [vmem:[#allocation8 + $0xe4] ss:$16 sps:$4 sm:$0xff]  }
  0xc7   :  { %1483 = vmatmul.mubr.bf16.vlgmr.msra.gmra.mxu1 %v4175_v8  ;;  %1496 = vmatpush1.bf16.msra.mxu0 %v3660_v29  ;;  %v3678_v8 = vld [vmem:[#allocation5 + $0x248] ss:$16 sps:$4 sm:$0xff]   ;;  %v3750_v29 = vld [vmem:[#allocation8 + $0xe0] ss:$16 sps:$4 sm:$0xff]  }
  0xc8   :  { %1533 = vmatpush1.bf16.msra.mxu1 %v3657_v28  ;;  %1497 = vmatprep.subr.bf16.mxu0 %v3668_v31  ;;  %v3747_v28 = vld [vmem:[#allocation5 + $0x508] ss:$16 sps:$4 sm:$0xff]   ;;  %v3753_v31 = vld [vmem:[#allocation8 + $0xc0] ss:$16 sps:$4 sm:$0xff]  }
  0xc9   :  { %1534 = vmatprep.subr.bf16.mxu1 %v3665_v30  ;;  %1564 = vmatprep.mubr.bf16.mxu1 %v4187_v36  ;;  %v3684_v36 = vld [vmem:[#allocation5 + $0x228] ss:$16 sps:$4 sm:$0xff]  }
  0xca   :  { %v3755_v30 = vld [vmem:[#allocation8 + $0xc4] ss:$16 sps:$4 sm:$0xff]  }
  0xcb   :  { %1498 = vmatpush1.bf16.msra.mxu0 %v3666_v33  ;;  %v3761_v33 = vld [vmem:[#allocation8 + $0x84] ss:$16 sps:$4 sm:$0xff]  }
  0xcc   :  { %1535 = vmatpush1.bf16.msra.mxu1 %v3663_v32  ;;  %1499 = vmatprep.subr.bf16.mxu0 %v3674_v35  ;;  %v3758_v32 = vld [vmem:[#allocation8 + $0xa4] ss:$16 sps:$4 sm:$0xff]  }
  0xcd   :  { %1536 = vmatprep.subr.bf16.mxu1 %v3671_v34  ;;  %v3759_v34 = vld [vmem:[#allocation8 + $0x80] ss:$16 sps:$4 sm:$0xff]   ;;  %v3764_v35 = vld [vmem:[#allocation8 + $0x64] ss:$16 sps:$4 sm:$0xff]  }
  0xcf   :  { %1500 = vmatpush1.bf16.msra.mxu0 %v3672_v52  ;;  %v3806_v52 = vld [vmem:[#allocation8 + $0x2e4] ss:$16 sps:$4 sm:$0xff]  }
  0xd0   :  { %1537 = vmatpush1.bf16.msra.mxu1 %v3669_v37  ;;  %1501 = vmatprep.subr.bf16.mxu0 %v3680_v39  ;;  %v3804_v37 = vld [vmem:[#allocation8 + $0x2e0] ss:$16 sps:$4 sm:$0xff]   ;;  %v3812_v39 = vld [vmem:[#allocation8 + $0x2c4] ss:$16 sps:$4 sm:$0xff]  }
  0xd1   :  { %1538 = vmatprep.subr.bf16.mxu1 %v3677_v38  ;;  %v3762_v38 = vld [vmem:[#allocation8 + $0x60] ss:$16 sps:$4 sm:$0xff]  }
  0xd3   :  { %1502 = vmatpush1.bf16.msra.mxu0 %v3678_v8  ;;  %v3770_v8 = vld [vmem:[#allocation8 + $0x24] ss:$16 sps:$4 sm:$0xff]  }
  0xd4   :  { %1539 = vmatpush1.bf16.msra.mxu1 %v3675_v40  ;;  %1503 = vmatprep.subr.bf16.mxu0 %v3686_v42  ;;  %v3765_v40 = vld [vmem:[#allocation8 + $0x40] ss:$16 sps:$4 sm:$0xff]   ;;  %v3818_v42 = vld [vmem:[#allocation8 + $0x2a4] ss:$16 sps:$4 sm:$0xff]  }
  0xd5   :  { %1540 = vmatprep.subr.bf16.mxu1 %v3683_v41  ;;  %v3816_v41 = vld [vmem:[#allocation8 + $0x2a0] ss:$16 sps:$4 sm:$0xff]  }
  0xd7   :  { %1504 = vmatpush1.bf16.msra.mxu0 %v3684_v36  ;;  %v3773_v36 = vld [vmem:[#allocation8 + $0x4] ss:$16 sps:$4 sm:$0xff]  }
  0xd8   :  { %1541 = vmatpush1.bf16.msra.mxu1 %v3681_v43  ;;  %1505 = vmatprep.subr.bf16.mxu0 %v3692_v45  ;;  %v3768_v43 = vld [vmem:[#allocation8 + $0x20] ss:$16 sps:$4 sm:$0xff]   ;;  %v3824_v45 = vld [vmem:[#allocation8 + $0x284] ss:$16 sps:$4 sm:$0xff]  }
  0xd9   :  { %1542 = vmatprep.subr.bf16.mxu1 %v3689_v44  ;;  %v3822_v44 = vld [vmem:[#allocation8 + $0x280] ss:$16 sps:$4 sm:$0xff]  }
  0xdb   :  { %1506 = vmatpush1.bf16.msra.mxu0 %v3690_v47  ;;  %v3776_v47 = vld [vmem:[#allocation8 + $0x1e4] ss:$16 sps:$4 sm:$0xff]  }
  0xdc   :  { %1543 = vmatpush1.bf16.msra.mxu1 %v3687_v46  ;;  %1507 = vmatprep.subr.bf16.mxu0 %v3698_v49  ;;  %v3771_v46 = vld [vmem:[#allocation8] ss:$16 sps:$4 sm:$0xff]   ;;  %v3830_v49 = vld [vmem:[#allocation8 + $0x264] ss:$16 sps:$4 sm:$0xff]  }
  0xdd   :  { %1544 = vmatprep.subr.bf16.mxu1 %v3695_v48  ;;  %v3828_v48 = vld [vmem:[#allocation8 + $0x260] ss:$16 sps:$4 sm:$0xff]  }
  0xdf   :  { %1508 = vmatpush2.bf16.msra.mxu0 %v3696_v51  ;;  %v3779_v51 = vld [vmem:[#allocation8 + $0x1c4] ss:$16 sps:$4 sm:$0xff]  }
  0xe0   :  { %1545 = vmatpush1.bf16.msra.mxu1 %v3693_v50  ;;  %1509 = vmatprep.subr.bf16.mxu0 %v3704_v54  ;;  %v3774_v50 = vld [vmem:[#allocation8 + $0x1e0] ss:$16 sps:$4 sm:$0xff]   ;;  %v3836_v54 = vld [vmem:[#allocation8 + $0x244] ss:$16 sps:$4 sm:$0xff]  }
  0xe1   :  { %1546 = vmatprep.subr.bf16.mxu1 %v3701_v53  ;;  %v3834_v53 = vld [vmem:[#allocation8 + $0x240] ss:$16 sps:$4 sm:$0xff]  }
  0xe3   :  { %1510 = vmatpush2.bf16.msra.mxu0 %v3702_v56  ;;  %v3782_v56 = vld [vmem:[#allocation8 + $0x1a4] ss:$16 sps:$4 sm:$0xff]  }
  0xe4   :  { %1547 = vmatpush1.bf16.msra.mxu1 %v3699_v55  ;;  %1511 = vmatprep.subr.bf16.mxu0 %v3710_v58  ;;  %v3777_v55 = vld [vmem:[#allocation8 + $0x1c0] ss:$16 sps:$4 sm:$0xff]   ;;  %v3842_v58 = vld [vmem:[#allocation8 + $0x224] ss:$16 sps:$4 sm:$0xff]  }
  0xe5   :  { %1548 = vmatprep.subr.bf16.mxu1 %v3707_v57  ;;  %v3840_v57 = vld [vmem:[#allocation8 + $0x220] ss:$16 sps:$4 sm:$0xff]  }
  0xe7   :  { %1512 = vmatpush2.bf16.msra.mxu0 %v3708_v60  ;;  %v3785_v60 = vld [vmem:[#allocation8 + $0x184] ss:$16 sps:$4 sm:$0xff]  }
  0xe8   :  { %1549 = vmatpush2.bf16.msra.mxu1 %v3705_v59  ;;  %1513 = vmatprep.subr.bf16.mxu0 %v3716_v62  ;;  %v3780_v59 = vld [vmem:[#allocation8 + $0x1a0] ss:$16 sps:$4 sm:$0xff]   ;;  %v3848_v62 = vld [vmem:[#allocation8 + $0x204] ss:$16 sps:$4 sm:$0xff]  }
  0xe9   :  { %1550 = vmatprep.subr.bf16.mxu1 %v3713_v61  ;;  %v3846_v61 = vld [vmem:[#allocation8 + $0x200] ss:$16 sps:$4 sm:$0xff]  }
  0xeb   :  { %1514 = vmatpush2.bf16.msra.mxu0 %v3714_v0  ;;  %v3788_v0 = vld [vmem:[#allocation8 + $0x164] ss:$16 sps:$4 sm:$0xff]  }
  0xec   :  { %1551 = vmatpush2.bf16.msra.mxu1 %v3711_v63  ;;  %1515 = vmatprep.subr.bf16.mxu0 %v3722_v2  ;;  %v3783_v63 = vld [vmem:[#allocation8 + $0x180] ss:$16 sps:$4 sm:$0xff]   ;;  %v3854_v2 = vld [vmem:[#allocation8 + $0x3e4] ss:$16 sps:$4 sm:$0xff]  }
  0xed   :  { %1552 = vmatprep.subr.bf16.mxu1 %v3719_v1  ;;  %v3852_v1 = vld [vmem:[#allocation8 + $0x3e0] ss:$16 sps:$4 sm:$0xff]  }
  0xef   :  { %1516 = vmatpush2.bf16.msra.mxu0 %v3720_v4  ;;  %v3791_v4 = vld [vmem:[#allocation8 + $0x144] ss:$16 sps:$4 sm:$0xff]  }
  0xf0   :  { %1553 = vmatpush2.bf16.msra.mxu1 %v3717_v3  ;;  %1517 = vmatprep.subr.bf16.mxu0 %v3728_v6  ;;  %v3786_v3 = vld [vmem:[#allocation8 + $0x160] ss:$16 sps:$4 sm:$0xff]   ;;  %v3860_v6 = vld [vmem:[#allocation8 + $0x3c4] ss:$16 sps:$4 sm:$0xff]  }
  0xf1   :  { %1554 = vmatprep.subr.bf16.mxu1 %v3725_v5  ;;  %v3858_v5 = vld [vmem:[#allocation8 + $0x3c0] ss:$16 sps:$4 sm:$0xff]  }
  0xf3   :  { %1518 = vmatpush2.bf16.msra.mxu0 %v3726_v10  ;;  %v3794_v10 = vld [vmem:[#allocation8 + $0x124] ss:$16 sps:$4 sm:$0xff]  }
  0xf4   :  { %1555 = vmatpush2.bf16.msra.mxu1 %v3723_v7  ;;  %1519 = vmatprep.subr.bf16.mxu0 %v3734_v12  ;;  %v3789_v7 = vld [vmem:[#allocation8 + $0x140] ss:$16 sps:$4 sm:$0xff]   ;;  %v3866_v12 = vld [vmem:[#allocation8 + $0x3a4] ss:$16 sps:$4 sm:$0xff]  }
  0xf5   :  { %1556 = vmatprep.subr.bf16.mxu1 %v3731_v11  ;;  %v3864_v11 = vld [vmem:[#allocation8 + $0x3a0] ss:$16 sps:$4 sm:$0xff]  }
  0xf7   :  { %1520 = vmatpush2.bf16.msra.mxu0 %v3732_v14  ;;  %v3797_v14 = vld [vmem:[#allocation8 + $0x104] ss:$16 sps:$4 sm:$0xff]  }
  0xf8   :  { %1557 = vmatpush2.bf16.msra.mxu1 %v3729_v13  ;;  %1521 = vmatprep.subr.bf16.mxu0 %v3740_v17  ;;  %v3792_v13 = vld [vmem:[#allocation8 + $0x120] ss:$16 sps:$4 sm:$0xff]  }
  0xf9   :  { %1558 = vmatprep.subr.bf16.mxu1 %v3737_v15  ;;  %v3872_v15 = vld [vmem:[#allocation8 + $0x384] ss:$16 sps:$4 sm:$0xff]  }
  0xfb   :  { %1522 = vmatpush2.bf16.msra.mxu0 %v3738_v21  ;;  %v3870_v21 = vld [vmem:[#allocation8 + $0x380] ss:$16 sps:$4 sm:$0xff]  }
  0xfc   :  { %1559 = vmatpush2.bf16.msra.mxu1 %v3735_v18  ;;  %1587 = vmatprep.subr.bf16.mxu0 %v3746_v23  ;;  %v3795_v23 = vld [vmem:[#allocation8 + $0x100] ss:$16 sps:$4 sm:$0xff]  }
  0xfd   :  { %1560 = vmatprep.subr.bf16.mxu1 %v3743_v22 }
  0xfe   :  { %1524 = vmatmul.mubr.bf16.vlgmr.msra.gmra.mxu0 %v4177_v9  ;;  %v3756_v9 = vld [vmem:[#allocation8 + $0xa0] ss:$16 sps:$4 sm:$0xff]  }
  0xff   :  { %1588 = vmatpush1.bf16.msra.mxu0 %v3744_v25  ;;  %1605 = vmatprep.mubr.bf16.mxu0 %v4111_v16 }
 0x100   :  { %1561 = vmatpush2.bf16.msra.mxu1 %v3741_v24  ;;  %2448 = vmatprep.subr.bf16.mxu0 %v3752_v27  ;;  %v3878_v27 = vld [vmem:[#allocation8 + $0x364] ss:$16 sps:$4 sm:$0xff]  }
 0x101   :  { %1562 = vmatprep.subr.bf16.mxu1 %v3749_v26  ;;  %v3800_v26 = vld [vmem:[#allocation8 + $0xec] ss:$16 sps:$4 sm:$0xff]  }
 0x104   :  { %1563 = vmatpush2.bf16.msra.mxu1 %v3747_v28 }
 0x105   :  { %2489 = vmatprep.subr.bf16.mxu1 %v3806_v52 }
 0x106   :  { %3236 = vmatmul.mubr.msk.bf16.vlgmr.msra.gmra.mxu0 %vm1282_vm0, %v4182_v19  ;;  %v3810_v19 = vld [vmem:[#allocation8 + $0x2c0] ss:$16 sps:$4 sm:$0xff]  }
 0x107   :  { %1565 = vmatmul.mubr.bf16.vlgmr.msra.gmra.mxu1 %v4190_v20  ;;  %2449 = vmatpush1.bf16.msra.mxu0 %v3750_v29  ;;  %v3767_v20 = vld [vmem:[#allocation8 + $0x44] ss:$16 sps:$4 sm:$0xff]  }
 0x108   :  { %2450 = vmatprep.subr.bf16.mxu0 %v3755_v30  ;;  %2490 = vmatpush1.bf16.msra.mxu1 %v3804_v37  ;;  %v3876_v30 = vld [vmem:[#allocation8 + $0x360] ss:$16 sps:$4 sm:$0xff]   ;;  %v3890_v37 = vld [vmem:[#allocation8 + $0x324] ss:$16 sps:$4 sm:$0xff]  }
 0x109   :  { %2491 = vmatprep.subr.bf16.mxu1 %v3812_v39  ;;  %v3891_v39 = vld [vmem:[#allocation8 + $0x300] ss:$16 sps:$4 sm:$0xff]  }
 0x10b   :  { %2451 = vmatpush1.bf16.msra.mxu0 %v3753_v31 }
 0x10c   :  { %2452 = vmatprep.subr.bf16.mxu0 %v3758_v32  ;;  %2492 = vmatpush1.bf16.msra.mxu1 %v3810_v19  ;;  %v3893_v19 = vld [vmem:[#allocation8 + $0x304] ss:$16 sps:$4 sm:$0xff]  }
 0x10d   :  { %2493 = vmatprep.subr.bf16.mxu1 %v3818_v42  ;;  %v1631_v42 = vlaneseq }
 0x10f   :  { %2453 = vmatpush1.bf16.msra.mxu0 %v3756_v9  ;;  %v3884_v9 = vld [vmem:[#allocation8 + $0x344] ss:$16 sps:$4 sm:$0xff]  }
 0x110   :  { %2454 = vmatprep.subr.bf16.mxu0 %v3761_v33  ;;  %2494 = vmatpush1.bf16.msra.mxu1 %v3816_v41 }
 0x111   :  { %2495 = vmatprep.subr.bf16.mxu1 %v3824_v45 }
 0x113   :  { %2455 = vmatpush1.bf16.msra.mxu0 %v3759_v34  ;;  %v3882_v34 = vld [vmem:[#allocation8 + $0x340] ss:$16 sps:$4 sm:$0xff]  }
 0x114   :  { %2456 = vmatprep.subr.bf16.mxu0 %v3764_v35  ;;  %2496 = vmatpush1.bf16.msra.mxu1 %v3822_v44  ;;  %v3237_v44 = vld.sshfl [vmem:[#allocation7] sm:$0x33 pattern:$0x75316420] }
 0x115   :  { %2497 = vmatprep.subr.bf16.mxu1 %v3830_v49 }
 0x117   :  { %2457 = vmatpush1.bf16.msra.mxu0 %v3762_v38  ;;  %v3888_v38 = vld [vmem:[#allocation8 + $0x320] ss:$16 sps:$4 sm:$0xff]  }
 0x118   :  { %2458 = vmatprep.subr.bf16.mxu0 %v3767_v20  ;;  %2498 = vmatpush1.bf16.msra.mxu1 %v3828_v48 }
 0x119   :  { %2499 = vmatprep.subr.bf16.mxu1 %v3836_v54 }
 0x11b   :  { %2459 = vmatpush1.bf16.msra.mxu0 %v3765_v40  ;;  %v3896_v40 = vld [vmem:[#allocation8 + $0x2ec] ss:$16 sps:$4 sm:$0xff]  }
 0x11c   :  { %2460 = vmatprep.subr.bf16.mxu0 %v3770_v8  ;;  %2500 = vmatpush1.bf16.msra.mxu1 %v3834_v53  ;;  %v4112_v8 = vmov 1966171168  }
 0x11d   :  { %2501 = vmatprep.subr.bf16.mxu1 %v3842_v58  ;;  %v1629_v41 = vunpack.c.l.s4 %v4112_v8 }
 0x11f   :  { %2461 = vmatpush1.bf16.msra.mxu0 %v3768_v43  ;;  %v1630_v43 = vunpack.c.0.s8 %v1629_v41  ;;  %v3879_v41 = vld [vmem:[#allocation8 + $0x128] ss:$16 sps:$4 sm:$0xff]  }
 0x120   :  { %2462 = vmatprep.subr.bf16.mxu0 %v3773_v36  ;;  %2502 = vmatpush1.bf16.msra.mxu1 %v3840_v57  ;;  %v1632_v36 = vshrl.u32 %v1631_v42, 7 }
 0x121   :  { %2503 = vmatprep.subr.bf16.mxu1 %v3848_v62 }
 0x122   :  { %v4201_v45 = vsub.s32 %v1630_v43, %v1632_v36 }
 0x123   :  { %2463 = vmatpush1.bf16.msra.mxu0 %v3771_v46  ;;  %v1627_v46 = vcombine.high %v3237_v44, %v3237_v44 }
 0x124   :  { %2464 = vmatprep.subr.bf16.mxu0 %v3776_v47  ;;  %2504 = vmatpush1.bf16.msra.mxu1 %v3846_v61  ;;  %v4204_v47 = vrot.slane %v3237_v44, %v4201_v45 }
 0x125   :  { %2505 = vmatprep.subr.bf16.mxu1 %v3854_v2  ;;  %v4207_v48 = vrot.slane %v1627_v46, %v4201_v45 }
 0x126   :  { %v1642_v43 = vcombine.high %v4204_v47, %v4204_v47 }
 0x127   :  { %2465 = vmatpush2.bf16.msra.mxu0 %v3774_v50  ;;  %v1645_v50 = vpack.i.b16 %v4204_v47, %v4204_v47  ;;  %v1643_v44 = vcombine.high %v4207_v48, %v4207_v48 }
 0x128   :  { %2466 = vmatprep.subr.bf16.mxu0 %v3779_v51  ;;  %2506 = vmatpush2.bf16.msra.mxu1 %v3852_v1  ;;  %v4211_v51 = vsub.s32 0, %v1632_v36  ;;  %v3887_v36 = vld [vmem:[#allocation8 + $0x10c] ss:$16 sps:$4 sm:$0xff]  }
 0x129   :  { %2507 = vmatprep.subr.bf16.mxu1 %v3860_v6 }
 0x12b   :  { %2467 = vmatpush2.bf16.msra.mxu0 %v3777_v55  ;;  %v1652_v55 = vpack.i.b16 %v4207_v48, %v4207_v48 }
 0x12c   :  { %2468 = vmatprep.subr.bf16.mxu0 %v3782_v56  ;;  %2508 = vmatpush2.bf16.msra.mxu1 %v3858_v5 }
 0x12d   :  { %2509 = vmatprep.subr.bf16.mxu1 %v3866_v12  ;;  %v3803_v12 = vld [vmem:[#allocation8 + $0xcc] ss:$16 sps:$4 sm:$0xff]  }
 0x12f   :  { %2469 = vmatpush2.bf16.msra.mxu0 %v3780_v59  ;;  %v1650_v59 = vrot.slane %v1645_v50, %v4211_v51  ;;  %v3885_v50 = vld [vmem:[#allocation8 + $0x108] ss:$16 sps:$4 sm:$0xff]  }
 0x130   :  { %2470 = vmatprep.subr.bf16.mxu0 %v3785_v60  ;;  %2510 = vmatpush2.bf16.msra.mxu1 %v3864_v11 }
 0x131   :  { %2511 = vmatprep.subr.bf16.mxu1 %v3872_v15  ;;  %v3809_v15 = vld [vmem:[#allocation8 + $0xac] ss:$16 sps:$4 sm:$0xff]  }
 0x133   :  { %2471 = vmatpush2.bf16.msra.mxu0 %v3783_v63  ;;  %v1657_v63 = vrot.slane %v1652_v55, %v4211_v51  ;;  %v1659_v55 = vpack.i.b16 %v1642_v43, %v1642_v43  ;;  %v3933_v43 = vld [vmem:[#allocation8 + $0x348] ss:$16 sps:$4 sm:$0xff]  }
 0x134   :  { %2472 = vmatprep.subr.bf16.mxu0 %v3788_v0  ;;  %2512 = vmatpush2.bf16.msra.mxu1 %v3870_v21  ;;  %v3813_v21 = vld [vmem:[#allocation8 + $0x88] ss:$16 sps:$4 sm:$0xff]  }
 0x135   :  { %2513 = vmatprep.subr.bf16.mxu1 %v3878_v27  ;;  %v3831_v27 = vld [vmem:[#allocation8 + $0x28] ss:$16 sps:$4 sm:$0xff]   ;;  %v1664_v48 = vrot.slane %v1659_v55, %v4211_v51 }
 0x136   :  { %v3951_v55 = vld [vmem:[#allocation10 + $0x18] sm:$0xff]  }
 0x137   :  { %2473 = vmatpush2.bf16.msra.mxu0 %v3786_v3 }
 0x138   :  { %2474 = vmatprep.subr.bf16.mxu0 %v3791_v4  ;;  %2514 = vmatpush2.bf16.msra.mxu1 %v3876_v30  ;;  %v3845_v30 = vld [vmem:[#allocation8 + $0x1ec] ss:$16 sps:$4 sm:$0xff]  }
 0x139   :  { %2515 = vmatprep.subr.bf16.mxu1 %v3884_v9  ;;  %v3849_v9 = vld [vmem:[#allocation8 + $0x1c8] ss:$16 sps:$4 sm:$0xff]  }
 0x13b   :  { %2475 = vmatpush2.bf16.msra.mxu0 %v3789_v7  ;;  %v3798_v7 = vld [vmem:[#allocation8 + $0xe8] ss:$16 sps:$4 sm:$0xff]  }
 0x13c   :  { %2476 = vmatprep.subr.bf16.mxu0 %v3794_v10  ;;  %2516 = vmatpush2.bf16.msra.mxu1 %v3882_v34  ;;  %v3855_v34 = vld [vmem:[#allocation8 + $0x1a8] ss:$16 sps:$4 sm:$0xff]  }
 0x13d   :  { %2517 = vmatprep.subr.bf16.mxu1 %v3890_v37  ;;  %v3861_v37 = vld [vmem:[#allocation8 + $0x188] ss:$16 sps:$4 sm:$0xff]  }
 0x13e   :  { %v1320_v17 = vpop.f32.mrf.mxu0 }
 0x13f   :  { %v1361_v18 = vpop.f32.mrf.mxu1  ;;  %2477 = vmatpush2.bf16.msra.mxu0 %v3792_v13 }
 0x140   :  { %v1362_v22 = vadd.f32 %v1361_v18, %v1320_v17  ;;  %v1322_v24 = vpop.f32.mrf.mxu0  ;;  %2478 = vmatprep.subr.bf16.mxu0 %v3797_v14  ;;  %2518 = vmatpush2.bf16.msra.mxu1 %v3888_v38  ;;  %v3801_v14 = vld [vmem:[#allocation8 + $0xc8] ss:$16 sps:$4 sm:$0xff]   ;;  %v3815_v18 = vld [vmem:[#allocation8 + $0x8c] ss:$16 sps:$4 sm:$0xff]  }
 0x141   :  { %v1363_v25 = vpop.f32.mrf.mxu1  ;;  %2519 = vmatprep.subr.bf16.mxu1 %v3893_v19  ;;  %v3807_v17 = vld [vmem:[#allocation8 + $0xa8] ss:$16 sps:$4 sm:$0xff]  }
 0x142   :  { %v1324_v28 = vpop.f32.mrf.mxu0  ;;  %v1364_v53 = vadd.f32 %v1363_v25, %v1322_v24  ;;  %v3827_v24 = vld [vmem:[#allocation8 + $0x4c] ss:$16 sps:$4 sm:$0xff]   ;;  %v3825_v25 = vld [vmem:[#allocation8 + $0x48] ss:$16 sps:$4 sm:$0xff]  }
 0x143   :  { %v1365_v29 = vpop.f32.mrf.mxu1  ;;  %2479 = vmatpush2.bf16.msra.mxu0 %v3795_v23  ;;  %v3819_v23 = vld [vmem:[#allocation8 + $0x68] ss:$16 sps:$4 sm:$0xff]   ;;  %v3839_v28 = vld [vmem:[#allocation8 + $0xc] ss:$16 sps:$4 sm:$0xff]  }
 0x144   :  { %v1325_v31 = vpop.f32.mrf.mxu0  ;;  %2530 = vmatprep.subr.bf16.mxu0 %v3800_v26  ;;  %2520 = vmatpush2.bf16.msra.mxu1 %v3891_v39  ;;  %v3833_v26 = vld [vmem:[#allocation8 + $0x2c] ss:$16 sps:$4 sm:$0xff]   ;;  %v3837_v29 = vld [vmem:[#allocation8 + $0x8] ss:$16 sps:$4 sm:$0xff]  }
 0x145   :  { %v1366_v32 = vpop.f32.mrf.mxu1  ;;  %2571 = vmatprep.subr.bf16.mxu1 %v3896_v40  ;;  %v3843_v31 = vld [vmem:[#allocation8 + $0x1e8] ss:$16 sps:$4 sm:$0xff]   ;;  %v3881_v40 = vld [vmem:[#allocation8 + $0x12c] ss:$16 sps:$4 sm:$0xff]  }
 0x146   :  { %v3851_v32 = vld [vmem:[#allocation8 + $0x1cc] ss:$16 sps:$4 sm:$0xff]   ;;  %v3867_v38 = vld [vmem:[#allocation8 + $0x168] ss:$16 sps:$4 sm:$0xff]  }
 0x147   :  { %v1443_v33 = vpop.f32.mrf.mxu1  ;;  %v3873_v19 = vld [vmem:[#allocation8 + $0x148] ss:$16 sps:$4 sm:$0xff]  }
 0x149   :  { %v1445_v35 = vpop.f32.mrf.mxu1 }
 0x14b   :  { %v1447_v52 = vpop.f32.mrf.mxu1 }
 0x14c   :  { %v3869_v52 = vld [vmem:[#allocation8 + $0x16c] ss:$16 sps:$4 sm:$0xff]  }
 0x14d   :  { %v1448_v20 = vpop.f32.mrf.mxu1 }
 0x14e   :  { %v3875_v20 = vld [vmem:[#allocation8 + $0x14c] ss:$16 sps:$4 sm:$0xff]  }
 0x17e   :  { %v1402_v49 = vpop.f32.mrf.mxu0 }
 0x17f   :  { %v1403_v54 = vadd.f32 %v1402_v49, %v1362_v22  ;;  %v3821_v22 = vld [vmem:[#allocation8 + $0x6c] ss:$16 sps:$4 sm:$0xff]  }
 0x180   :  { %v1404_v56 = vpop.f32.mrf.mxu0 }
 0x181   :  { %v1444_v57 = vadd.f32 %v1443_v33, %v1403_v54  ;;  %v1405_v58 = vadd.f32 %v1404_v56, %v1364_v53  ;;  %v3857_v33 = vld [vmem:[#allocation8 + $0x1ac] ss:$16 sps:$4 sm:$0xff]  }
 0x182   :  { %v1406_v60 = vpop.f32.mrf.mxu0 }
 0x183   :  { %v1614_v61 = vpack.c.bf16 %v1444_v57, %v1444_v57  ;;  %v1446_v62 = vadd.f32 %v1445_v35, %v1405_v58  ;;  %v3863_v35 = vld [vmem:[#allocation8 + $0x18c] ss:$16 sps:$4 sm:$0xff]   ;;  %v1666_v58 = vpack.i.b16 %v1643_v44, %v1643_v44  ;;  %v3936_v44 = vld [vmem:[#allocation8 + $0x328] ss:$16 sps:$4 sm:$0xff]  }
 0x184   :  { %v1407_v0 = vpop.f32.mrf.mxu0 }
 0x185   :  { %v1615_v1 = vpack.c.bf16 %v1446_v62, %v1446_v62  ;;  %v1672_v2 = vadd.bf16 %v1650_v59, %v1614_v61 }
 0x187   :  { %v4217_v3 = vpop.f32.mrf.mxu1  ;;  %v1673_v4 = vadd.bf16 %v1657_v63, %v1615_v1  ;;  %v4223_v10 = vmax.bf16 %v4111_v16, %v1672_v2  ;;  %v1671_v2 = vrot.slane %v1666_v58, %v4211_v51  ;;  %v3954_v58 = vld [vmem:[#allocation10 + $0x48] sm:$0xff]  }
 0x189   :  { %v4219_v5 = vpop.f32.mrf.mxu1  ;;  %v1677_v6 = vmax.bf16 %v4111_v16, %v1673_v4 }
 0x18b   :  { %v1488_v11 = vpop.f32.mrf.mxu1  ;;  %2480 = vmatprep.mubr.bf16.mxu0 %v1677_v6 }
 0x18c   :  { %2481 = vmatmul.mubr.bf16.vlgmr.msra.gmra.mxu0 %v4223_v10 }
 0x18d   :  { %v1489_v13 = vpop.f32.mrf.mxu1  ;;  %2531 = vmatpush1.bf16.msra.mxu0 %v3798_v7  ;;  %2562 = vmatprep.mubr.bf16.mxu0 %v1677_v6 }
 0x18e   :  { %2532 = vmatprep.subr.bf16.mxu0 %v3803_v12  ;;  %v3894_v12 = vld [vmem:[#allocation8 + $0x2e8] ss:$16 sps:$4 sm:$0xff]  }
 0x191   :  { %2533 = vmatpush1.bf16.msra.mxu0 %v3801_v14  ;;  %v3899_v14 = vld [vmem:[#allocation8 + $0x2cc] ss:$16 sps:$4 sm:$0xff]  }
 0x192   :  { %2534 = vmatprep.subr.bf16.mxu0 %v3809_v15  ;;  %v3942_v15 = vld [vmem:[#allocation10 + $0x78] sm:$0xff]  }
 0x195   :  { %2535 = vmatpush1.bf16.msra.mxu0 %v3807_v17  ;;  %v3943_v17 = vld [vmem:[#allocation10 + $0x38] sm:$0xff]  }
 0x196   :  { %2536 = vmatprep.subr.bf16.mxu0 %v3815_v18  ;;  %v3944_v18 = vld [vmem:[#allocation10 + $0x70] sm:$0xff]  }
 0x199   :  { %2537 = vmatpush1.bf16.msra.mxu0 %v3813_v21  ;;  %v3902_v21 = vld [vmem:[#allocation8 + $0x2ac] ss:$16 sps:$4 sm:$0xff]  }
 0x19a   :  { %2538 = vmatprep.subr.bf16.mxu0 %v3821_v22  ;;  %v3945_v22 = vld [vmem:[#allocation10 + $0x30] sm:$0xff]  }
 0x19d   :  { %2539 = vmatpush1.bf16.msra.mxu0 %v3819_v23  ;;  %v3946_v23 = vld [vmem:[#allocation10 + $0x68] sm:$0xff]  }
 0x19e   :  { %2540 = vmatprep.subr.bf16.mxu0 %v3827_v24  ;;  %v3900_v24 = vld [vmem:[#allocation8 + $0x2a8] ss:$16 sps:$4 sm:$0xff]  }
 0x1a1   :  { %2541 = vmatpush1.bf16.msra.mxu0 %v3825_v25  ;;  %v3905_v25 = vld [vmem:[#allocation8 + $0x28c] ss:$16 sps:$4 sm:$0xff]  }
 0x1a2   :  { %2542 = vmatprep.subr.bf16.mxu0 %v3833_v26  ;;  %v3947_v26 = vld [vmem:[#allocation10 + $0x28] sm:$0xff]  }
 0x1a5   :  { %2543 = vmatpush1.bf16.msra.mxu0 %v3831_v27  ;;  %v3903_v27 = vld [vmem:[#allocation8 + $0x288] ss:$16 sps:$4 sm:$0xff]  }
 0x1a6   :  { %2544 = vmatprep.subr.bf16.mxu0 %v3839_v28  ;;  %v3908_v28 = vld [vmem:[#allocation8 + $0x26c] ss:$16 sps:$4 sm:$0xff]  }
 0x1a9   :  { %2545 = vmatpush1.bf16.msra.mxu0 %v3837_v29  ;;  %v3906_v29 = vld [vmem:[#allocation8 + $0x268] ss:$16 sps:$4 sm:$0xff]  }
 0x1aa   :  { %2546 = vmatprep.subr.bf16.mxu0 %v3845_v30  ;;  %v3911_v30 = vld [vmem:[#allocation8 + $0x24c] ss:$16 sps:$4 sm:$0xff]  }
 0x1ad   :  { %2547 = vmatpush2.bf16.msra.mxu0 %v3843_v31  ;;  %v3909_v31 = vld [vmem:[#allocation8 + $0x248] ss:$16 sps:$4 sm:$0xff]  }
 0x1ae   :  { %2548 = vmatprep.subr.bf16.mxu0 %v3851_v32  ;;  %v3914_v32 = vld [vmem:[#allocation8 + $0x22c] ss:$16 sps:$4 sm:$0xff]  }
 0x1b1   :  { %2549 = vmatpush2.bf16.msra.mxu0 %v3849_v9  ;;  %v3912_v9 = vld [vmem:[#allocation8 + $0x228] ss:$16 sps:$4 sm:$0xff]  }
 0x1b2   :  { %2550 = vmatprep.subr.bf16.mxu0 %v3857_v33  ;;  %v3917_v33 = vld [vmem:[#allocation8 + $0x20c] ss:$16 sps:$4 sm:$0xff]  }
 0x1b5   :  { %2551 = vmatpush2.bf16.msra.mxu0 %v3855_v34  ;;  %v3915_v34 = vld [vmem:[#allocation8 + $0x208] ss:$16 sps:$4 sm:$0xff]  }
 0x1b6   :  { %2552 = vmatprep.subr.bf16.mxu0 %v3863_v35  ;;  %v3920_v35 = vld [vmem:[#allocation8 + $0x3ec] ss:$16 sps:$4 sm:$0xff]  }
 0x1b9   :  { %2553 = vmatpush2.bf16.msra.mxu0 %v3861_v37  ;;  %v3918_v37 = vld [vmem:[#allocation8 + $0x3e8] ss:$16 sps:$4 sm:$0xff]  }
 0x1ba   :  { %2554 = vmatprep.subr.bf16.mxu0 %v3869_v52  ;;  %v3923_v52 = vld [vmem:[#allocation8 + $0x3cc] ss:$16 sps:$4 sm:$0xff]  }
 0x1bd   :  { %2555 = vmatpush2.bf16.msra.mxu0 %v3867_v38  ;;  %v3921_v38 = vld [vmem:[#allocation8 + $0x3c8] ss:$16 sps:$4 sm:$0xff]  }
 0x1be   :  { %v1525_v39 = vpop.f32.mrf.mxu0  ;;  %2556 = vmatprep.subr.bf16.mxu0 %v3875_v20  ;;  %v3926_v20 = vld [vmem:[#allocation8 + $0x3ac] ss:$16 sps:$4 sm:$0xff]  }
 0x1bf   :  { %v1526_v49 = vadd.f32 %v1525_v39, %v4217_v3  ;;  %v3929_v39 = vld [vmem:[#allocation8 + $0x38c] ss:$16 sps:$4 sm:$0xff]  }
 0x1c0   :  { %v1527_v8 = vpop.f32.mrf.mxu0 }
 0x1c1   :  { %2557 = vmatpush2.bf16.msra.mxu0 %v3873_v19  ;;  %v1528_v56 = vadd.f32 %v1527_v8, %v4219_v5  ;;  %v3924_v19 = vld [vmem:[#allocation8 + $0x3a8] ss:$16 sps:$4 sm:$0xff]   ;;  %v3932_v8 = vld [vmem:[#allocation8 + $0x36c] ss:$16 sps:$4 sm:$0xff]  }
 0x1c2   :  { %v1529_v42 = vpop.f32.mrf.mxu0  ;;  %2558 = vmatprep.subr.bf16.mxu0 %v3881_v40  ;;  %v3927_v40 = vld [vmem:[#allocation8 + $0x388] ss:$16 sps:$4 sm:$0xff]  }
 0x1c3   :  { %v3935_v42 = vld [vmem:[#allocation8 + $0x34c] ss:$16 sps:$4 sm:$0xff]  }
 0x1c4   :  { %v1530_v46 = vpop.f32.mrf.mxu0 }
 0x1c5   :  { %2559 = vmatpush2.bf16.msra.mxu0 %v3879_v41  ;;  %v3930_v41 = vld [vmem:[#allocation8 + $0x368] ss:$16 sps:$4 sm:$0xff]   ;;  %v3941_v46 = vld [vmem:[#allocation8 + $0x30c] ss:$16 sps:$4 sm:$0xff]  }
 0x1c6   :  { %v1607_v54 = vpop.f32.mrf.mxu0  ;;  %2560 = vmatprep.subr.bf16.mxu0 %v3887_v36  ;;  %v3938_v36 = vld [vmem:[#allocation8 + $0x32c] ss:$16 sps:$4 sm:$0xff]  }
 0x1c7   :  { %v1566_v53 = vpop.f32.mrf.mxu1 }
 0x1c8   :  { %v1567_v57 = vadd.f32 %v1566_v53, %v1526_v49  ;;  %v1609_v60 = vpop.f32.mrf.mxu0  ;;  %v3948_v49 = vld [vmem:[#allocation10 + $0x60] sm:$0xff]   ;;  %v3939_v53 = vld [vmem:[#allocation8 + $0x308] ss:$16 sps:$4 sm:$0xff]  }
 0x1c9   :  { %v1568_v59 = vpop.f32.mrf.mxu1  ;;  %2561 = vmatpush2.bf16.msra.mxu0 %v3885_v50  ;;  %v3949_v50 = vld [vmem:[#allocation10 + $0x20] sm:$0xff]  }
 0x1ca   :  { %v1608_v47 = vadd.f32 %v1607_v54, %v1567_v57  ;;  %v1569_v61 = vadd.f32 %v1568_v59, %v1528_v56  ;;  %v1611_v63 = vpop.f32.mrf.mxu0  ;;  %3400 = vmatprep.subr.bf16.mxu0 %v3942_v15  ;;  %v3950_v54 = vld [vmem:[#allocation10 + $0x58] sm:$0xff]   ;;  %v3952_v56 = vld [vmem:[#allocation10 + $0x50] sm:$0xff]   ;;  %v3955_v59 = vld [vmem:[#allocation10 + $0x8] sm:$0xff]  }
 0x1cb   :  { %v1570_v62 = vpop.f32.mrf.mxu1  ;;  %v3953_v57 = vld [vmem:[#allocation10 + $0x10] sm:$0xff]   ;;  %v3970_v15 = vld [vmem:[#allocation10 + $0xc8] sm:$0xff]  }
 0x1cc   :  { %v1616_v0 = vpack.c.bf16 %v1608_v47, %v1608_v47  ;;  %v1610_v1 = vadd.f32 %v1609_v60, %v1569_v61  ;;  %2563 = vmatmul.mubr.bf16.vlgmr.msra.gmra.mxu0 %v4223_v10  ;;  %v1612_v4 = vpop.f32.mrf.mxu0  ;;  %v3897_v10 = vld [vmem:[#allocation8 + $0x2c8] ss:$16 sps:$4 sm:$0xff]   ;;  %v3956_v60 = vld [vmem:[#allocation10 + $0x40] sm:$0xff]   ;;  %v3960_v62 = vld [vmem:[#allocation10 + $0xf0] sm:$0xff]  }
 0x1cd   :  { %v1571_v3 = vpop.f32.mrf.mxu1  ;;  %3401 = vmatpush3.bf16.msra.mxu0 %v3943_v17  ;;  %v3957_v47 = vld [vmem:[#allocation10] sm:$0xff]   ;;  %v3958_v61 = vld [vmem:[#allocation10 + $0xf8] sm:$0xff]   ;;  %v3961_v63 = vld [vmem:[#allocation10 + $0xb0] sm:$0xff]  }
 0x1ce   :  { %v1617_v5 = vpack.c.bf16 %v1610_v1, %v1610_v1  ;;  %v1674_v6 = vadd.bf16 %v1664_v48, %v1616_v0  ;;  %3402 = vmatprep.subr.bf16.mxu0 %v3944_v18  ;;  %v3959_v48 = vld [vmem:[#allocation10 + $0xb8] sm:$0xff]   ;;  %v3962_v0 = vld [vmem:[#allocation10 + $0xe8] sm:$0xff]   ;;  %v3965_v3 = vld [vmem:[#allocation10 + $0xa0] sm:$0xff]  }
 0x1cf   :  { %v3963_v1 = vld [vmem:[#allocation10 + $0xa8] sm:$0xff]   ;;  %v3966_v4 = vld [vmem:[#allocation10 + $0xd8] sm:$0xff]   ;;  %v3972_v18 = vld [vmem:[#allocation10 + $0xc0] sm:$0xff]  }
 0x1d0   :  { %v1675_v7 = vadd.bf16 %v1671_v2, %v1617_v5  ;;  %v4237_v13 = vmax.bf16 %v4111_v16, %v1674_v6  ;;  %v3964_v2 = vld [vmem:[#allocation10 + $0xe0] sm:$0xff]   ;;  %v3967_v5 = vld [vmem:[#allocation10 + $0x98] sm:$0xff]   ;;  %v3971_v17 = vld [vmem:[#allocation10 + $0x88] sm:$0xff]  }
 0x1d1   :  { %3403 = vmatpush3.bf16.msra.mxu0 %v3945_v22 }
 0x1d2   :  { %v1679_v11 = vmax.bf16 %v4111_v16, %v1675_v7  ;;  %3404 = vmatprep.subr.bf16.mxu0 %v3946_v23 }
 0x1d4   :  { %2521 = vmatprep.mubr.bf16.mxu1 %v1679_v11 }
 0x1d5   :  { %2522 = vmatmul.mubr.bf16.vlgmr.msra.gmra.mxu1 %v4237_v13  ;;  %3405 = vmatpush3.bf16.msra.mxu0 %v3947_v26 }
 0x1d6   :  { %2572 = vmatpush1.bf16.msra.mxu1 %v3894_v12  ;;  %2603 = vmatprep.mubr.bf16.mxu1 %v1679_v11 }
 0x1d7   :  { %2573 = vmatprep.subr.bf16.mxu1 %v3899_v14  ;;  %3406 = vmatprep.subr.bf16.mxu0 %v3948_v49  ;;  %v3969_v14 = vld [vmem:[#allocation10 + $0x90] sm:$0xff]  }
 0x1d9   :  { %3407 = vmatpush3.bf16.msra.mxu0 %v3949_v50 }
 0x1da   :  { %2574 = vmatpush1.bf16.msra.mxu1 %v3897_v10  ;;  %3408 = vmatprep.subr.bf16.mxu0 %v3950_v54  ;;  %v3973_v10 = vld [vmem:[#allocation10 + $0x80] sm:$0xff]  }
 0x1db   :  { %2575 = vmatprep.subr.bf16.mxu1 %v3902_v21  ;;  %v3366_v21 = vld.sshfl [vmem:[%s4264_s4] sm:$0x33 pattern:$0x75316420] }
 0x1dc   :  { %v2625_v22 = vcombine.high %v3366_v21, %v3366_v21 }
 0x1dd   :  { %3409 = vmatpush3.bf16.msra.mxu0 %v3951_v55 }
 0x1de   :  { %2576 = vmatpush1.bf16.msra.mxu1 %v3900_v24  ;;  %3410 = vmatprep.subr.bf16.mxu0 %v3952_v56  ;;  %v2639_v26 = vrot.slane %v2625_v22, %v4201_v45 }
 0x1df   :  { %2577 = vmatprep.subr.bf16.mxu1 %v3905_v25  ;;  %v2632_v25 = vrot.slane %v3366_v21, %v4201_v45 }
 0x1e1   :  { %3411 = vmatpush3.bf16.msra.mxu0 %v3953_v57 }
 0x1e2   :  { %2578 = vmatpush1.bf16.msra.mxu1 %v3903_v27  ;;  %3412 = vmatprep.subr.bf16.mxu0 %v3954_v58 }
 0x1e3   :  { %2579 = vmatprep.subr.bf16.mxu1 %v3908_v28 }
 0x1e5   :  { %3413 = vmatpush3.bf16.msra.mxu0 %v3955_v59 }
 0x1e6   :  { %2580 = vmatpush1.bf16.msra.mxu1 %v3906_v29  ;;  %3414 = vmatprep.subr.bf16.mxu0 %v3956_v60  ;;  %v2643_v29 = vpack.i.b16 %v2632_v25, %v2632_v25 }
 0x1e7   :  { %2581 = vmatprep.subr.bf16.mxu1 %v3911_v30  ;;  %v2650_v30 = vpack.i.b16 %v2639_v26, %v2639_v26 }
 0x1e9   :  { %3415 = vmatpush3.bf16.msra.mxu0 %v3957_v47 }
 0x1ea   :  { %2582 = vmatpush1.bf16.msra.mxu1 %v3909_v31 }
 0x1eb   :  { %2583 = vmatprep.subr.bf16.mxu1 %v3914_v32 }
 0x1ee   :  { %2584 = vmatpush1.bf16.msra.mxu1 %v3912_v9  ;;  %v2648_v9 = vrot.slane %v2643_v29, %v4211_v51 }
 0x1ef   :  { %2585 = vmatprep.subr.bf16.mxu1 %v3917_v33 }
 0x1f2   :  { %2586 = vmatpush1.bf16.msra.mxu1 %v3915_v34 }
 0x1f3   :  { %2587 = vmatprep.subr.bf16.mxu1 %v3920_v35 }
 0x1f6   :  { %2588 = vmatpush2.bf16.msra.mxu1 %v3918_v37  ;;  %v2655_v37 = vrot.slane %v2650_v30, %v4211_v51 }
 0x1f7   :  { %2589 = vmatprep.subr.bf16.mxu1 %v3923_v52 }
 0x1fa   :  { %2590 = vmatpush2.bf16.msra.mxu1 %v3921_v38 }
 0x1fb   :  { %2591 = vmatprep.subr.bf16.mxu1 %v3926_v20 }
 0x1fe   :  { %2592 = vmatpush2.bf16.msra.mxu1 %v3924_v19 }
 0x1ff   :  { %2593 = vmatprep.subr.bf16.mxu1 %v3929_v39 }
 0x202   :  { %2594 = vmatpush2.bf16.msra.mxu1 %v3927_v40 }
 0x203   :  { %2595 = vmatprep.subr.bf16.mxu1 %v3932_v8  ;;  %v2640_v8 = vcombine.high %v2632_v25, %v2632_v25 }
 0x206   :  { %2596 = vmatpush2.bf16.msra.mxu1 %v3930_v41  ;;  %v2641_v41 = vcombine.high %v2639_v26, %v2639_v26 }
 0x207   :  { %2597 = vmatprep.subr.bf16.mxu1 %v3935_v42  ;;  %v2657_v42 = vpack.i.b16 %v2640_v8, %v2640_v8 }
 0x20a   :  { %2598 = vmatpush2.bf16.msra.mxu1 %v3933_v43  ;;  %v2664_v43 = vpack.i.b16 %v2641_v41, %v2641_v41 }
 0x20b   :  { %2599 = vmatprep.subr.bf16.mxu1 %v3938_v36 }
 0x20c   :  { %v2669_v54 = vrot.slane %v2664_v43, %v4211_v51 }
 0x20e   :  { %2600 = vmatpush2.bf16.msra.mxu1 %v3936_v44 }
 0x20f   :  { %2601 = vmatprep.subr.bf16.mxu1 %v3941_v46  ;;  %v2662_v46 = vrot.slane %v2657_v42, %v4211_v51  ;;  %v3367_v51 = vld [vmem:[%s4266_s6] ss:$0 sm:$0xff] }
 0x212   :  { %2602 = vmatpush2.bf16.msra.mxu1 %v3939_v53 }
 0x213   :  { %3422 = vmatprep.subr.bf16.mxu1 %v3958_v61 }
 0x215   :  { %2604 = vmatmul.mubr.bf16.vlgmr.msra.gmra.mxu1 %v4237_v13  ;;  %v3968_v13 = vld [vmem:[#allocation10 + $0xd0] sm:$0xff]  }
 0x216   :  { %3423 = vmatpush3.bf16.msra.mxu1 %v3959_v48 }
 0x217   :  { %3424 = vmatprep.subr.bf16.mxu1 %v3960_v62 }
 0x21a   :  { %3425 = vmatpush3.bf16.msra.mxu1 %v3961_v63 }
 0x21b   :  { %3426 = vmatprep.subr.bf16.mxu1 %v3962_v0 }
 0x21e   :  { %3427 = vmatpush3.bf16.msra.mxu1 %v3963_v1 }
 0x21f   :  { %3428 = vmatprep.subr.bf16.mxu1 %v3964_v2 }
 0x222   :  { %3429 = vmatpush3.bf16.msra.mxu1 %v3965_v3 }
 0x223   :  { %3430 = vmatprep.subr.bf16.mxu1 %v3966_v4 }
 0x226   :  { %3431 = vmatpush3.bf16.msra.mxu1 %v3967_v5 }
 0x227   :  { %3432 = vmatprep.subr.bf16.mxu1 %v3968_v13 }
 0x22a   :  { %3433 = vmatpush3.bf16.msra.mxu1 %v3969_v14 }
 0x22b   :  { %3434 = vmatprep.subr.bf16.mxu1 %v3970_v15 }
 0x22e   :  { %3435 = vmatpush3.bf16.msra.mxu1 %v3971_v17 }
 0x22f   :  { %3436 = vmatprep.subr.bf16.mxu1 %v3972_v18 }
 0x232   :  { %3437 = vmatpush3.bf16.msra.mxu1 %v3973_v10 }
 0x24c   :  { %v2482_v6 = vpop.f32.mrf.mxu0 }
 0x24e   :  { %v2484_v7 = vpop.f32.mrf.mxu0 }
 0x250   :  { %v2486_v11 = vpop.f32.mrf.mxu0 }
 0x252   :  { %v2487_v12 = vpop.f32.mrf.mxu0 }
 0x28c   :  { %v2564_v23 = vpop.f32.mrf.mxu0 }
 0x28e   :  { %v2566_v24 = vpop.f32.mrf.mxu0 }
 0x290   :  { %v2568_v27 = vpop.f32.mrf.mxu0 }
 0x292   :  { %v2569_v28 = vpop.f32.mrf.mxu0 }
 0x295   :  { %v2523_v31 = vpop.f32.mrf.mxu1 }
 0x296   :  { %v2524_v32 = vadd.f32 %v2523_v31, %v2482_v6 }
 0x297   :  { %v2525_v33 = vpop.f32.mrf.mxu1 }
 0x298   :  { %v2612_v34 = vpack.c.bf16 %v2524_v32, %v2524_v32  ;;  %v2526_v35 = vadd.f32 %v2525_v33, %v2484_v7 }
 0x299   :  { %v2527_v52 = vpop.f32.mrf.mxu1 }
 0x29a   :  { %v2613_v38 = vpack.c.bf16 %v2526_v35, %v2526_v35  ;;  %v2670_v20 = vadd.bf16 %v2648_v9, %v2612_v34 }
 0x29b   :  { %v2528_v19 = vpop.f32.mrf.mxu1 }
 0x29c   :  { %v2671_v39 = vadd.bf16 %v2655_v37, %v2613_v38  ;;  %v2674_v40 = vmax.bf16 %v4111_v16, %v2670_v20 }
 0x29e   :  { %v2675_v45 = vmax.bf16 %v4111_v16, %v2671_v39 }
 0x2a0   :  { %2973 = vmatprep.mubr.bf16.mxu0 %v2675_v45 }
 0x2a1   :  { %2974 = vmatmul.mubr.bf16.vlgmr.msra.gmra.mxu0 %v2674_v40 }
 0x2d5   :  { %v2605_v36 = vpop.f32.mrf.mxu1 }
 0x2d6   :  { %v2606_v44 = vadd.f32 %v2605_v36, %v2564_v23 }
 0x2d7   :  { %v2607_v49 = vpop.f32.mrf.mxu1 }
 0x2d8   :  { %v2614_v50 = vpack.c.bf16 %v2606_v44, %v2606_v44  ;;  %v2608_v53 = vadd.f32 %v2607_v49, %v2566_v24 }
 0x2d9   :  { %v2609_v55 = vpop.f32.mrf.mxu1 }
 0x2da   :  { %v2615_v56 = vpack.c.bf16 %v2608_v53, %v2608_v53  ;;  %v2672_v57 = vadd.bf16 %v2662_v46, %v2614_v50 }
 0x2db   :  { %v2610_v58 = vpop.f32.mrf.mxu1 }
 0x2dc   :  { %v2673_v59 = vadd.bf16 %v2669_v54, %v2615_v56  ;;  %v2676_v47 = vmax.bf16 %v4111_v16, %v2672_v57 }
 0x2de   :  { %v2677_v60 = vmax.bf16 %v4111_v16, %v2673_v59 }
 0x2e0   :  { %3013 = vmatprep.mubr.bf16.mxu1 %v2677_v60 }
 0x2e1   :  { %3014 = vmatmul.mubr.bf16.vlgmr.msra.gmra.mxu1 %v2676_v47 }
 0x361   :  { %v3416_v61 = vpop.f32.mrf.mxu0 }
 0x363   :  { %v3417_v48 = vpop.f32.mrf.mxu0 }
 0x364   :  { %v3418_v0 = vadd.f32 %v3417_v48, %v3416_v61 }
 0x365   :  { %v3419_v62 = vpop.f32.mrf.mxu0 }
 0x366   :  { %v2976_v3 = vadd.f32 %v3418_v0, %v3367_v51 }
 0x367   :  { %v3420_v63 = vpop.f32.mrf.mxu0 }
 0x3a1   :  { %v3438_v1 = vpop.f32.mrf.mxu1 }
 0x3a3   :  { %v3439_v2 = vpop.f32.mrf.mxu1 }
 0x3a4   :  { %v3440_v4 = vadd.f32 %v3439_v2, %v3438_v1 }
 0x3a5   :  { %v3441_v5 = vpop.f32.mrf.mxu1 }
 0x3a6   :  { %v3016_v6 = vadd.f32 %v3440_v4, %v2976_v3 }
 0x3a7   :  { %v3442_v16 = vpop.f32.mrf.mxu1 }
 0x3a8   :  { %3021 = vst [vmem:[#allocation11] sm:$0xff] %v3016_v6 }
 0x3a9   :  { %4085 = shalt.err (!%p4082_p1)
}
 0x3aa   :  { %3031 = dma.vmem_to_hbm [thread:$0]  %s3029_s29, 128, %s4267_s7, [#allocation4]  }
 0x3ab   :  { %4100 = dma.done.wait [#allocation4], 128  }
 0x3ac   :  { %4101 = vsyncadd [#allocation4], 4294967168 }
 0x3ad   :  { %3035 = vsyncpa [#allocation3], 1 }
 0x3ae   :  { %3036 = vsyncpa [#allocation6], 1 }
 0x3af   :  { %3037 = vsyncpa [#allocation9], 1 }
 0x3b0   :  { %3038 = vsyncpa [#allocation4], 1 }

// kernel: tpu_custom_call.1
= control target key start
LH: loop header
LB: loop body
LE: loop exit
PB: predicated region body
PF: predicated region fallthrough
CT: control target
= control target key end

     0   :  { %12 = vsyncpa [#allocation3], 0  ;;  %s4260_s0 = inlined_call_operand.hbm [shape: f32[8,784], index: 0, kind: input, shape index: {}]   ;;  %s4261_s1 = inlined_call_operand.hbm [shape: bf16[784,512], index: 1, kind: input, shape index: {}]   ;;  %s4262_s2 = inlined_call_operand.hbm [shape: bf16[1,512], index: 2, kind: input, shape index: {}]   ;;  %s4263_s3 = inlined_call_operand.hbm [shape: bf16[512,512], index: 3, kind: input, shape index: {}]   ;;  %s4264_s4 = inlined_call_operand.vmem [shape: bf16[1,512], index: 4, kind: input, shape index: {}]   ;;  %s4265_s5 = inlined_call_operand.hbm [shape: bf16[512,128], index: 5, kind: input, shape index: {}]   ;;  %s4266_s6 = inlined_call_operand.vmem [shape: f32[1,128], index: 6, kind: input, shape index: {}]   ;;  %s4267_s7 = inlined_call_operand.hbm [shape: f32[8,128], index: 7, kind: output, shape index: {}]  }
   0x1   :  { %13 = vsyncpa [#allocation6], 0 }
   0x2   :  { %14 = vsyncpa [#allocation9], 0 }
   0x3   :  { %15 = vsyncpa [#allocation4], 0  ;;  %s4102_s24 = smov [#allocation5]  }
   0x4   :  { %s31_s25 = sshll.u32 %s4102_s24, 4  ;;  %s32_s25 = int_to_ptr.vmem [resolvable:$true] %s31_s25 }
   0x5   :  { %s3982_s26 = scalar_lea.vmem %s32_s25, 25088  ;;  %p3987_p1 = scmp.lt.s32.totalorder %s32_s25, %s32_s25 }
   0x6   :  { %p3983_p0 = scmp.ne.s32.totalorder %s32_s25, %s3982_s26  ;;  %p3988_p2 = scmp.lt.s32.totalorder %s3982_s26, %s3982_s26 }
   0x8   :  { %p3989_p3 = por %p3988_p2, %p3987_p1 }
   0xa   :  { %p3990_p4 = pnand %p3989_p3, %p3983_p0 }
   0xc   :  { %3993 = shalt.err (!%p3990_p4)
}
   0xd   :  { %s4103_s27 = smov 256   ;;  %s4104_s28 = smov 16  }
   0xe   :  { %37 = dma.hbm_to_vmem [thread:$0]  %s4261_s1, 25088, %s32_s25, [#allocation6], %s4103_s27, %s4103_s27, %s4104_s28  }
   0xf   :  { %s4105_s8 = smov [#allocation8]   ;;  %s4106_s10 = smov [#allocation2]  }
  0x10   :  { %s53_s9 = sshll.u32 %s4105_s8, 4  ;;  %s22_s11 = sshll.u32 %s4106_s10, 4  ;;  %s54_s9 = int_to_ptr.vmem [resolvable:$true] %s53_s9  ;;  %s23_s11 = int_to_ptr.vmem [resolvable:$true] %s22_s11 }
  0x11   :  { %s4002_s12 = scalar_lea.vmem %s54_s9, 16384  ;;  %p4007_p6 = scmp.lt.s32.totalorder %s54_s9, %s54_s9 }
  0x12   :  { %p4003_p5 = scmp.ne.s32.totalorder %s54_s9, %s4002_s12  ;;  %p4008_p7 = scmp.lt.s32.totalorder %s4002_s12, %s4002_s12 }
  0x14   :  { %p4009_p8 = por %p4008_p7, %p4007_p6 }
  0x16   :  { %p4010_p9 = pnand %p4009_p8, %p4003_p5 }
  0x18   :  { %4013 = shalt.err (!%p4010_p9)
}
  0x19   :  { %59 = dma.hbm_to_vmem [thread:$0]  %s4263_s3, 16384, %s54_s9, [#allocation9], %s4103_s27, %s4103_s27, %s4104_s28  }
  0x1a   :  { %s4022_s15 = scalar_lea.vmem %s23_s11, 896  ;;  %p4027_p11 = scmp.lt.s32.totalorder %s23_s11, %s23_s11 }
  0x1b   :  { %p4023_p10 = scmp.ne.s32.totalorder %s23_s11, %s4022_s15  ;;  %p4028_p12 = scmp.lt.s32.totalorder %s4022_s15, %s4022_s15 }
  0x1d   :  { %p4029_p13 = por %p4028_p12, %p4027_p11 }
  0x1f   :  { %p4030_p0 = pnand %p4029_p13, %p4023_p10 }
  0x21   :  { %4033 = shalt.err (!%p4030_p0)
}
  0x22   :  { %25 = dma.hbm_to_vmem [thread:$0]  %s4260_s0, 896, %s23_s11, [#allocation3]  }
  0x23   :  { %s4107_s17 = smov [#allocation7]   ;;  %s4108_s19 = smov [#allocation10]  }
  0x24   :  { %s44_s18 = sshll.u32 %s4107_s17, 4  ;;  %s67_s20 = sshll.u32 %s4108_s19, 4  ;;  %s45_s18 = int_to_ptr.vmem [resolvable:$true] %s44_s18  ;;  %s68_s20 = int_to_ptr.vmem [resolvable:$true] %s67_s20 }
  0x25   :  { %s4042_s21 = scalar_lea.vmem %s45_s18, 64  ;;  %p4047_p2 = scmp.lt.s32.totalorder %s45_s18, %s45_s18 }
  0x26   :  { %p4043_p1 = scmp.ne.s32.totalorder %s45_s18, %s4042_s21  ;;  %p4048_p3 = scmp.lt.s32.totalorder %s4042_s21, %s4042_s21 }
  0x28   :  { %p4049_p4 = por %p4048_p3, %p4047_p2 }
  0x2a   :  { %p4050_p5 = pnand %p4049_p4, %p4043_p1 }
  0x2c   :  { %4053 = shalt.err (!%p4050_p5)
}
  0x2d   :  { %47 = dma.hbm_to_vmem [thread:$0]  %s4262_s2, 64, %s45_s18, [#allocation6]  }
  0x2e   :  { %s4062_s23 = scalar_lea.vmem %s68_s20, 4096  ;;  %p4067_p7 = scmp.lt.s32.totalorder %s68_s20, %s68_s20 }
  0x2f   :  { %p4063_p6 = scmp.ne.s32.totalorder %s68_s20, %s4062_s23  ;;  %p4068_p8 = scmp.lt.s32.totalorder %s4062_s23, %s4062_s23 }
  0x31   :  { %p4069_p9 = por %p4068_p8, %p4067_p7 }
  0x33   :  { %p4070_p10 = pnand %p4069_p9, %p4063_p6 }
  0x35   :  { %4073 = shalt.err (!%p4070_p10)
}
  0x36   :  { %s4109_s0 = smov 64   ;;  %s4110_s24 = smov 4  }
  0x37   :  { %73 = dma.hbm_to_vmem [thread:$0]  %s4265_s5, 4096, %s68_s20, [#allocation9], %s4109_s0, %s4109_s0, %s4110_s24  }
  0x38   :  { %4094 = dma.done.wait [#allocation3], 896  }
  0x39   :  { %4095 = vsyncadd [#allocation3], 4294966400 }
  0x3a   :  { %4096 = dma.done.wait [#allocation6], 25152  }
  0x3b   :  { %4097 = vsyncadd [#allocation6], 4294942144 }
  0x3c   :  { %4098 = dma.done.wait [#allocation9], 20480  }
  0x3d   :  { %4099 = vsyncadd [#allocation9], 4294946816  ;;  %v3456_v0 = vld [vmem:[#allocation5 + $0xe4] ss:$16 sps:$4 sm:$0xff]   ;;  %v3460_v2 = vld [vmem:[#allocation5 + $0xe0] ss:$16 sps:$4 sm:$0xff]  }
  0x3e   :  { %v3458_v1 = vld [vmem:[#allocation5 + $0x2e4] ss:$16 sps:$4 sm:$0xff]   ;;  %1286 = vmatprep.subr.bf16.mxu0 %v3456_v0  ;;  %v3461_v3 = vld [vmem:[#allocation5 + $0x2e0] ss:$16 sps:$4 sm:$0xff]   ;;  %vm1282_vm0 = vcmask 130048   ;;  %s4113_s28 = smov [#allocation11]  }
  0x3f   :  { %1327 = vmatprep.subr.bf16.mxu1 %v3458_v1  ;;  %v3462_v4 = vld [vmem:[#allocation5 + $0xc4] ss:$16 sps:$4 sm:$0xff]   ;;  %1287 = vmatpush1.bf16.msra.mxu0 %v3460_v2  ;;  %v3466_v6 = vld [vmem:[#allocation5 + $0xc0] ss:$16 sps:$4 sm:$0xff]   ;;  %s3028_s29 = sshll.u32 %s4113_s28, 4  ;;  %s3029_s29 = int_to_ptr.vmem [resolvable:$true] %s3028_s29 }
  0x40   :  { %1328 = vmatpush1.bf16.msra.mxu1 %v3461_v3  ;;  %v3464_v5 = vld [vmem:[#allocation5 + $0x2c4] ss:$16 sps:$4 sm:$0xff]   ;;  %1288 = vmatprep.subr.bf16.mxu0 %v3462_v4  ;;  %v3467_v7 = vld [vmem:[#allocation5 + $0x2c0] ss:$16 sps:$4 sm:$0xff]   ;;  %v92_v4 = vld [vmem:[#allocation2] sm:$0xff]  ;;  %s4074_s30 = scalar_lea.vmem %s3029_s29, 128  ;;  %p4079_p12 = scmp.lt.s32.totalorder %s3029_s29, %s3029_s29 }
  0x41   :  { %1329 = vmatprep.subr.bf16.mxu1 %v3464_v5  ;;  %v3468_v8 = vld [vmem:[#allocation5 + $0xa4] ss:$16 sps:$4 sm:$0xff]   ;;  %v3472_v10 = vld [vmem:[#allocation5 + $0xa0] ss:$16 sps:$4 sm:$0xff]   ;;  %v94_v5 = vld [vmem:[#allocation2 + $0x10] sm:$0xff]  ;;  %p4075_p11 = scmp.ne.s32.totalorder %s3029_s29, %s4074_s30  ;;  %p4080_p13 = scmp.lt.s32.totalorder %s4074_s30, %s4074_s30 }
  0x42   :  { %v3470_v9 = vld [vmem:[#allocation5 + $0x2a4] ss:$16 sps:$4 sm:$0xff]   ;;  %v3473_v11 = vld [vmem:[#allocation5 + $0x2a0] ss:$16 sps:$4 sm:$0xff]  }
  0x43   :  { %1289 = vmatpush1.bf16.msra.mxu0 %v3466_v6  ;;  %v3474_v12 = vld [vmem:[#allocation5 + $0x84] ss:$16 sps:$4 sm:$0xff]   ;;  %v3478_v14 = vld [vmem:[#allocation5 + $0x80] ss:$16 sps:$4 sm:$0xff]   ;;  %p4081_p0 = por %p4080_p13, %p4079_p12 }
  0x44   :  { %1330 = vmatpush1.bf16.msra.mxu1 %v3467_v7  ;;  %1290 = vmatprep.subr.bf16.mxu0 %v3468_v8  ;;  %v3476_v13 = vld [vmem:[#allocation5 + $0x284] ss:$16 sps:$4 sm:$0xff]   ;;  %v3479_v15 = vld [vmem:[#allocation5 + $0x280] ss:$16 sps:$4 sm:$0xff]   ;;  %v4175_v8 = vpack.c.bf16 %v92_v4, %v92_v4  ;;  %v3635_v4 = vld [vmem:[#allocation5 + $0x16c] ss:$16 sps:$4 sm:$0xff]  }
  0x45   :  { %1331 = vmatprep.subr.bf16.mxu1 %v3470_v9  ;;  %v3480_v16 = vld [vmem:[#allocation5 + $0x64] ss:$16 sps:$4 sm:$0xff]   ;;  %v3484_v18 = vld [vmem:[#allocation5 + $0x60] ss:$16 sps:$4 sm:$0xff]   ;;  %v4177_v9 = vpack.c.bf16 %v94_v5, %v94_v5  ;;  %p4082_p1 = pnand %p4081_p0, %p4075_p11 }
  0x46   :  { %v3482_v17 = vld [vmem:[#allocation5 + $0x264] ss:$16 sps:$4 sm:$0xff]   ;;  %v3485_v19 = vld [vmem:[#allocation5 + $0x260] ss:$16 sps:$4 sm:$0xff]  }
  0x47   :  { %1291 = vmatpush1.bf16.msra.mxu0 %v3472_v10  ;;  %v3486_v20 = vld [vmem:[#allocation5 + $0x44] ss:$16 sps:$4 sm:$0xff]   ;;  %v3490_v22 = vld [vmem:[#allocation5 + $0x40] ss:$16 sps:$4 sm:$0xff]  }
  0x48   :  { %1332 = vmatpush1.bf16.msra.mxu1 %v3473_v11  ;;  %1292 = vmatprep.subr.bf16.mxu0 %v3474_v12  ;;  %v3488_v21 = vld [vmem:[#allocation5 + $0x244] ss:$16 sps:$4 sm:$0xff]   ;;  %v3491_v23 = vld [vmem:[#allocation5 + $0x240] ss:$16 sps:$4 sm:$0xff]  }
  0x49   :  { %1333 = vmatprep.subr.bf16.mxu1 %v3476_v13  ;;  %v3492_v24 = vld [vmem:[#allocation5 + $0x24] ss:$16 sps:$4 sm:$0xff]   ;;  %v3496_v26 = vld [vmem:[#allocation5 + $0x20] ss:$16 sps:$4 sm:$0xff]   ;;  %v3563_v13 = vld [vmem:[#allocation5 + $0xec] ss:$16 sps:$4 sm:$0xff]  }
  0x4a   :  { %v3494_v25 = vld [vmem:[#allocation5 + $0x224] ss:$16 sps:$4 sm:$0xff]   ;;  %v3497_v27 = vld [vmem:[#allocation5 + $0x220] ss:$16 sps:$4 sm:$0xff]  }
  0x4b   :  { %1293 = vmatpush1.bf16.msra.mxu0 %v3478_v14  ;;  %v3498_v28 = vld [vmem:[#allocation5 + $0x4] ss:$16 sps:$4 sm:$0xff]   ;;  %v3502_v30 = vld [vmem:[#allocation5] ss:$16 sps:$4 sm:$0xff]  }
  0x4c   :  { %1334 = vmatpush1.bf16.msra.mxu1 %v3479_v15  ;;  %1294 = vmatprep.subr.bf16.mxu0 %v3480_v16  ;;  %v3500_v29 = vld [vmem:[#allocation5 + $0x204] ss:$16 sps:$4 sm:$0xff]   ;;  %v3503_v31 = vld [vmem:[#allocation5 + $0x200] ss:$16 sps:$4 sm:$0xff]   ;;  %v98_v15 = vld [vmem:[#allocation2 + $0x30] sm:$0xff]  ;;  %v4111_v16 = vmov 0  }
  0x4d   :  { %1335 = vmatprep.subr.bf16.mxu1 %v3482_v17  ;;  %v3504_v32 = vld [vmem:[#allocation5 + $0x1e4] ss:$16 sps:$4 sm:$0xff]   ;;  %v3508_v34 = vld [vmem:[#allocation5 + $0x1e0] ss:$16 sps:$4 sm:$0xff]  }
  0x4e   :  { %v3506_v33 = vld [vmem:[#allocation5 + $0x3e4] ss:$16 sps:$4 sm:$0xff]   ;;  %v3509_v35 = vld [vmem:[#allocation5 + $0x3e0] ss:$16 sps:$4 sm:$0xff]  }
  0x4f   :  { %1295 = vmatpush1.bf16.msra.mxu0 %v3484_v18  ;;  %v3510_v36 = vld [vmem:[#allocation5 + $0x1c4] ss:$16 sps:$4 sm:$0xff]   ;;  %v3514_v38 = vld [vmem:[#allocation5 + $0x1c0] ss:$16 sps:$4 sm:$0xff]   ;;  %v3561_v18 = vld [vmem:[#allocation5 + $0xe8] ss:$16 sps:$4 sm:$0xff]  }
  0x50   :  { %1336 = vmatpush1.bf16.msra.mxu1 %v3485_v19  ;;  %1296 = vmatprep.subr.bf16.mxu0 %v3486_v20  ;;  %v3512_v37 = vld [vmem:[#allocation5 + $0x3c4] ss:$16 sps:$4 sm:$0xff]   ;;  %v3515_v39 = vld [vmem:[#allocation5 + $0x3c0] ss:$16 sps:$4 sm:$0xff]   ;;  %v4182_v19 = vpack.c.bf16 %v98_v15, %v98_v15  ;;  %v96_v15 = vld [vmem:[#allocation2 + $0x20] sm:$0xff] }
  0x51   :  { %1337 = vmatprep.subr.bf16.mxu1 %v3488_v21  ;;  %v3516_v40 = vld [vmem:[#allocation5 + $0x1a4] ss:$16 sps:$4 sm:$0xff]   ;;  %v3520_v42 = vld [vmem:[#allocation5 + $0x1a0] ss:$16 sps:$4 sm:$0xff]   ;;  %v3569_v21 = vld [vmem:[#allocation5 + $0xcc] ss:$16 sps:$4 sm:$0xff]  }
  0x52   :  { %v3518_v41 = vld [vmem:[#allocation5 + $0x3a4] ss:$16 sps:$4 sm:$0xff]   ;;  %v3521_v43 = vld [vmem:[#allocation5 + $0x3a0] ss:$16 sps:$4 sm:$0xff]  }
  0x53   :  { %1297 = vmatpush1.bf16.msra.mxu0 %v3490_v22  ;;  %v3522_v44 = vld [vmem:[#allocation5 + $0x184] ss:$16 sps:$4 sm:$0xff]   ;;  %v3526_v47 = vld [vmem:[#allocation5 + $0x180] ss:$16 sps:$4 sm:$0xff]  }
  0x54   :  { %1338 = vmatpush1.bf16.msra.mxu1 %v3491_v23  ;;  %1298 = vmatprep.subr.bf16.mxu0 %v3492_v24  ;;  %v3524_v45 = vld [vmem:[#allocation5 + $0x384] ss:$16 sps:$4 sm:$0xff]   ;;  %v3527_v48 = vld [vmem:[#allocation5 + $0x380] ss:$16 sps:$4 sm:$0xff]   ;;  %v3567_v23 = vld [vmem:[#allocation5 + $0xc8] ss:$16 sps:$4 sm:$0xff]  }
  0x55   :  { %1339 = vmatprep.subr.bf16.mxu1 %v3494_v25  ;;  %v93_v46 = vld [vmem:[#allocation2 + $0x8] sm:$0xff]  ;;  %v95_v50 = vld [vmem:[#allocation2 + $0x18] sm:$0xff]  ;;  %v3575_v25 = vld [vmem:[#allocation5 + $0xac] ss:$16 sps:$4 sm:$0xff]  }
  0x56   :  { %v4169_v49 = vpack.c.bf16 %v93_v46, %v93_v46  ;;  %v3528_v51 = vld [vmem:[#allocation5 + $0x164] ss:$16 sps:$4 sm:$0xff]   ;;  %v4171_v52 = vpack.c.bf16 %v95_v50, %v95_v50  ;;  %v3532_v54 = vld [vmem:[#allocation5 + $0x160] ss:$16 sps:$4 sm:$0xff]  }
  0x57   :  { %1299 = vmatpush1.bf16.msra.mxu0 %v3496_v26  ;;  %v3530_v53 = vld [vmem:[#allocation5 + $0x364] ss:$16 sps:$4 sm:$0xff]   ;;  %v3533_v55 = vld [vmem:[#allocation5 + $0x360] ss:$16 sps:$4 sm:$0xff]  }
  0x58   :  { %1340 = vmatpush1.bf16.msra.mxu1 %v3497_v27  ;;  %1300 = vmatprep.subr.bf16.mxu0 %v3498_v28  ;;  %v3534_v56 = vld [vmem:[#allocation5 + $0x144] ss:$16 sps:$4 sm:$0xff]   ;;  %v3538_v58 = vld [vmem:[#allocation5 + $0x140] ss:$16 sps:$4 sm:$0xff]   ;;  %v3573_v27 = vld [vmem:[#allocation5 + $0xa8] ss:$16 sps:$4 sm:$0xff]  }
  0x59   :  { %1341 = vmatprep.subr.bf16.mxu1 %v3500_v29  ;;  %1318 = vmatprep.mubr.bf16.mxu0 %v4169_v49  ;;  %v3536_v57 = vld [vmem:[#allocation5 + $0x344] ss:$16 sps:$4 sm:$0xff]   ;;  %v3539_v59 = vld [vmem:[#allocation5 + $0x340] ss:$16 sps:$4 sm:$0xff]   ;;  %v3581_v29 = vld [vmem:[#allocation5 + $0x8c] ss:$16 sps:$4 sm:$0xff]  }
  0x5a   :  { %1359 = vmatprep.mubr.bf16.mxu1 %v4171_v52  ;;  %v3540_v60 = vld [vmem:[#allocation5 + $0x124] ss:$16 sps:$4 sm:$0xff]   ;;  %v3544_v62 = vld [vmem:[#allocation5 + $0x120] ss:$16 sps:$4 sm:$0xff]  }
  0x5b   :  { %1301 = vmatpush1.bf16.msra.mxu0 %v3502_v30  ;;  %v3542_v61 = vld [vmem:[#allocation5 + $0x324] ss:$16 sps:$4 sm:$0xff]   ;;  %v3545_v63 = vld [vmem:[#allocation5 + $0x320] ss:$16 sps:$4 sm:$0xff]  }
  0x5c   :  { %1342 = vmatpush1.bf16.msra.mxu1 %v3503_v31  ;;  %1302 = vmatprep.subr.bf16.mxu0 %v3504_v32  ;;  %v3546_v0 = vld [vmem:[#allocation5 + $0x104] ss:$16 sps:$4 sm:$0xff]   ;;  %v3550_v2 = vld [vmem:[#allocation5 + $0x100] ss:$16 sps:$4 sm:$0xff]   ;;  %v3579_v31 = vld [vmem:[#allocation5 + $0x88] ss:$16 sps:$4 sm:$0xff]  }
  0x5d   :  { %1343 = vmatprep.subr.bf16.mxu1 %v3506_v33  ;;  %v3548_v1 = vld [vmem:[#allocation5 + $0x304] ss:$16 sps:$4 sm:$0xff]   ;;  %v3551_v3 = vld [vmem:[#allocation5 + $0x300] ss:$16 sps:$4 sm:$0xff]   ;;  %v3587_v33 = vld [vmem:[#allocation5 + $0x6c] ss:$16 sps:$4 sm:$0xff]  }
  0x5e   :  { %v3554_v6 = vld [vmem:[#allocation5 + $0x4e4] ss:$16 sps:$4 sm:$0xff]   ;;  %v3552_v10 = vld [vmem:[#allocation5 + $0x4e0] ss:$16 sps:$4 sm:$0xff]  }
  0x5f   :  { %1303 = vmatpush2.bf16.msra.mxu0 %v3508_v34  ;;  %v3557_v7 = vld [vmem:[#allocation5 + $0x604] ss:$16 sps:$4 sm:$0xff]   ;;  %v3555_v11 = vld [vmem:[#allocation5 + $0x600] ss:$16 sps:$4 sm:$0xff]  }
  0x60   :  { %1344 = vmatpush2.bf16.msra.mxu1 %v3509_v35  ;;  %1304 = vmatprep.subr.bf16.mxu0 %v3510_v36  ;;  %v3560_v12 = vld [vmem:[#allocation5 + $0x4c4] ss:$16 sps:$4 sm:$0xff]   ;;  %v3558_v14 = vld [vmem:[#allocation5 + $0x4c0] ss:$16 sps:$4 sm:$0xff]  }
  0x61   :  { %1345 = vmatprep.subr.bf16.mxu1 %v3512_v37  ;;  %v3566_v17 = vld [vmem:[#allocation5 + $0x4a4] ss:$16 sps:$4 sm:$0xff]   ;;  %v3564_v20 = vld [vmem:[#allocation5 + $0x4a0] ss:$16 sps:$4 sm:$0xff]   ;;  %v3585_v37 = vld [vmem:[#allocation5 + $0x68] ss:$16 sps:$4 sm:$0xff]  }
  0x62   :  { %v3572_v22 = vld [vmem:[#allocation5 + $0x484] ss:$16 sps:$4 sm:$0xff]   ;;  %v3570_v24 = vld [vmem:[#allocation5 + $0x480] ss:$16 sps:$4 sm:$0xff]  }
  0x63   :  { %1305 = vmatpush2.bf16.msra.mxu0 %v3514_v38  ;;  %v3578_v26 = vld [vmem:[#allocation5 + $0x464] ss:$16 sps:$4 sm:$0xff]   ;;  %v3576_v28 = vld [vmem:[#allocation5 + $0x460] ss:$16 sps:$4 sm:$0xff]  }
  0x64   :  { %1346 = vmatpush2.bf16.msra.mxu1 %v3515_v39  ;;  %1306 = vmatprep.subr.bf16.mxu0 %v3516_v40  ;;  %v3584_v30 = vld [vmem:[#allocation5 + $0x444] ss:$16 sps:$4 sm:$0xff]   ;;  %v3582_v32 = vld [vmem:[#allocation5 + $0x440] ss:$16 sps:$4 sm:$0xff]   ;;  %v3593_v39 = vld [vmem:[#allocation5 + $0x4c] ss:$16 sps:$4 sm:$0xff]  }
  0x65   :  { %1347 = vmatprep.subr.bf16.mxu1 %v3518_v41  ;;  %v3590_v34 = vld [vmem:[#allocation5 + $0x424] ss:$16 sps:$4 sm:$0xff]   ;;  %v3588_v38 = vld [vmem:[#allocation5 + $0x420] ss:$16 sps:$4 sm:$0xff]   ;;  %v3591_v41 = vld [vmem:[#allocation5 + $0x48] ss:$16 sps:$4 sm:$0xff]  }
  0x66   :  { %v97_v35 = vld [vmem:[#allocation2 + $0x28] sm:$0xff] }
  0x67   :  { %1307 = vmatpush2.bf16.msra.mxu0 %v3520_v42  ;;  %v4187_v36 = vpack.c.bf16 %v97_v35, %v97_v35  ;;  %v3596_v40 = vld [vmem:[#allocation5 + $0x404] ss:$16 sps:$4 sm:$0xff]   ;;  %v3594_v42 = vld [vmem:[#allocation5 + $0x400] ss:$16 sps:$4 sm:$0xff]   ;;  %v3674_v35 = vld [vmem:[#allocation5 + $0x26c] ss:$16 sps:$4 sm:$0xff]  }
  0x68   :  { %1348 = vmatpush2.bf16.msra.mxu1 %v3521_v43  ;;  %1308 = vmatprep.subr.bf16.mxu0 %v3522_v44  ;;  %v3599_v43 = vld [vmem:[#allocation5 + $0x2c] ss:$16 sps:$4 sm:$0xff]   ;;  %v3602_v44 = vld [vmem:[#allocation5 + $0x5e4] ss:$16 sps:$4 sm:$0xff]   ;;  %v3600_v46 = vld [vmem:[#allocation5 + $0x5e0] ss:$16 sps:$4 sm:$0xff]  }
  0x69   :  { %1349 = vmatprep.subr.bf16.mxu1 %v3524_v45  ;;  %v3597_v45 = vld [vmem:[#allocation5 + $0x28] ss:$16 sps:$4 sm:$0xff]   ;;  %v3606_v50 = vld [vmem:[#allocation5 + $0x5c0] ss:$16 sps:$4 sm:$0xff]   ;;  %v3638_v5 = vld [vmem:[#allocation5 + $0x524] ss:$16 sps:$4 sm:$0xff]  }
  0x6b   :  { %1309 = vmatpush2.bf16.msra.mxu0 %v3526_v47  ;;  %v3605_v47 = vld [vmem:[#allocation5 + $0xc] ss:$16 sps:$4 sm:$0xff]  }
  0x6c   :  { %1350 = vmatpush2.bf16.msra.mxu1 %v3527_v48  ;;  %1310 = vmatprep.subr.bf16.mxu0 %v3528_v51  ;;  %v3608_v48 = vld [vmem:[#allocation5 + $0x5c4] ss:$16 sps:$4 sm:$0xff]   ;;  %v3611_v51 = vld [vmem:[#allocation5 + $0x1ec] ss:$16 sps:$4 sm:$0xff]  }
  0x6d   :  { %1351 = vmatprep.subr.bf16.mxu1 %v3530_v53  ;;  %v3614_v53 = vld [vmem:[#allocation5 + $0x5a4] ss:$16 sps:$4 sm:$0xff]  }
  0x6f   :  { %1311 = vmatpush2.bf16.msra.mxu0 %v3532_v54  ;;  %v3609_v54 = vld [vmem:[#allocation5 + $0x1e8] ss:$16 sps:$4 sm:$0xff]  }
  0x70   :  { %1352 = vmatpush2.bf16.msra.mxu1 %v3533_v55  ;;  %1312 = vmatprep.subr.bf16.mxu0 %v3534_v56  ;;  %v3612_v55 = vld [vmem:[#allocation5 + $0x5a0] ss:$16 sps:$4 sm:$0xff]   ;;  %v3617_v56 = vld [vmem:[#allocation5 + $0x1cc] ss:$16 sps:$4 sm:$0xff]  }
  0x71   :  { %1353 = vmatprep.subr.bf16.mxu1 %v3536_v57  ;;  %v3620_v57 = vld [vmem:[#allocation5 + $0x584] ss:$16 sps:$4 sm:$0xff]  }
  0x73   :  { %1313 = vmatpush2.bf16.msra.mxu0 %v3538_v58  ;;  %v3615_v58 = vld [vmem:[#allocation5 + $0x1c8] ss:$16 sps:$4 sm:$0xff]  }
  0x74   :  { %1354 = vmatpush2.bf16.msra.mxu1 %v3539_v59  ;;  %1314 = vmatprep.subr.bf16.mxu0 %v3540_v60  ;;  %v3618_v59 = vld [vmem:[#allocation5 + $0x580] ss:$16 sps:$4 sm:$0xff]   ;;  %v3623_v60 = vld [vmem:[#allocation5 + $0x1ac] ss:$16 sps:$4 sm:$0xff]  }
  0x75   :  { %1355 = vmatprep.subr.bf16.mxu1 %v3542_v61  ;;  %v3626_v61 = vld [vmem:[#allocation5 + $0x564] ss:$16 sps:$4 sm:$0xff]  }
  0x77   :  { %1315 = vmatpush2.bf16.msra.mxu0 %v3544_v62  ;;  %v3621_v62 = vld [vmem:[#allocation5 + $0x1a8] ss:$16 sps:$4 sm:$0xff]  }
  0x78   :  { %1356 = vmatpush2.bf16.msra.mxu1 %v3545_v63  ;;  %1316 = vmatprep.subr.bf16.mxu0 %v3546_v0  ;;  %v3624_v63 = vld [vmem:[#allocation5 + $0x560] ss:$16 sps:$4 sm:$0xff]   ;;  %v3629_v0 = vld [vmem:[#allocation5 + $0x18c] ss:$16 sps:$4 sm:$0xff]  }
  0x79   :  { %1357 = vmatprep.subr.bf16.mxu1 %v3548_v1  ;;  %v3632_v1 = vld [vmem:[#allocation5 + $0x544] ss:$16 sps:$4 sm:$0xff]  }
  0x7b   :  { %1317 = vmatpush2.bf16.msra.mxu0 %v3550_v2  ;;  %v3627_v2 = vld [vmem:[#allocation5 + $0x188] ss:$16 sps:$4 sm:$0xff]  }
  0x7c   :  { %1358 = vmatpush2.bf16.msra.mxu1 %v3551_v3  ;;  %1368 = vmatprep.subr.bf16.mxu0 %v3554_v6  ;;  %v3630_v3 = vld [vmem:[#allocation5 + $0x540] ss:$16 sps:$4 sm:$0xff]   ;;  %v3633_v6 = vld [vmem:[#allocation5 + $0x168] ss:$16 sps:$4 sm:$0xff]  }
  0x7d   :  { %1423 = vmatprep.subr.bf16.mxu1 %v3557_v7  ;;  %v3636_v7 = vld [vmem:[#allocation5 + $0x520] ss:$16 sps:$4 sm:$0xff]  }
  0x7e   :  { %1319 = vmatmul.mubr.bf16.vlgmr.msra.gmra.mxu0 %v4175_v8 }
  0x7f   :  { %1360 = vmatmul.mubr.bf16.vlgmr.msra.gmra.mxu1 %v4177_v9  ;;  %1369 = vmatpush1.bf16.msra.mxu0 %v3552_v10  ;;  %v3641_v10 = vld [vmem:[#allocation5 + $0x14c] ss:$16 sps:$4 sm:$0xff]  }
  0x80   :  { %1424 = vmatpush1.bf16.msra.mxu1 %v3555_v11  ;;  %1370 = vmatprep.subr.bf16.mxu0 %v3560_v12  ;;  %v3644_v11 = vld [vmem:[#allocation5 + $0x504] ss:$16 sps:$4 sm:$0xff]   ;;  %v3639_v12 = vld [vmem:[#allocation5 + $0x148] ss:$16 sps:$4 sm:$0xff]  }
  0x81   :  { %1441 = vmatprep.mubr.bf16.mxu1 %v4111_v16  ;;  %1450 = vmatprep.subr.bf16.mxu1 %v3563_v13  ;;  %v3642_v13 = vld [vmem:[#allocation5 + $0x500] ss:$16 sps:$4 sm:$0xff]  }
  0x82   :  { %1400 = vmatprep.mubr.bf16.mxu0 %v4187_v36 }
  0x83   :  { %1371 = vmatpush1.bf16.msra.mxu0 %v3558_v14  ;;  %v3647_v14 = vld [vmem:[#allocation5 + $0x12c] ss:$16 sps:$4 sm:$0xff]  }
  0x84   :  { %1372 = vmatprep.subr.bf16.mxu0 %v3566_v17  ;;  %v3650_v17 = vld [vmem:[#allocation5 + $0x2ec] ss:$16 sps:$4 sm:$0xff]  }
  0x87   :  { %3235 = vmatmul.mubr.msk.bf16.vlgmr.msra.gmra.mxu1 %vm1282_vm0, %v4182_v19  ;;  %1373 = vmatpush1.bf16.msra.mxu0 %v3564_v20  ;;  %v4190_v20 = vpack.c.bf16 %v96_v15, %v96_v15  ;;  %v3737_v15 = vld [vmem:[#allocation5 + $0x54c] ss:$16 sps:$4 sm:$0xff]  }
  0x88   :  { %1451 = vmatpush1.bf16.msra.mxu1 %v3561_v18  ;;  %1374 = vmatprep.subr.bf16.mxu0 %v3572_v22  ;;  %v3645_v18 = vld [vmem:[#allocation5 + $0x128] ss:$16 sps:$4 sm:$0xff]   ;;  %v3653_v22 = vld [vmem:[#allocation5 + $0x10c] ss:$16 sps:$4 sm:$0xff]  }
  0x89   :  { %1452 = vmatprep.subr.bf16.mxu1 %v3569_v21  ;;  %1482 = vmatprep.mubr.bf16.mxu1 %v4169_v49  ;;  %v3603_v49 = vld [vmem:[#allocation5 + $0x8] ss:$16 sps:$4 sm:$0xff]  }
  0x8a   :  { %v3648_v21 = vld [vmem:[#allocation5 + $0x2e8] ss:$16 sps:$4 sm:$0xff]  }
  0x8b   :  { %1375 = vmatpush1.bf16.msra.mxu0 %v3570_v24  ;;  %v3651_v24 = vld [vmem:[#allocation5 + $0x108] ss:$16 sps:$4 sm:$0xff]  }
  0x8c   :  { %1453 = vmatpush1.bf16.msra.mxu1 %v3567_v23  ;;  %1376 = vmatprep.subr.bf16.mxu0 %v3578_v26  ;;  %v3656_v23 = vld [vmem:[#allocation5 + $0x2cc] ss:$16 sps:$4 sm:$0xff]  }
  0x8d   :  { %1454 = vmatprep.subr.bf16.mxu1 %v3575_v25  ;;  %v3654_v25 = vld [vmem:[#allocation5 + $0x2c8] ss:$16 sps:$4 sm:$0xff]   ;;  %v3659_v26 = vld [vmem:[#allocation5 + $0x4ec] ss:$16 sps:$4 sm:$0xff]  }
  0x8f   :  { %1377 = vmatpush1.bf16.msra.mxu0 %v3576_v28  ;;  %v3657_v28 = vld [vmem:[#allocation5 + $0x4e8] ss:$16 sps:$4 sm:$0xff]  }
  0x90   :  { %1455 = vmatpush1.bf16.msra.mxu1 %v3573_v27  ;;  %1378 = vmatprep.subr.bf16.mxu0 %v3584_v30  ;;  %v3662_v27 = vld [vmem:[#allocation5 + $0x2ac] ss:$16 sps:$4 sm:$0xff]  }
  0x91   :  { %1456 = vmatprep.subr.bf16.mxu1 %v3581_v29  ;;  %v3660_v29 = vld [vmem:[#allocation5 + $0x2a8] ss:$16 sps:$4 sm:$0xff]   ;;  %v3665_v30 = vld [vmem:[#allocation5 + $0x4cc] ss:$16 sps:$4 sm:$0xff]  }
  0x93   :  { %1379 = vmatpush1.bf16.msra.mxu0 %v3582_v32  ;;  %v3663_v32 = vld [vmem:[#allocation5 + $0x4c8] ss:$16 sps:$4 sm:$0xff]  }
  0x94   :  { %1457 = vmatpush1.bf16.msra.mxu1 %v3579_v31  ;;  %1380 = vmatprep.subr.bf16.mxu0 %v3590_v34  ;;  %v3668_v31 = vld [vmem:[#allocation5 + $0x28c] ss:$16 sps:$4 sm:$0xff]  }
  0x95   :  { %1458 = vmatprep.subr.bf16.mxu1 %v3587_v33  ;;  %v3666_v33 = vld [vmem:[#allocation5 + $0x288] ss:$16 sps:$4 sm:$0xff]   ;;  %v3671_v34 = vld [vmem:[#allocation5 + $0x4ac] ss:$16 sps:$4 sm:$0xff]  }
  0x97   :  { %1381 = vmatpush1.bf16.msra.mxu0 %v3588_v38  ;;  %v3677_v38 = vld [vmem:[#allocation5 + $0x48c] ss:$16 sps:$4 sm:$0xff]  }
  0x98   :  { %1459 = vmatpush1.bf16.msra.mxu1 %v3585_v37  ;;  %1382 = vmatprep.subr.bf16.mxu0 %v3596_v40  ;;  %v3669_v37 = vld [vmem:[#allocation5 + $0x4a8] ss:$16 sps:$4 sm:$0xff]  }
  0x99   :  { %1460 = vmatprep.subr.bf16.mxu1 %v3593_v39  ;;  %v3680_v39 = vld [vmem:[#allocation5 + $0x24c] ss:$16 sps:$4 sm:$0xff]   ;;  %v3675_v40 = vld [vmem:[#allocation5 + $0x488] ss:$16 sps:$4 sm:$0xff]  }
  0x9b   :  { %1383 = vmatpush1.bf16.msra.mxu0 %v3594_v42  ;;  %v3686_v42 = vld [vmem:[#allocation5 + $0x22c] ss:$16 sps:$4 sm:$0xff]  }
  0x9c   :  { %1461 = vmatpush1.bf16.msra.mxu1 %v3591_v41  ;;  %1384 = vmatprep.subr.bf16.mxu0 %v3602_v44  ;;  %v3683_v41 = vld [vmem:[#allocation5 + $0x46c] ss:$16 sps:$4 sm:$0xff]  }
  0x9d   :  { %1462 = vmatprep.subr.bf16.mxu1 %v3599_v43  ;;  %v3681_v43 = vld [vmem:[#allocation5 + $0x468] ss:$16 sps:$4 sm:$0xff]   ;;  %v3689_v44 = vld [vmem:[#allocation5 + $0x44c] ss:$16 sps:$4 sm:$0xff]  }
  0x9f   :  { %1385 = vmatpush2.bf16.msra.mxu0 %v3600_v46  ;;  %v3687_v46 = vld [vmem:[#allocation5 + $0x448] ss:$16 sps:$4 sm:$0xff]  }
  0xa0   :  { %1463 = vmatpush1.bf16.msra.mxu1 %v3597_v45  ;;  %1386 = vmatprep.subr.bf16.mxu0 %v3608_v48  ;;  %v3692_v45 = vld [vmem:[#allocation5 + $0x20c] ss:$16 sps:$4 sm:$0xff]  }
  0xa1   :  { %1464 = vmatprep.subr.bf16.mxu1 %v3605_v47  ;;  %v3690_v47 = vld [vmem:[#allocation5 + $0x208] ss:$16 sps:$4 sm:$0xff]   ;;  %v3695_v48 = vld [vmem:[#allocation5 + $0x42c] ss:$16 sps:$4 sm:$0xff]  }
  0xa3   :  { %1387 = vmatpush2.bf16.msra.mxu0 %v3606_v50  ;;  %v3693_v50 = vld [vmem:[#allocation5 + $0x428] ss:$16 sps:$4 sm:$0xff]  }
  0xa4   :  { %1465 = vmatpush1.bf16.msra.mxu1 %v3603_v49  ;;  %1388 = vmatprep.subr.bf16.mxu0 %v3614_v53  ;;  %v3698_v49 = vld [vmem:[#allocation5 + $0x3ec] ss:$16 sps:$4 sm:$0xff]  }
  0xa5   :  { %1466 = vmatprep.subr.bf16.mxu1 %v3611_v51  ;;  %v3696_v51 = vld [vmem:[#allocation5 + $0x3e8] ss:$16 sps:$4 sm:$0xff]   ;;  %v3701_v53 = vld [vmem:[#allocation5 + $0x40c] ss:$16 sps:$4 sm:$0xff]  }
  0xa7   :  { %1389 = vmatpush2.bf16.msra.mxu0 %v3612_v55  ;;  %v3699_v55 = vld [vmem:[#allocation5 + $0x408] ss:$16 sps:$4 sm:$0xff]  }
  0xa8   :  { %1467 = vmatpush2.bf16.msra.mxu1 %v3609_v54  ;;  %1390 = vmatprep.subr.bf16.mxu0 %v3620_v57  ;;  %v3704_v54 = vld [vmem:[#allocation5 + $0x3cc] ss:$16 sps:$4 sm:$0xff]  }
  0xa9   :  { %1468 = vmatprep.subr.bf16.mxu1 %v3617_v56  ;;  %v3702_v56 = vld [vmem:[#allocation5 + $0x3c8] ss:$16 sps:$4 sm:$0xff]   ;;  %v3707_v57 = vld [vmem:[#allocation5 + $0x5ec] ss:$16 sps:$4 sm:$0xff]  }
  0xab   :  { %1391 = vmatpush2.bf16.msra.mxu0 %v3618_v59  ;;  %v3705_v59 = vld [vmem:[#allocation5 + $0x5e8] ss:$16 sps:$4 sm:$0xff]  }
  0xac   :  { %1469 = vmatpush2.bf16.msra.mxu1 %v3615_v58  ;;  %1392 = vmatprep.subr.bf16.mxu0 %v3626_v61  ;;  %v3710_v58 = vld [vmem:[#allocation5 + $0x3ac] ss:$16 sps:$4 sm:$0xff]  }
  0xad   :  { %1470 = vmatprep.subr.bf16.mxu1 %v3623_v60  ;;  %v3708_v60 = vld [vmem:[#allocation5 + $0x3a8] ss:$16 sps:$4 sm:$0xff]   ;;  %v3713_v61 = vld [vmem:[#allocation5 + $0x5cc] ss:$16 sps:$4 sm:$0xff]  }
  0xaf   :  { %1393 = vmatpush2.bf16.msra.mxu0 %v3624_v63  ;;  %v3711_v63 = vld [vmem:[#allocation5 + $0x5c8] ss:$16 sps:$4 sm:$0xff]  }
  0xb0   :  { %1471 = vmatpush2.bf16.msra.mxu1 %v3621_v62  ;;  %1394 = vmatprep.subr.bf16.mxu0 %v3632_v1  ;;  %v3716_v62 = vld [vmem:[#allocation5 + $0x38c] ss:$16 sps:$4 sm:$0xff]  }
  0xb1   :  { %1472 = vmatprep.subr.bf16.mxu1 %v3629_v0  ;;  %v3714_v0 = vld [vmem:[#allocation5 + $0x388] ss:$16 sps:$4 sm:$0xff]   ;;  %v3719_v1 = vld [vmem:[#allocation5 + $0x5ac] ss:$16 sps:$4 sm:$0xff]  }
  0xb3   :  { %1395 = vmatpush2.bf16.msra.mxu0 %v3630_v3  ;;  %v3717_v3 = vld [vmem:[#allocation5 + $0x5a8] ss:$16 sps:$4 sm:$0xff]  }
  0xb4   :  { %1473 = vmatpush2.bf16.msra.mxu1 %v3627_v2  ;;  %1396 = vmatprep.subr.bf16.mxu0 %v3638_v5  ;;  %v3722_v2 = vld [vmem:[#allocation5 + $0x36c] ss:$16 sps:$4 sm:$0xff]  }
  0xb5   :  { %1474 = vmatprep.subr.bf16.mxu1 %v3635_v4  ;;  %v3720_v4 = vld [vmem:[#allocation5 + $0x368] ss:$16 sps:$4 sm:$0xff]   ;;  %v3725_v5 = vld [vmem:[#allocation5 + $0x58c] ss:$16 sps:$4 sm:$0xff]  }
  0xb7   :  { %1397 = vmatpush2.bf16.msra.mxu0 %v3636_v7  ;;  %v3723_v7 = vld [vmem:[#allocation5 + $0x588] ss:$16 sps:$4 sm:$0xff]  }
  0xb8   :  { %1475 = vmatpush2.bf16.msra.mxu1 %v3633_v6  ;;  %1398 = vmatprep.subr.bf16.mxu0 %v3644_v11  ;;  %v3728_v6 = vld [vmem:[#allocation5 + $0x34c] ss:$16 sps:$4 sm:$0xff]  }
  0xb9   :  { %1476 = vmatprep.subr.bf16.mxu1 %v3641_v10  ;;  %v3726_v10 = vld [vmem:[#allocation5 + $0x348] ss:$16 sps:$4 sm:$0xff]   ;;  %v3731_v11 = vld [vmem:[#allocation5 + $0x56c] ss:$16 sps:$4 sm:$0xff]  }
  0xbb   :  { %1399 = vmatpush2.bf16.msra.mxu0 %v3642_v13  ;;  %v3729_v13 = vld [vmem:[#allocation5 + $0x568] ss:$16 sps:$4 sm:$0xff]  }
  0xbc   :  { %1477 = vmatpush2.bf16.msra.mxu1 %v3639_v12  ;;  %1491 = vmatprep.subr.bf16.mxu0 %v3650_v17  ;;  %v3734_v12 = vld [vmem:[#allocation5 + $0x32c] ss:$16 sps:$4 sm:$0xff]  }
  0xbd   :  { %1478 = vmatprep.subr.bf16.mxu1 %v3647_v14  ;;  %v3732_v14 = vld [vmem:[#allocation5 + $0x328] ss:$16 sps:$4 sm:$0xff]   ;;  %v3740_v17 = vld [vmem:[#allocation5 + $0x30c] ss:$16 sps:$4 sm:$0xff]  }
  0xbe   :  { %1401 = vmatmul.mubr.bf16.vlgmr.msra.gmra.mxu0 %v4190_v20 }
  0xbf   :  { %1492 = vmatpush1.bf16.msra.mxu0 %v3648_v21  ;;  %1523 = vmatprep.mubr.bf16.mxu0 %v4171_v52  ;;  %v3672_v52 = vld [vmem:[#allocation5 + $0x268] ss:$16 sps:$4 sm:$0xff]  }
  0xc0   :  { %1479 = vmatpush2.bf16.msra.mxu1 %v3645_v18  ;;  %1493 = vmatprep.subr.bf16.mxu0 %v3656_v23  ;;  %v3735_v18 = vld [vmem:[#allocation5 + $0x548] ss:$16 sps:$4 sm:$0xff]   ;;  %v3746_v23 = vld [vmem:[#allocation5 + $0x60c] ss:$16 sps:$4 sm:$0xff]  }
  0xc1   :  { %1480 = vmatprep.subr.bf16.mxu1 %v3653_v22  ;;  %v3738_v21 = vld [vmem:[#allocation5 + $0x308] ss:$16 sps:$4 sm:$0xff]   ;;  %v3743_v22 = vld [vmem:[#allocation5 + $0x52c] ss:$16 sps:$4 sm:$0xff]  }
  0xc3   :  { %1494 = vmatpush1.bf16.msra.mxu0 %v3654_v25  ;;  %v3744_v25 = vld [vmem:[#allocation5 + $0x608] ss:$16 sps:$4 sm:$0xff]  }
  0xc4   :  { %1481 = vmatpush2.bf16.msra.mxu1 %v3651_v24  ;;  %1495 = vmatprep.subr.bf16.mxu0 %v3662_v27  ;;  %v3741_v24 = vld [vmem:[#allocation5 + $0x528] ss:$16 sps:$4 sm:$0xff]  }
  0xc5   :  { %1532 = vmatprep.subr.bf16.mxu1 %v3659_v26  ;;  %v3749_v26 = vld [vmem:[#allocation5 + $0x50c] ss:$16 sps:$4 sm:$0xff]   ;;  %v3752_v27 = vld [vmem:[#allocation8 + $0xe4] ss:$16 sps:$4 sm:$0xff]  }
  0xc7   :  { %1483 = vmatmul.mubr.bf16.vlgmr.msra.gmra.mxu1 %v4175_v8  ;;  %1496 = vmatpush1.bf16.msra.mxu0 %v3660_v29  ;;  %v3678_v8 = vld [vmem:[#allocation5 + $0x248] ss:$16 sps:$4 sm:$0xff]   ;;  %v3750_v29 = vld [vmem:[#allocation8 + $0xe0] ss:$16 sps:$4 sm:$0xff]  }
  0xc8   :  { %1533 = vmatpush1.bf16.msra.mxu1 %v3657_v28  ;;  %1497 = vmatprep.subr.bf16.mxu0 %v3668_v31  ;;  %v3747_v28 = vld [vmem:[#allocation5 + $0x508] ss:$16 sps:$4 sm:$0xff]   ;;  %v3753_v31 = vld [vmem:[#allocation8 + $0xc0] ss:$16 sps:$4 sm:$0xff]  }
  0xc9   :  { %1534 = vmatprep.subr.bf16.mxu1 %v3665_v30  ;;  %1564 = vmatprep.mubr.bf16.mxu1 %v4187_v36  ;;  %v3684_v36 = vld [vmem:[#allocation5 + $0x228] ss:$16 sps:$4 sm:$0xff]  }
  0xca   :  { %v3755_v30 = vld [vmem:[#allocation8 + $0xc4] ss:$16 sps:$4 sm:$0xff]  }
  0xcb   :  { %1498 = vmatpush1.bf16.msra.mxu0 %v3666_v33  ;;  %v3761_v33 = vld [vmem:[#allocation8 + $0x84] ss:$16 sps:$4 sm:$0xff]  }
  0xcc   :  { %1535 = vmatpush1.bf16.msra.mxu1 %v3663_v32  ;;  %1499 = vmatprep.subr.bf16.mxu0 %v3674_v35  ;;  %v3758_v32 = vld [vmem:[#allocation8 + $0xa4] ss:$16 sps:$4 sm:$0xff]  }
  0xcd   :  { %1536 = vmatprep.subr.bf16.mxu1 %v3671_v34  ;;  %v3759_v34 = vld [vmem:[#allocation8 + $0x80] ss:$16 sps:$4 sm:$0xff]   ;;  %v3764_v35 = vld [vmem:[#allocation8 + $0x64] ss:$16 sps:$4 sm:$0xff]  }
  0xcf   :  { %1500 = vmatpush1.bf16.msra.mxu0 %v3672_v52  ;;  %v3806_v52 = vld [vmem:[#allocation8 + $0x2e4] ss:$16 sps:$4 sm:$0xff]  }
  0xd0   :  { %1537 = vmatpush1.bf16.msra.mxu1 %v3669_v37  ;;  %1501 = vmatprep.subr.bf16.mxu0 %v3680_v39  ;;  %v3804_v37 = vld [vmem:[#allocation8 + $0x2e0] ss:$16 sps:$4 sm:$0xff]   ;;  %v3812_v39 = vld [vmem:[#allocation8 + $0x2c4] ss:$16 sps:$4 sm:$0xff]  }
  0xd1   :  { %1538 = vmatprep.subr.bf16.mxu1 %v3677_v38  ;;  %v3762_v38 = vld [vmem:[#allocation8 + $0x60] ss:$16 sps:$4 sm:$0xff]  }
  0xd3   :  { %1502 = vmatpush1.bf16.msra.mxu0 %v3678_v8  ;;  %v3770_v8 = vld [vmem:[#allocation8 + $0x24] ss:$16 sps:$4 sm:$0xff]  }
  0xd4   :  { %1539 = vmatpush1.bf16.msra.mxu1 %v3675_v40  ;;  %1503 = vmatprep.subr.bf16.mxu0 %v3686_v42  ;;  %v3765_v40 = vld [vmem:[#allocation8 + $0x40] ss:$16 sps:$4 sm:$0xff]   ;;  %v3818_v42 = vld [vmem:[#allocation8 + $0x2a4] ss:$16 sps:$4 sm:$0xff]  }
  0xd5   :  { %1540 = vmatprep.subr.bf16.mxu1 %v3683_v41  ;;  %v3816_v41 = vld [vmem:[#allocation8 + $0x2a0] ss:$16 sps:$4 sm:$0xff]  }
  0xd7   :  { %1504 = vmatpush1.bf16.msra.mxu0 %v3684_v36  ;;  %v3773_v36 = vld [vmem:[#allocation8 + $0x4] ss:$16 sps:$4 sm:$0xff]  }
  0xd8   :  { %1541 = vmatpush1.bf16.msra.mxu1 %v3681_v43  ;;  %1505 = vmatprep.subr.bf16.mxu0 %v3692_v45  ;;  %v3768_v43 = vld [vmem:[#allocation8 + $0x20] ss:$16 sps:$4 sm:$0xff]   ;;  %v3824_v45 = vld [vmem:[#allocation8 + $0x284] ss:$16 sps:$4 sm:$0xff]  }
  0xd9   :  { %1542 = vmatprep.subr.bf16.mxu1 %v3689_v44  ;;  %v3822_v44 = vld [vmem:[#allocation8 + $0x280] ss:$16 sps:$4 sm:$0xff]  }
  0xdb   :  { %1506 = vmatpush1.bf16.msra.mxu0 %v3690_v47  ;;  %v3776_v47 = vld [vmem:[#allocation8 + $0x1e4] ss:$16 sps:$4 sm:$0xff]  }
  0xdc   :  { %1543 = vmatpush1.bf16.msra.mxu1 %v3687_v46  ;;  %1507 = vmatprep.subr.bf16.mxu0 %v3698_v49  ;;  %v3771_v46 = vld [vmem:[#allocation8] ss:$16 sps:$4 sm:$0xff]   ;;  %v3830_v49 = vld [vmem:[#allocation8 + $0x264] ss:$16 sps:$4 sm:$0xff]  }
  0xdd   :  { %1544 = vmatprep.subr.bf16.mxu1 %v3695_v48  ;;  %v3828_v48 = vld [vmem:[#allocation8 + $0x260] ss:$16 sps:$4 sm:$0xff]  }
  0xdf   :  { %1508 = vmatpush2.bf16.msra.mxu0 %v3696_v51  ;;  %v3779_v51 = vld [vmem:[#allocation8 + $0x1c4] ss:$16 sps:$4 sm:$0xff]  }
  0xe0   :  { %1545 = vmatpush1.bf16.msra.mxu1 %v3693_v50  ;;  %1509 = vmatprep.subr.bf16.mxu0 %v3704_v54  ;;  %v3774_v50 = vld [vmem:[#allocation8 + $0x1e0] ss:$16 sps:$4 sm:$0xff]   ;;  %v3836_v54 = vld [vmem:[#allocation8 + $0x244] ss:$16 sps:$4 sm:$0xff]  }
  0xe1   :  { %1546 = vmatprep.subr.bf16.mxu1 %v3701_v53  ;;  %v3834_v53 = vld [vmem:[#allocation8 + $0x240] ss:$16 sps:$4 sm:$0xff]  }
  0xe3   :  { %1510 = vmatpush2.bf16.msra.mxu0 %v3702_v56  ;;  %v3782_v56 = vld [vmem:[#allocation8 + $0x1a4] ss:$16 sps:$4 sm:$0xff]  }
  0xe4   :  { %1547 = vmatpush1.bf16.msra.mxu1 %v3699_v55  ;;  %1511 = vmatprep.subr.bf16.mxu0 %v3710_v58  ;;  %v3777_v55 = vld [vmem:[#allocation8 + $0x1c0] ss:$16 sps:$4 sm:$0xff]   ;;  %v3842_v58 = vld [vmem:[#allocation8 + $0x224] ss:$16 sps:$4 sm:$0xff]  }
  0xe5   :  { %1548 = vmatprep.subr.bf16.mxu1 %v3707_v57  ;;  %v3840_v57 = vld [vmem:[#allocation8 + $0x220] ss:$16 sps:$4 sm:$0xff]  }
  0xe7   :  { %1512 = vmatpush2.bf16.msra.mxu0 %v3708_v60  ;;  %v3785_v60 = vld [vmem:[#allocation8 + $0x184] ss:$16 sps:$4 sm:$0xff]  }
  0xe8   :  { %1549 = vmatpush2.bf16.msra.mxu1 %v3705_v59  ;;  %1513 = vmatprep.subr.bf16.mxu0 %v3716_v62  ;;  %v3780_v59 = vld [vmem:[#allocation8 + $0x1a0] ss:$16 sps:$4 sm:$0xff]   ;;  %v3848_v62 = vld [vmem:[#allocation8 + $0x204] ss:$16 sps:$4 sm:$0xff]  }
  0xe9   :  { %1550 = vmatprep.subr.bf16.mxu1 %v3713_v61  ;;  %v3846_v61 = vld [vmem:[#allocation8 + $0x200] ss:$16 sps:$4 sm:$0xff]  }
  0xeb   :  { %1514 = vmatpush2.bf16.msra.mxu0 %v3714_v0  ;;  %v3788_v0 = vld [vmem:[#allocation8 + $0x164] ss:$16 sps:$4 sm:$0xff]  }
  0xec   :  { %1551 = vmatpush2.bf16.msra.mxu1 %v3711_v63  ;;  %1515 = vmatprep.subr.bf16.mxu0 %v3722_v2  ;;  %v3783_v63 = vld [vmem:[#allocation8 + $0x180] ss:$16 sps:$4 sm:$0xff]   ;;  %v3854_v2 = vld [vmem:[#allocation8 + $0x3e4] ss:$16 sps:$4 sm:$0xff]  }
  0xed   :  { %1552 = vmatprep.subr.bf16.mxu1 %v3719_v1  ;;  %v3852_v1 = vld [vmem:[#allocation8 + $0x3e0] ss:$16 sps:$4 sm:$0xff]  }
  0xef   :  { %1516 = vmatpush2.bf16.msra.mxu0 %v3720_v4  ;;  %v3791_v4 = vld [vmem:[#allocation8 + $0x144] ss:$16 sps:$4 sm:$0xff]  }
  0xf0   :  { %1553 = vmatpush2.bf16.msra.mxu1 %v3717_v3  ;;  %1517 = vmatprep.subr.bf16.mxu0 %v3728_v6  ;;  %v3786_v3 = vld [vmem:[#allocation8 + $0x160] ss:$16 sps:$4 sm:$0xff]   ;;  %v3860_v6 = vld [vmem:[#allocation8 + $0x3c4] ss:$16 sps:$4 sm:$0xff]  }
  0xf1   :  { %1554 = vmatprep.subr.bf16.mxu1 %v3725_v5  ;;  %v3858_v5 = vld [vmem:[#allocation8 + $0x3c0] ss:$16 sps:$4 sm:$0xff]  }
  0xf3   :  { %1518 = vmatpush2.bf16.msra.mxu0 %v3726_v10  ;;  %v3794_v10 = vld [vmem:[#allocation8 + $0x124] ss:$16 sps:$4 sm:$0xff]  }
  0xf4   :  { %1555 = vmatpush2.bf16.msra.mxu1 %v3723_v7  ;;  %1519 = vmatprep.subr.bf16.mxu0 %v3734_v12  ;;  %v3789_v7 = vld [vmem:[#allocation8 + $0x140] ss:$16 sps:$4 sm:$0xff]   ;;  %v3866_v12 = vld [vmem:[#allocation8 + $0x3a4] ss:$16 sps:$4 sm:$0xff]  }
  0xf5   :  { %1556 = vmatprep.subr.bf16.mxu1 %v3731_v11  ;;  %v3864_v11 = vld [vmem:[#allocation8 + $0x3a0] ss:$16 sps:$4 sm:$0xff]  }
  0xf7   :  { %1520 = vmatpush2.bf16.msra.mxu0 %v3732_v14  ;;  %v3797_v14 = vld [vmem:[#allocation8 + $0x104] ss:$16 sps:$4 sm:$0xff]  }
  0xf8   :  { %1557 = vmatpush2.bf16.msra.mxu1 %v3729_v13  ;;  %1521 = vmatprep.subr.bf16.mxu0 %v3740_v17  ;;  %v3792_v13 = vld [vmem:[#allocation8 + $0x120] ss:$16 sps:$4 sm:$0xff]  }
  0xf9   :  { %1558 = vmatprep.subr.bf16.mxu1 %v3737_v15  ;;  %v3872_v15 = vld [vmem:[#allocation8 + $0x384] ss:$16 sps:$4 sm:$0xff]  }
  0xfb   :  { %1522 = vmatpush2.bf16.msra.mxu0 %v3738_v21  ;;  %v3870_v21 = vld [vmem:[#allocation8 + $0x380] ss:$16 sps:$4 sm:$0xff]  }
  0xfc   :  { %1559 = vmatpush2.bf16.msra.mxu1 %v3735_v18  ;;  %1587 = vmatprep.subr.bf16.mxu0 %v3746_v23  ;;  %v3795_v23 = vld [vmem:[#allocation8 + $0x100] ss:$16 sps:$4 sm:$0xff]  }
  0xfd   :  { %1560 = vmatprep.subr.bf16.mxu1 %v3743_v22 }
  0xfe   :  { %1524 = vmatmul.mubr.bf16.vlgmr.msra.gmra.mxu0 %v4177_v9  ;;  %v3756_v9 = vld [vmem:[#allocation8 + $0xa0] ss:$16 sps:$4 sm:$0xff]  }
  0xff   :  { %1588 = vmatpush1.bf16.msra.mxu0 %v3744_v25  ;;  %1605 = vmatprep.mubr.bf16.mxu0 %v4111_v16 }
 0x100   :  { %1561 = vmatpush2.bf16.msra.mxu1 %v3741_v24  ;;  %2448 = vmatprep.subr.bf16.mxu0 %v3752_v27  ;;  %v3878_v27 = vld [vmem:[#allocation8 + $0x364] ss:$16 sps:$4 sm:$0xff]  }
 0x101   :  { %1562 = vmatprep.subr.bf16.mxu1 %v3749_v26  ;;  %v3800_v26 = vld [vmem:[#allocation8 + $0xec] ss:$16 sps:$4 sm:$0xff]  }
 0x104   :  { %1563 = vmatpush2.bf16.msra.mxu1 %v3747_v28 }
 0x105   :  { %2489 = vmatprep.subr.bf16.mxu1 %v3806_v52 }
 0x106   :  { %3236 = vmatmul.mubr.msk.bf16.vlgmr.msra.gmra.mxu0 %vm1282_vm0, %v4182_v19  ;;  %v3810_v19 = vld [vmem:[#allocation8 + $0x2c0] ss:$16 sps:$4 sm:$0xff]  }
 0x107   :  { %1565 = vmatmul.mubr.bf16.vlgmr.msra.gmra.mxu1 %v4190_v20  ;;  %2449 = vmatpush1.bf16.msra.mxu0 %v3750_v29  ;;  %v3767_v20 = vld [vmem:[#allocation8 + $0x44] ss:$16 sps:$4 sm:$0xff]  }
 0x108   :  { %2450 = vmatprep.subr.bf16.mxu0 %v3755_v30  ;;  %2490 = vmatpush1.bf16.msra.mxu1 %v3804_v37  ;;  %v3876_v30 = vld [vmem:[#allocation8 + $0x360] ss:$16 sps:$4 sm:$0xff]   ;;  %v3890_v37 = vld [vmem:[#allocation8 + $0x324] ss:$16 sps:$4 sm:$0xff]  }
 0x109   :  { %2491 = vmatprep.subr.bf16.mxu1 %v3812_v39  ;;  %v3891_v39 = vld [vmem:[#allocation8 + $0x300] ss:$16 sps:$4 sm:$0xff]  }
 0x10b   :  { %2451 = vmatpush1.bf16.msra.mxu0 %v3753_v31 }
 0x10c   :  { %2452 = vmatprep.subr.bf16.mxu0 %v3758_v32  ;;  %2492 = vmatpush1.bf16.msra.mxu1 %v3810_v19  ;;  %v3893_v19 = vld [vmem:[#allocation8 + $0x304] ss:$16 sps:$4 sm:$0xff]  }
 0x10d   :  { %2493 = vmatprep.subr.bf16.mxu1 %v3818_v42  ;;  %v1631_v42 = vlaneseq }
 0x10f   :  { %2453 = vmatpush1.bf16.msra.mxu0 %v3756_v9  ;;  %v3884_v9 = vld [vmem:[#allocation8 + $0x344] ss:$16 sps:$4 sm:$0xff]  }
 0x110   :  { %2454 = vmatprep.subr.bf16.mxu0 %v3761_v33  ;;  %2494 = vmatpush1.bf16.msra.mxu1 %v3816_v41 }
 0x111   :  { %2495 = vmatprep.subr.bf16.mxu1 %v3824_v45 }
 0x113   :  { %2455 = vmatpush1.bf16.msra.mxu0 %v3759_v34  ;;  %v3882_v34 = vld [vmem:[#allocation8 + $0x340] ss:$16 sps:$4 sm:$0xff]  }
 0x114   :  { %2456 = vmatprep.subr.bf16.mxu0 %v3764_v35  ;;  %2496 = vmatpush1.bf16.msra.mxu1 %v3822_v44  ;;  %v3237_v44 = vld.sshfl [vmem:[#allocation7] sm:$0x33 pattern:$0x75316420] }
 0x115   :  { %2497 = vmatprep.subr.bf16.mxu1 %v3830_v49 }
 0x117   :  { %2457 = vmatpush1.bf16.msra.mxu0 %v3762_v38  ;;  %v3888_v38 = vld [vmem:[#allocation8 + $0x320] ss:$16 sps:$4 sm:$0xff]  }
 0x118   :  { %2458 = vmatprep.subr.bf16.mxu0 %v3767_v20  ;;  %2498 = vmatpush1.bf16.msra.mxu1 %v3828_v48 }
 0x119   :  { %2499 = vmatprep.subr.bf16.mxu1 %v3836_v54 }
 0x11b   :  { %2459 = vmatpush1.bf16.msra.mxu0 %v3765_v40  ;;  %v3896_v40 = vld [vmem:[#allocation8 + $0x2ec] ss:$16 sps:$4 sm:$0xff]  }
 0x11c   :  { %2460 = vmatprep.subr.bf16.mxu0 %v3770_v8  ;;  %2500 = vmatpush1.bf16.msra.mxu1 %v3834_v53  ;;  %v4112_v8 = vmov 1966171168  }
 0x11d   :  { %2501 = vmatprep.subr.bf16.mxu1 %v3842_v58  ;;  %v1629_v41 = vunpack.c.l.s4 %v4112_v8 }
 0x11f   :  { %2461 = vmatpush1.bf16.msra.mxu0 %v3768_v43  ;;  %v1630_v43 = vunpack.c.0.s8 %v1629_v41  ;;  %v3879_v41 = vld [vmem:[#allocation8 + $0x128] ss:$16 sps:$4 sm:$0xff]  }
 0x120   :  { %2462 = vmatprep.subr.bf16.mxu0 %v3773_v36  ;;  %2502 = vmatpush1.bf16.msra.mxu1 %v3840_v57  ;;  %v1632_v36 = vshrl.u32 %v1631_v42, 7 }
 0x121   :  { %2503 = vmatprep.subr.bf16.mxu1 %v3848_v62 }
 0x122   :  { %v4201_v45 = vsub.s32 %v1630_v43, %v1632_v36 }
 0x123   :  { %2463 = vmatpush1.bf16.msra.mxu0 %v3771_v46  ;;  %v1627_v46 = vcombine.high %v3237_v44, %v3237_v44 }
 0x124   :  { %2464 = vmatprep.subr.bf16.mxu0 %v3776_v47  ;;  %2504 = vmatpush1.bf16.msra.mxu1 %v3846_v61  ;;  %v4204_v47 = vrot.slane %v3237_v44, %v4201_v45 }
 0x125   :  { %2505 = vmatprep.subr.bf16.mxu1 %v3854_v2  ;;  %v4207_v48 = vrot.slane %v1627_v46, %v4201_v45 }
 0x126   :  { %v1642_v43 = vcombine.high %v4204_v47, %v4204_v47 }
 0x127   :  { %2465 = vmatpush2.bf16.msra.mxu0 %v3774_v50  ;;  %v1645_v50 = vpack.i.b16 %v4204_v47, %v4204_v47  ;;  %v1643_v44 = vcombine.high %v4207_v48, %v4207_v48 }
 0x128   :  { %2466 = vmatprep.subr.bf16.mxu0 %v3779_v51  ;;  %2506 = vmatpush2.bf16.msra.mxu1 %v3852_v1  ;;  %v4211_v51 = vsub.s32 0, %v1632_v36  ;;  %v3887_v36 = vld [vmem:[#allocation8 + $0x10c] ss:$16 sps:$4 sm:$0xff]  }
 0x129   :  { %2507 = vmatprep.subr.bf16.mxu1 %v3860_v6 }
 0x12b   :  { %2467 = vmatpush2.bf16.msra.mxu0 %v3777_v55  ;;  %v1652_v55 = vpack.i.b16 %v4207_v48, %v4207_v48 }
 0x12c   :  { %2468 = vmatprep.subr.bf16.mxu0 %v3782_v56  ;;  %2508 = vmatpush2.bf16.msra.mxu1 %v3858_v5 }
 0x12d   :  { %2509 = vmatprep.subr.bf16.mxu1 %v3866_v12  ;;  %v3803_v12 = vld [vmem:[#allocation8 + $0xcc] ss:$16 sps:$4 sm:$0xff]  }
 0x12f   :  { %2469 = vmatpush2.bf16.msra.mxu0 %v3780_v59  ;;  %v1650_v59 = vrot.slane %v1645_v50, %v4211_v51  ;;  %v3885_v50 = vld [vmem:[#allocation8 + $0x108] ss:$16 sps:$4 sm:$0xff]  }
 0x130   :  { %2470 = vmatprep.subr.bf16.mxu0 %v3785_v60  ;;  %2510 = vmatpush2.bf16.msra.mxu1 %v3864_v11 }
 0x131   :  { %2511 = vmatprep.subr.bf16.mxu1 %v3872_v15  ;;  %v3809_v15 = vld [vmem:[#allocation8 + $0xac] ss:$16 sps:$4 sm:$0xff]  }
 0x133   :  { %2471 = vmatpush2.bf16.msra.mxu0 %v3783_v63  ;;  %v1657_v63 = vrot.slane %v1652_v55, %v4211_v51  ;;  %v1659_v55 = vpack.i.b16 %v1642_v43, %v1642_v43  ;;  %v3933_v43 = vld [vmem:[#allocation8 + $0x348] ss:$16 sps:$4 sm:$0xff]  }
 0x134   :  { %2472 = vmatprep.subr.bf16.mxu0 %v3788_v0  ;;  %2512 = vmatpush2.bf16.msra.mxu1 %v3870_v21  ;;  %v3813_v21 = vld [vmem:[#allocation8 + $0x88] ss:$16 sps:$4 sm:$0xff]  }
 0x135   :  { %2513 = vmatprep.subr.bf16.mxu1 %v3878_v27  ;;  %v3831_v27 = vld [vmem:[#allocation8 + $0x28] ss:$16 sps:$4 sm:$0xff]   ;;  %v1664_v48 = vrot.slane %v1659_v55, %v4211_v51 }
 0x136   :  { %v3951_v55 = vld [vmem:[#allocation10 + $0x18] sm:$0xff]  }
 0x137   :  { %2473 = vmatpush2.bf16.msra.mxu0 %v3786_v3 }
 0x138   :  { %2474 = vmatprep.subr.bf16.mxu0 %v3791_v4  ;;  %2514 = vmatpush2.bf16.msra.mxu1 %v3876_v30  ;;  %v3845_v30 = vld [vmem:[#allocation8 + $0x1ec] ss:$16 sps:$4 sm:$0xff]  }
 0x139   :  { %2515 = vmatprep.subr.bf16.mxu1 %v3884_v9  ;;  %v3849_v9 = vld [vmem:[#allocation8 + $0x1c8] ss:$16 sps:$4 sm:$0xff]  }
 0x13b   :  { %2475 = vmatpush2.bf16.msra.mxu0 %v3789_v7  ;;  %v3798_v7 = vld [vmem:[#allocation8 + $0xe8] ss:$16 sps:$4 sm:$0xff]  }
 0x13c   :  { %2476 = vmatprep.subr.bf16.mxu0 %v3794_v10  ;;  %2516 = vmatpush2.bf16.msra.mxu1 %v3882_v34  ;;  %v3855_v34 = vld [vmem:[#allocation8 + $0x1a8] ss:$16 sps:$4 sm:$0xff]  }
 0x13d   :  { %2517 = vmatprep.subr.bf16.mxu1 %v3890_v37  ;;  %v3861_v37 = vld [vmem:[#allocation8 + $0x188] ss:$16 sps:$4 sm:$0xff]  }
 0x13e   :  { %v1320_v17 = vpop.f32.mrf.mxu0 }
 0x13f   :  { %v1361_v18 = vpop.f32.mrf.mxu1  ;;  %2477 = vmatpush2.bf16.msra.mxu0 %v3792_v13 }
 0x140   :  { %v1362_v22 = vadd.f32 %v1361_v18, %v1320_v17  ;;  %v1322_v24 = vpop.f32.mrf.mxu0  ;;  %2478 = vmatprep.subr.bf16.mxu0 %v3797_v14  ;;  %2518 = vmatpush2.bf16.msra.mxu1 %v3888_v38  ;;  %v3801_v14 = vld [vmem:[#allocation8 + $0xc8] ss:$16 sps:$4 sm:$0xff]   ;;  %v3815_v18 = vld [vmem:[#allocation8 + $0x8c] ss:$16 sps:$4 sm:$0xff]  }
 0x141   :  { %v1363_v25 = vpop.f32.mrf.mxu1  ;;  %2519 = vmatprep.subr.bf16.mxu1 %v3893_v19  ;;  %v3807_v17 = vld [vmem:[#allocation8 + $0xa8] ss:$16 sps:$4 sm:$0xff]  }
 0x142   :  { %v1324_v28 = vpop.f32.mrf.mxu0  ;;  %v1364_v53 = vadd.f32 %v1363_v25, %v1322_v24  ;;  %v3827_v24 = vld [vmem:[#allocation8 + $0x4c] ss:$16 sps:$4 sm:$0xff]   ;;  %v3825_v25 = vld [vmem:[#allocation8 + $0x48] ss:$16 sps:$4 sm:$0xff]  }
 0x143   :  { %v1365_v29 = vpop.f32.mrf.mxu1  ;;  %2479 = vmatpush2.bf16.msra.mxu0 %v3795_v23  ;;  %v3819_v23 = vld [vmem:[#allocation8 + $0x68] ss:$16 sps:$4 sm:$0xff]   ;;  %v3839_v28 = vld [vmem:[#allocation8 + $0xc] ss:$16 sps:$4 sm:$0xff]  }
 0x144   :  { %v1325_v31 = vpop.f32.mrf.mxu0  ;;  %2530 = vmatprep.subr.bf16.mxu0 %v3800_v26  ;;  %2520 = vmatpush2.bf16.msra.mxu1 %v3891_v39  ;;  %v3833_v26 = vld [vmem:[#allocation8 + $0x2c] ss:$16 sps:$4 sm:$0xff]   ;;  %v3837_v29 = vld [vmem:[#allocation8 + $0x8] ss:$16 sps:$4 sm:$0xff]  }
 0x145   :  { %v1366_v32 = vpop.f32.mrf.mxu1  ;;  %2571 = vmatprep.subr.bf16.mxu1 %v3896_v40  ;;  %v3843_v31 = vld [vmem:[#allocation8 + $0x1e8] ss:$16 sps:$4 sm:$0xff]   ;;  %v3881_v40 = vld [vmem:[#allocation8 + $0x12c] ss:$16 sps:$4 sm:$0xff]  }
 0x146   :  { %v3851_v32 = vld [vmem:[#allocation8 + $0x1cc] ss:$16 sps:$4 sm:$0xff]   ;;  %v3867_v38 = vld [vmem:[#allocation8 + $0x168] ss:$16 sps:$4 sm:$0xff]  }
 0x147   :  { %v1443_v33 = vpop.f32.mrf.mxu1  ;;  %v3873_v19 = vld [vmem:[#allocation8 + $0x148] ss:$16 sps:$4 sm:$0xff]  }
 0x149   :  { %v1445_v35 = vpop.f32.mrf.mxu1 }
 0x14b   :  { %v1447_v52 = vpop.f32.mrf.mxu1 }
 0x14c   :  { %v3869_v52 = vld [vmem:[#allocation8 + $0x16c] ss:$16 sps:$4 sm:$0xff]  }
 0x14d   :  { %v1448_v20 = vpop.f32.mrf.mxu1 }
 0x14e   :  { %v3875_v20 = vld [vmem:[#allocation8 + $0x14c] ss:$16 sps:$4 sm:$0xff]  }
 0x17e   :  { %v1402_v49 = vpop.f32.mrf.mxu0 }
 0x17f   :  { %v1403_v54 = vadd.f32 %v1402_v49, %v1362_v22  ;;  %v3821_v22 = vld [vmem:[#allocation8 + $0x6c] ss:$16 sps:$4 sm:$0xff]  }
 0x180   :  { %v1404_v56 = vpop.f32.mrf.mxu0 }
 0x181   :  { %v1444_v57 = vadd.f32 %v1443_v33, %v1403_v54  ;;  %v1405_v58 = vadd.f32 %v1404_v56, %v1364_v53  ;;  %v3857_v33 = vld [vmem:[#allocation8 + $0x1ac] ss:$16 sps:$4 sm:$0xff]  }
 0x182   :  { %v1406_v60 = vpop.f32.mrf.mxu0 }
 0x183   :  { %v1614_v61 = vpack.c.bf16 %v1444_v57, %v1444_v57  ;;  %v1446_v62 = vadd.f32 %v1445_v35, %v1405_v58  ;;  %v3863_v35 = vld [vmem:[#allocation8 + $0x18c] ss:$16 sps:$4 sm:$0xff]   ;;  %v1666_v58 = vpack.i.b16 %v1643_v44, %v1643_v44  ;;  %v3936_v44 = vld [vmem:[#allocation8 + $0x328] ss:$16 sps:$4 sm:$0xff]  }
 0x184   :  { %v1407_v0 = vpop.f32.mrf.mxu0 }
 0x185   :  { %v1615_v1 = vpack.c.bf16 %v1446_v62, %v1446_v62  ;;  %v1672_v2 = vadd.bf16 %v1650_v59, %v1614_v61 }
 0x187   :  { %v4217_v3 = vpop.f32.mrf.mxu1  ;;  %v1673_v4 = vadd.bf16 %v1657_v63, %v1615_v1  ;;  %v4223_v10 = vmax.bf16 %v4111_v16, %v1672_v2  ;;  %v1671_v2 = vrot.slane %v1666_v58, %v4211_v51  ;;  %v3954_v58 = vld [vmem:[#allocation10 + $0x48] sm:$0xff]  }
 0x189   :  { %v4219_v5 = vpop.f32.mrf.mxu1  ;;  %v1677_v6 = vmax.bf16 %v4111_v16, %v1673_v4 }
 0x18b   :  { %v1488_v11 = vpop.f32.mrf.mxu1  ;;  %2480 = vmatprep.mubr.bf16.mxu0 %v1677_v6 }
 0x18c   :  { %2481 = vmatmul.mubr.bf16.vlgmr.msra.gmra.mxu0 %v4223_v10 }
 0x18d   :  { %v1489_v13 = vpop.f32.mrf.mxu1  ;;  %2531 = vmatpush1.bf16.msra.mxu0 %v3798_v7  ;;  %2562 = vmatprep.mubr.bf16.mxu0 %v1677_v6 }
 0x18e   :  { %2532 = vmatprep.subr.bf16.mxu0 %v3803_v12  ;;  %v3894_v12 = vld [vmem:[#allocation8 + $0x2e8] ss:$16 sps:$4 sm:$0xff]  }
 0x191   :  { %2533 = vmatpush1.bf16.msra.mxu0 %v3801_v14  ;;  %v3899_v14 = vld [vmem:[#allocation8 + $0x2cc] ss:$16 sps:$4 sm:$0xff]  }
 0x192   :  { %2534 = vmatprep.subr.bf16.mxu0 %v3809_v15  ;;  %v3942_v15 = vld [vmem:[#allocation10 + $0x78] sm:$0xff]  }
 0x195   :  { %2535 = vmatpush1.bf16.msra.mxu0 %v3807_v17  ;;  %v3943_v17 = vld [vmem:[#allocation10 + $0x38] sm:$0xff]  }
 0x196   :  { %2536 = vmatprep.subr.bf16.mxu0 %v3815_v18  ;;  %v3944_v18 = vld [vmem:[#allocation10 + $0x70] sm:$0xff]  }
 0x199   :  { %2537 = vmatpush1.bf16.msra.mxu0 %v3813_v21  ;;  %v3902_v21 = vld [vmem:[#allocation8 + $0x2ac] ss:$16 sps:$4 sm:$0xff]  }
 0x19a   :  { %2538 = vmatprep.subr.bf16.mxu0 %v3821_v22  ;;  %v3945_v22 = vld [vmem:[#allocation10 + $0x30] sm:$0xff]  }
 0x19d   :  { %2539 = vmatpush1.bf16.msra.mxu0 %v3819_v23  ;;  %v3946_v23 = vld [vmem:[#allocation10 + $0x68] sm:$0xff]  }
 0x19e   :  { %2540 = vmatprep.subr.bf16.mxu0 %v3827_v24  ;;  %v3900_v24 = vld [vmem:[#allocation8 + $0x2a8] ss:$16 sps:$4 sm:$0xff]  }
 0x1a1   :  { %2541 = vmatpush1.bf16.msra.mxu0 %v3825_v25  ;;  %v3905_v25 = vld [vmem:[#allocation8 + $0x28c] ss:$16 sps:$4 sm:$0xff]  }
 0x1a2   :  { %2542 = vmatprep.subr.bf16.mxu0 %v3833_v26  ;;  %v3947_v26 = vld [vmem:[#allocation10 + $0x28] sm:$0xff]  }
 0x1a5   :  { %2543 = vmatpush1.bf16.msra.mxu0 %v3831_v27  ;;  %v3903_v27 = vld [vmem:[#allocation8 + $0x288] ss:$16 sps:$4 sm:$0xff]  }
 0x1a6   :  { %2544 = vmatprep.subr.bf16.mxu0 %v3839_v28  ;;  %v3908_v28 = vld [vmem:[#allocation8 + $0x26c] ss:$16 sps:$4 sm:$0xff]  }
 0x1a9   :  { %2545 = vmatpush1.bf16.msra.mxu0 %v3837_v29  ;;  %v3906_v29 = vld [vmem:[#allocation8 + $0x268] ss:$16 sps:$4 sm:$0xff]  }
 0x1aa   :  { %2546 = vmatprep.subr.bf16.mxu0 %v3845_v30  ;;  %v3911_v30 = vld [vmem:[#allocation8 + $0x24c] ss:$16 sps:$4 sm:$0xff]  }
 0x1ad   :  { %2547 = vmatpush2.bf16.msra.mxu0 %v3843_v31  ;;  %v3909_v31 = vld [vmem:[#allocation8 + $0x248] ss:$16 sps:$4 sm:$0xff]  }
 0x1ae   :  { %2548 = vmatprep.subr.bf16.mxu0 %v3851_v32  ;;  %v3914_v32 = vld [vmem:[#allocation8 + $0x22c] ss:$16 sps:$4 sm:$0xff]  }
 0x1b1   :  { %2549 = vmatpush2.bf16.msra.mxu0 %v3849_v9  ;;  %v3912_v9 = vld [vmem:[#allocation8 + $0x228] ss:$16 sps:$4 sm:$0xff]  }
 0x1b2   :  { %2550 = vmatprep.subr.bf16.mxu0 %v3857_v33  ;;  %v3917_v33 = vld [vmem:[#allocation8 + $0x20c] ss:$16 sps:$4 sm:$0xff]  }
 0x1b5   :  { %2551 = vmatpush2.bf16.msra.mxu0 %v3855_v34  ;;  %v3915_v34 = vld [vmem:[#allocation8 + $0x208] ss:$16 sps:$4 sm:$0xff]  }
 0x1b6   :  { %2552 = vmatprep.subr.bf16.mxu0 %v3863_v35  ;;  %v3920_v35 = vld [vmem:[#allocation8 + $0x3ec] ss:$16 sps:$4 sm:$0xff]  }
 0x1b9   :  { %2553 = vmatpush2.bf16.msra.mxu0 %v3861_v37  ;;  %v3918_v37 = vld [vmem:[#allocation8 + $0x3e8] ss:$16 sps:$4 sm:$0xff]  }
 0x1ba   :  { %2554 = vmatprep.subr.bf16.mxu0 %v3869_v52  ;;  %v3923_v52 = vld [vmem:[#allocation8 + $0x3cc] ss:$16 sps:$4 sm:$0xff]  }
 0x1bd   :  { %2555 = vmatpush2.bf16.msra.mxu0 %v3867_v38  ;;  %v3921_v38 = vld [vmem:[#allocation8 + $0x3c8] ss:$16 sps:$4 sm:$0xff]  }
 0x1be   :  { %v1525_v39 = vpop.f32.mrf.mxu0  ;;  %2556 = vmatprep.subr.bf16.mxu0 %v3875_v20  ;;  %v3926_v20 = vld [vmem:[#allocation8 + $0x3ac] ss:$16 sps:$4 sm:$0xff]  }
 0x1bf   :  { %v1526_v49 = vadd.f32 %v1525_v39, %v4217_v3  ;;  %v3929_v39 = vld [vmem:[#allocation8 + $0x38c] ss:$16 sps:$4 sm:$0xff]  }
 0x1c0   :  { %v1527_v8 = vpop.f32.mrf.mxu0 }
 0x1c1   :  { %2557 = vmatpush2.bf16.msra.mxu0 %v3873_v19  ;;  %v1528_v56 = vadd.f32 %v1527_v8, %v4219_v5  ;;  %v3924_v19 = vld [vmem:[#allocation8 + $0x3a8] ss:$16 sps:$4 sm:$0xff]   ;;  %v3932_v8 = vld [vmem:[#allocation8 + $0x36c] ss:$16 sps:$4 sm:$0xff]  }
 0x1c2   :  { %v1529_v42 = vpop.f32.mrf.mxu0  ;;  %2558 = vmatprep.subr.bf16.mxu0 %v3881_v40  ;;  %v3927_v40 = vld [vmem:[#allocation8 + $0x388] ss:$16 sps:$4 sm:$0xff]  }
 0x1c3   :  { %v3935_v42 = vld [vmem:[#allocation8 + $0x34c] ss:$16 sps:$4 sm:$0xff]  }
 0x1c4   :  { %v1530_v46 = vpop.f32.mrf.mxu0 }
 0x1c5   :  { %2559 = vmatpush2.bf16.msra.mxu0 %v3879_v41  ;;  %v3930_v41 = vld [vmem:[#allocation8 + $0x368] ss:$16 sps:$4 sm:$0xff]   ;;  %v3941_v46 = vld [vmem:[#allocation8 + $0x30c] ss:$16 sps:$4 sm:$0xff]  }
 0x1c6   :  { %v1607_v54 = vpop.f32.mrf.mxu0  ;;  %2560 = vmatprep.subr.bf16.mxu0 %v3887_v36  ;;  %v3938_v36 = vld [vmem:[#allocation8 + $0x32c] ss:$16 sps:$4 sm:$0xff]  }
 0x1c7   :  { %v1566_v53 = vpop.f32.mrf.mxu1 }
 0x1c8   :  { %v1567_v57 = vadd.f32 %v1566_v53, %v1526_v49  ;;  %v1609_v60 = vpop.f32.mrf.mxu0  ;;  %v3948_v49 = vld [vmem:[#allocation10 + $0x60] sm:$0xff]   ;;  %v3939_v53 = vld [vmem:[#allocation8 + $0x308] ss:$16 sps:$4 sm:$0xff]  }
 0x1c9   :  { %v1568_v59 = vpop.f32.mrf.mxu1  ;;  %2561 = vmatpush2.bf16.msra.mxu0 %v3885_v50  ;;  %v3949_v50 = vld [vmem:[#allocation10 + $0x20] sm:$0xff]  }
 0x1ca   :  { %v1608_v47 = vadd.f32 %v1607_v54, %v1567_v57  ;;  %v1569_v61 = vadd.f32 %v1568_v59, %v1528_v56  ;;  %v1611_v63 = vpop.f32.mrf.mxu0  ;;  %3400 = vmatprep.subr.bf16.mxu0 %v3942_v15  ;;  %v3950_v54 = vld [vmem:[#allocation10 + $0x58] sm:$0xff]   ;;  %v3952_v56 = vld [vmem:[#allocation10 + $0x50] sm:$0xff]   ;;  %v3955_v59 = vld [vmem:[#allocation10 + $0x8] sm:$0xff]  }
 0x1cb   :  { %v1570_v62 = vpop.f32.mrf.mxu1  ;;  %v3953_v57 = vld [vmem:[#allocation10 + $0x10] sm:$0xff]   ;;  %v3970_v15 = vld [vmem:[#allocation10 + $0xc8] sm:$0xff]  }
 0x1cc   :  { %v1616_v0 = vpack.c.bf16 %v1608_v47, %v1608_v47  ;;  %v1610_v1 = vadd.f32 %v1609_v60, %v1569_v61  ;;  %2563 = vmatmul.mubr.bf16.vlgmr.msra.gmra.mxu0 %v4223_v10  ;;  %v1612_v4 = vpop.f32.mrf.mxu0  ;;  %v3897_v10 = vld [vmem:[#allocation8 + $0x2c8] ss:$16 sps:$4 sm:$0xff]   ;;  %v3956_v60 = vld [vmem:[#allocation10 + $0x40] sm:$0xff]   ;;  %v3960_v62 = vld [vmem:[#allocation10 + $0xf0] sm:$0xff]  }
 0x1cd   :  { %v1571_v3 = vpop.f32.mrf.mxu1  ;;  %3401 = vmatpush3.bf16.msra.mxu0 %v3943_v17  ;;  %v3957_v47 = vld [vmem:[#allocation10] sm:$0xff]   ;;  %v3958_v61 = vld [vmem:[#allocation10 + $0xf8] sm:$0xff]   ;;  %v3961_v63 = vld [vmem:[#allocation10 + $0xb0] sm:$0xff]  }
 0x1ce   :  { %v1617_v5 = vpack.c.bf16 %v1610_v1, %v1610_v1  ;;  %v1674_v6 = vadd.bf16 %v1664_v48, %v1616_v0  ;;  %3402 = vmatprep.subr.bf16.mxu0 %v3944_v18  ;;  %v3959_v48 = vld [vmem:[#allocation10 + $0xb8] sm:$0xff]   ;;  %v3962_v0 = vld [vmem:[#allocation10 + $0xe8] sm:$0xff]   ;;  %v3965_v3 = vld [vmem:[#allocation10 + $0xa0] sm:$0xff]  }
 0x1cf   :  { %v3963_v1 = vld [vmem:[#allocation10 + $0xa8] sm:$0xff]   ;;  %v3966_v4 = vld [vmem:[#allocation10 + $0xd8] sm:$0xff]   ;;  %v3972_v18 = vld [vmem:[#allocation10 + $0xc0] sm:$0xff]  }
 0x1d0   :  { %v1675_v7 = vadd.bf16 %v1671_v2, %v1617_v5  ;;  %v4237_v13 = vmax.bf16 %v4111_v16, %v1674_v6  ;;  %v3964_v2 = vld [vmem:[#allocation10 + $0xe0] sm:$0xff]   ;;  %v3967_v5 = vld [vmem:[#allocation10 + $0x98] sm:$0xff]   ;;  %v3971_v17 = vld [vmem:[#allocation10 + $0x88] sm:$0xff]  }
 0x1d1   :  { %3403 = vmatpush3.bf16.msra.mxu0 %v3945_v22 }
 0x1d2   :  { %v1679_v11 = vmax.bf16 %v4111_v16, %v1675_v7  ;;  %3404 = vmatprep.subr.bf16.mxu0 %v3946_v23 }
 0x1d4   :  { %2521 = vmatprep.mubr.bf16.mxu1 %v1679_v11 }
 0x1d5   :  { %2522 = vmatmul.mubr.bf16.vlgmr.msra.gmra.mxu1 %v4237_v13  ;;  %3405 = vmatpush3.bf16.msra.mxu0 %v3947_v26 }
 0x1d6   :  { %2572 = vmatpush1.bf16.msra.mxu1 %v3894_v12  ;;  %2603 = vmatprep.mubr.bf16.mxu1 %v1679_v11 }
 0x1d7   :  { %2573 = vmatprep.subr.bf16.mxu1 %v3899_v14  ;;  %3406 = vmatprep.subr.bf16.mxu0 %v3948_v49  ;;  %v3969_v14 = vld [vmem:[#allocation10 + $0x90] sm:$0xff]  }
 0x1d9   :  { %3407 = vmatpush3.bf16.msra.mxu0 %v3949_v50 }
 0x1da   :  { %2574 = vmatpush1.bf16.msra.mxu1 %v3897_v10  ;;  %3408 = vmatprep.subr.bf16.mxu0 %v3950_v54  ;;  %v3973_v10 = vld [vmem:[#allocation10 + $0x80] sm:$0xff]  }
 0x1db   :  { %2575 = vmatprep.subr.bf16.mxu1 %v3902_v21  ;;  %v3366_v21 = vld.sshfl [vmem:[%s4264_s4] sm:$0x33 pattern:$0x75316420] }
 0x1dc   :  { %v2625_v22 = vcombine.high %v3366_v21, %v3366_v21 }
 0x1dd   :  { %3409 = vmatpush3.bf16.msra.mxu0 %v3951_v55 }
 0x1de   :  { %2576 = vmatpush1.bf16.msra.mxu1 %v3900_v24  ;;  %3410 = vmatprep.subr.bf16.mxu0 %v3952_v56  ;;  %v2639_v26 = vrot.slane %v2625_v22, %v4201_v45 }
 0x1df   :  { %2577 = vmatprep.subr.bf16.mxu1 %v3905_v25  ;;  %v2632_v25 = vrot.slane %v3366_v21, %v4201_v45 }
 0x1e1   :  { %3411 = vmatpush3.bf16.msra.mxu0 %v3953_v57 }
 0x1e2   :  { %2578 = vmatpush1.bf16.msra.mxu1 %v3903_v27  ;;  %3412 = vmatprep.subr.bf16.mxu0 %v3954_v58 }
 0x1e3   :  { %2579 = vmatprep.subr.bf16.mxu1 %v3908_v28 }
 0x1e5   :  { %3413 = vmatpush3.bf16.msra.mxu0 %v3955_v59 }
 0x1e6   :  { %2580 = vmatpush1.bf16.msra.mxu1 %v3906_v29  ;;  %3414 = vmatprep.subr.bf16.mxu0 %v3956_v60  ;;  %v2643_v29 = vpack.i.b16 %v2632_v25, %v2632_v25 }
 0x1e7   :  { %2581 = vmatprep.subr.bf16.mxu1 %v3911_v30  ;;  %v2650_v30 = vpack.i.b16 %v2639_v26, %v2639_v26 }
 0x1e9   :  { %3415 = vmatpush3.bf16.msra.mxu0 %v3957_v47 }
 0x1ea   :  { %2582 = vmatpush1.bf16.msra.mxu1 %v3909_v31 }
 0x1eb   :  { %2583 = vmatprep.subr.bf16.mxu1 %v3914_v32 }
 0x1ee   :  { %2584 = vmatpush1.bf16.msra.mxu1 %v3912_v9  ;;  %v2648_v9 = vrot.slane %v2643_v29, %v4211_v51 }
 0x1ef   :  { %2585 = vmatprep.subr.bf16.mxu1 %v3917_v33 }
 0x1f2   :  { %2586 = vmatpush1.bf16.msra.mxu1 %v3915_v34 }
 0x1f3   :  { %2587 = vmatprep.subr.bf16.mxu1 %v3920_v35 }
 0x1f6   :  { %2588 = vmatpush2.bf16.msra.mxu1 %v3918_v37  ;;  %v2655_v37 = vrot.slane %v2650_v30, %v4211_v51 }
 0x1f7   :  { %2589 = vmatprep.subr.bf16.mxu1 %v3923_v52 }
 0x1fa   :  { %2590 = vmatpush2.bf16.msra.mxu1 %v3921_v38 }
 0x1fb   :  { %2591 = vmatprep.subr.bf16.mxu1 %v3926_v20 }
 0x1fe   :  { %2592 = vmatpush2.bf16.msra.mxu1 %v3924_v19 }
 0x1ff   :  { %2593 = vmatprep.subr.bf16.mxu1 %v3929_v39 }
 0x202   :  { %2594 = vmatpush2.bf16.msra.mxu1 %v3927_v40 }
 0x203   :  { %2595 = vmatprep.subr.bf16.mxu1 %v3932_v8  ;;  %v2640_v8 = vcombine.high %v2632_v25, %v2632_v25 }
 0x206   :  { %2596 = vmatpush2.bf16.msra.mxu1 %v3930_v41  ;;  %v2641_v41 = vcombine.high %v2639_v26, %v2639_v26 }
 0x207   :  { %2597 = vmatprep.subr.bf16.mxu1 %v3935_v42  ;;  %v2657_v42 = vpack.i.b16 %v2640_v8, %v2640_v8 }
 0x20a   :  { %2598 = vmatpush2.bf16.msra.mxu1 %v3933_v43  ;;  %v2664_v43 = vpack.i.b16 %v2641_v41, %v2641_v41 }
 0x20b   :  { %2599 = vmatprep.subr.bf16.mxu1 %v3938_v36 }
 0x20c   :  { %v2669_v54 = vrot.slane %v2664_v43, %v4211_v51 }
 0x20e   :  { %2600 = vmatpush2.bf16.msra.mxu1 %v3936_v44 }
 0x20f   :  { %2601 = vmatprep.subr.bf16.mxu1 %v3941_v46  ;;  %v2662_v46 = vrot.slane %v2657_v42, %v4211_v51  ;;  %v3367_v51 = vld [vmem:[%s4266_s6] ss:$0 sm:$0xff] }
 0x212   :  { %2602 = vmatpush2.bf16.msra.mxu1 %v3939_v53 }
 0x213   :  { %3422 = vmatprep.subr.bf16.mxu1 %v3958_v61 }
 0x215   :  { %2604 = vmatmul.mubr.bf16.vlgmr.msra.gmra.mxu1 %v4237_v13  ;;  %v3968_v13 = vld [vmem:[#allocation10 + $0xd0] sm:$0xff]  }
 0x216   :  { %3423 = vmatpush3.bf16.msra.mxu1 %v3959_v48 }
 0x217   :  { %3424 = vmatprep.subr.bf16.mxu1 %v3960_v62 }
 0x21a   :  { %3425 = vmatpush3.bf16.msra.mxu1 %v3961_v63 }
 0x21b   :  { %3426 = vmatprep.subr.bf16.mxu1 %v3962_v0 }
 0x21e   :  { %3427 = vmatpush3.bf16.msra.mxu1 %v3963_v1 }
 0x21f   :  { %3428 = vmatprep.subr.bf16.mxu1 %v3964_v2 }
 0x222   :  { %3429 = vmatpush3.bf16.msra.mxu1 %v3965_v3 }
 0x223   :  { %3430 = vmatprep.subr.bf16.mxu1 %v3966_v4 }
 0x226   :  { %3431 = vmatpush3.bf16.msra.mxu1 %v3967_v5 }
 0x227   :  { %3432 = vmatprep.subr.bf16.mxu1 %v3968_v13 }
 0x22a   :  { %3433 = vmatpush3.bf16.msra.mxu1 %v3969_v14 }
 0x22b   :  { %3434 = vmatprep.subr.bf16.mxu1 %v3970_v15 }
 0x22e   :  { %3435 = vmatpush3.bf16.msra.mxu1 %v3971_v17 }
 0x22f   :  { %3436 = vmatprep.subr.bf16.mxu1 %v3972_v18 }
 0x232   :  { %3437 = vmatpush3.bf16.msra.mxu1 %v3973_v10 }
 0x24c   :  { %v2482_v6 = vpop.f32.mrf.mxu0 }
 0x24e   :  { %v2484_v7 = vpop.f32.mrf.mxu0 }
 0x250   :  { %v2486_v11 = vpop.f32.mrf.mxu0 }
 0x252   :  { %v2487_v12 = vpop.f32.mrf.mxu0 }
 0x28c   :  { %v2564_v23 = vpop.f32.mrf.mxu0 }
 0x28e   :  { %v2566_v24 = vpop.f32.mrf.mxu0 }
 0x290   :  { %v2568_v27 = vpop.f32.mrf.mxu0 }
 0x292   :  { %v2569_v28 = vpop.f32.mrf.mxu0 }
 0x295   :  { %v2523_v31 = vpop.f32.mrf.mxu1 }
 0x296   :  { %v2524_v32 = vadd.f32 %v2523_v31, %v2482_v6 }
 0x297   :  { %v2525_v33 = vpop.f32.mrf.mxu1 }
 0x298   :  { %v2612_v34 = vpack.c.bf16 %v2524_v32, %v2524_v32  ;;  %v2526_v35 = vadd.f32 %v2525_v33, %v2484_v7 }
 0x299   :  { %v2527_v52 = vpop.f32.mrf.mxu1 }
 0x29a   :  { %v2613_v38 = vpack.c.bf16 %v2526_v35, %v2526_v35  ;;  %v2670_v20 = vadd.bf16 %v2648_v9, %v2612_v34 }
 0x29b   :  { %v2528_v19 = vpop.f32.mrf.mxu1 }
 0x29c   :  { %v2671_v39 = vadd.bf16 %v2655_v37, %v2613_v38  ;;  %v2674_v40 = vmax.bf16 %v4111_v16, %v2670_v20 }
 0x29e   :  { %v2675_v45 = vmax.bf16 %v4111_v16, %v2671_v39 }
 0x2a0   :  { %2973 = vmatprep.mubr.bf16.mxu0 %v2675_v45 }
 0x2a1   :  { %2974 = vmatmul.mubr.bf16.vlgmr.msra.gmra.mxu0 %v2674_v40 }
 0x2d5   :  { %v2605_v36 = vpop.f32.mrf.mxu1 }
 0x2d6   :  { %v2606_v44 = vadd.f32 %v2605_v36, %v2564_v23 }
 0x2d7   :  { %v2607_v49 = vpop.f32.mrf.mxu1 }
 0x2d8   :  { %v2614_v50 = vpack.c.bf16 %v2606_v44, %v2606_v44  ;;  %v2608_v53 = vadd.f32 %v2607_v49, %v2566_v24 }
 0x2d9   :  { %v2609_v55 = vpop.f32.mrf.mxu1 }
 0x2da   :  { %v2615_v56 = vpack.c.bf16 %v2608_v53, %v2608_v53  ;;  %v2672_v57 = vadd.bf16 %v2662_v46, %v2614_v50 }
 0x2db   :  { %v2610_v58 = vpop.f32.mrf.mxu1 }
 0x2dc   :  { %v2673_v59 = vadd.bf16 %v2669_v54, %v2615_v56  ;;  %v2676_v47 = vmax.bf16 %v4111_v16, %v2672_v57 }
 0x2de   :  { %v2677_v60 = vmax.bf16 %v4111_v16, %v2673_v59 }
 0x2e0   :  { %3013 = vmatprep.mubr.bf16.mxu1 %v2677_v60 }
 0x2e1   :  { %3014 = vmatmul.mubr.bf16.vlgmr.msra.gmra.mxu1 %v2676_v47 }
 0x361   :  { %v3416_v61 = vpop.f32.mrf.mxu0 }
 0x363   :  { %v3417_v48 = vpop.f32.mrf.mxu0 }
 0x364   :  { %v3418_v0 = vadd.f32 %v3417_v48, %v3416_v61 }
 0x365   :  { %v3419_v62 = vpop.f32.mrf.mxu0 }
 0x366   :  { %v2976_v3 = vadd.f32 %v3418_v0, %v3367_v51 }
 0x367   :  { %v3420_v63 = vpop.f32.mrf.mxu0 }
 0x3a1   :  { %v3438_v1 = vpop.f32.mrf.mxu1 }
 0x3a3   :  { %v3439_v2 = vpop.f32.mrf.mxu1 }
 0x3a4   :  { %v3440_v4 = vadd.f32 %v3439_v2, %v3438_v1 }
 0x3a5   :  { %v3441_v5 = vpop.f32.mrf.mxu1 }
 0x3a6   :  { %v3016_v6 = vadd.f32 %v3440_v4, %v2976_v3 }
 0x3a7   :  { %v3442_v16 = vpop.f32.mrf.mxu1 }
 0x3a8   :  { %3021 = vst [vmem:[#allocation11] sm:$0xff] %v3016_v6 }
 0x3a9   :  { %4085 = shalt.err (!%p4082_p1)
}
 0x3aa   :  { %3031 = dma.vmem_to_hbm [thread:$0]  %s3029_s29, 128, %s4267_s7, [#allocation4]  }
 0x3ab   :  { %4100 = dma.done.wait [#allocation4], 128  }
 0x3ac   :  { %4101 = vsyncadd [#allocation4], 4294967168 }
 0x3ad   :  { %3035 = vsyncpa [#allocation3], 1 }
 0x3ae   :  { %3036 = vsyncpa [#allocation6], 1 }
 0x3af   :  { %3037 = vsyncpa [#allocation9], 1 }
 0x3b0   :  { %3038 = vsyncpa [#allocation4], 1 }

</bundles_post_ra>
